<compile_context>
chip_gen: v5e
topology: v5e:2x2
jax: 0.10.0
libtpu: 0.0.40
codegen_flags: <defaults>
</compile_context>

<pallas_src>
import jax
import jax.numpy as jnp
import numpy as np
from jax.experimental import pallas as pl
from jax.experimental.pallas import tpu as pltpu


# ----------------------------------------------------------------------------
# Kernel body (operates on the lane-packed layout).
# ----------------------------------------------------------------------------
def attsets_kernel(x_ref, w1_ref, b1_ref, w2_ref, b2_ref, y_ref):
    # x_ref : (V, tsp, PK) f32     w1_ref: (PK, PH) bf16   b1_ref: (1, PH) f32
    # w2_ref: (PH, PK) bf16        b2_ref: (1, PK) f32     y_ref : (tsp, PK) f32
    # where PK = pack*K, PH = pack*H and each packed row holds `pack` samples.
    V, tsp, PK = x_ref.shape

    x = x_ref[...]                                   # f32, kept for weighted sum
    x2 = x.reshape(V * tsp, PK)                      # leading-dim collapse: free
    x2_bf = x2.astype(jnp.bfloat16)                  # MXU operand only

    # --- MLP: two dense 2D matmuls on the MXU (bf16 in, f32 accumulate) ------
    # Block-diagonal weights make these the exact per-sample Linear layers.
    h = jnp.dot(x2_bf, w1_ref[...],
                preferred_element_type=jnp.float32)            # (V*tsp, PH)
    h = jnp.maximum(h + b1_ref[...], 0.0)                      # sublane bcast

    logits2 = jnp.dot(h.astype(jnp.bfloat16), w2_ref[...],
                      preferred_element_type=jnp.float32)      # (V*tsp, PK)
    logits2 = jnp.maximum(logits2 + b2_ref[...], 0.0)

    logits = logits2.reshape(V, tsp, PK)             # leading-dim expand: free

    # --- softmax over the view axis (dim 0): elementwise per (sample, feat) --
    m = jnp.max(logits, axis=0, keepdims=True)
    e = jnp.exp(logits - m)
    denom = jnp.sum(e, axis=0, keepdims=True)        # >= 1 after relu
    attn = e * pl.reciprocal(denom, approx=True)     # EUP vrcp: free slot

    # --- attention-weighted sum over views ------------------------------------
    y_ref[...] = jnp.sum(attn * x, axis=0).astype(y_ref.dtype)


# ----------------------------------------------------------------------------
# Generation-aware configuration helpers.
# ----------------------------------------------------------------------------
def _device_kind():
    try:
        return jax.devices()[0].device_kind.lower()
    except Exception:  # pragma: no cover
        return ""


def _default_pack(K):
    """Samples packed per 128/256-lane row.  v5e MXU is 128-deep -> target 128
    lanes; v6e/v7x MXUs are 256-deep -> target 256 lanes."""
    kind = _device_kind()
    target = 128 if "v5" in kind else 256
    return max(1, target // K)


def _num_tensorcores():
    """Only v7x has 2 TensorCores per chip; everything else here has 1."""
    return 2 if "v7" in _device_kind() else 1


def _auto_tile_sp(Sp, B, num_tc):
    """Tile size in packed rows.  Whole-set tiles (1 step) unless the batch
    axis is too small to feed all TensorCores (v7x), in which case split the
    sample axis into ~2*num_tc chunks (keeping the sublane multiple-of-8)."""
    if num_tc <= 1 or B >= 2 * num_tc:
        return Sp
    want_steps = -(-2 * num_tc // B)   # ceil
    t = Sp
    while (Sp // t) < want_steps and t % 16 == 0:
        t //= 2
    return t


def _block_diag(w, p):
    """(din, dout) -> (p*din, p*dout) with p copies of w on the diagonal."""
    eye = jnp.eye(p, dtype=w.dtype)
    return jnp.einsum("ij,kl->ikjl", eye, w).reshape(p * w.shape[0], p * w.shape[1])


# ----------------------------------------------------------------------------
# Wrappers.
# ----------------------------------------------------------------------------
def attsets_batch_many(x, w1, b1, w2, b2, *, pack=None, tile_sp=None):
    """x: [B, V, S, K] f32 -> y: [B, S, K] f32 (B independent sets, one launch)."""
    B, V, S, K = x.shape
    H = w1.shape[1]

    if pack is None:
        pack = _default_pack(K)
    while pack > 1 and S % pack != 0:
        pack //= 2
    PK, PH = pack * K, pack * H
    Sp = S // pack

    num_tc = _num_tensorcores()
    if tile_sp is None:
        tile_sp = _auto_tile_sp(Sp, B, num_tc)
    assert Sp % tile_sp == 0, "packed Nsamples must be divisible by tile_sp"
    assert tile_sp == Sp or tile_sp % 8 == 0, "tile must be a sublane multiple"

    # Lane-pack x: row-major contiguous reshape, no data movement.
    xp = x.reshape(B, V, Sp, PK)

    # Block-diagonal replicated weights (bf16 MXU operands) + tiled biases.
    w1_bd = _block_diag(w1, pack).astype(jnp.bfloat16)          # (PK, PH)
    w2_bd = _block_diag(w2, pack).astype(jnp.bfloat16)          # (PH, PK)
    b1_t = jnp.tile(b1.reshape(1, H), (1, pack)).astype(jnp.float32)   # (1, PH)
    b2_t = jnp.tile(b2.reshape(1, K), (1, pack)).astype(jnp.float32)   # (1, PK)

    grid = (B, Sp // tile_sp)

    cost = pl.CostEstimate(
        flops=int(4 * B * V * S * K * H),                 # two dense layers
        transcendentals=int(B * V * S * K),               # exp in the softmax
        bytes_accessed=int(4 * B * S * K * (V + 1)        # x read + y write
                           + 2 * 2 * PK * PH),            # bf16 weight blocks
    )

    yp = pl.pallas_call(
        attsets_kernel,
        out_shape=jax.ShapeDtypeStruct((B, Sp, PK), x.dtype),
        grid_spec=pltpu.PrefetchScalarGridSpec(
            num_scalar_prefetch=0,
            grid=grid,
            in_specs=[
                # x tile: one set, all views, tile_sp packed rows, 128/256 lanes.
                pl.BlockSpec((None, V, tile_sp, PK), lambda b, i: (b, 0, i, 0)),
                pl.BlockSpec((PK, PH), lambda b, i: (0, 0)),   # W1 block-diag
                pl.BlockSpec((1, PH), lambda b, i: (0, 0)),    # b1 tiled
                pl.BlockSpec((PH, PK), lambda b, i: (0, 0)),   # W2 block-diag
                pl.BlockSpec((1, PK), lambda b, i: (0, 0)),    # b2 tiled
            ],
            # Lane-dense (>=128-wide) unmasked output store.
            out_specs=pl.BlockSpec((None, tile_sp, PK), lambda b, i: (b, i, 0)),
        ),
        compiler_params=pltpu.CompilerParams(
            # Both grid axes are fully independent -> shardable across TCs (v7x).
            dimension_semantics=("parallel", "parallel"),
            # Explicit cap (cheap headroom): v7x has only 32 MiB scoped default.
            vmem_limit_bytes=64 * 1024 * 1024,
        ),
        cost_estimate=cost,
    )(xp, w1_bd, b1_t, w2_bd, b2_t)

    # Unpack: row-major contiguous reshape, free.
    return yp.reshape(B, S, K)


def attsets_batch(x, w1, b1, w2, b2, **kw):
    """Single set, matching the PyTorch module: x [V, S, K] -> y [S, K]."""
    return attsets_batch_many(x[None], w1, b1, w2, b2, **kw)[0]


def attsets_reference(x, w1, b1, w2, b2):
    """Pure-JAX f32 reference mirroring the PyTorch module."""
    h = jax.nn.relu(jnp.einsum("vsk,kh->vsh", x, w1) + b1)
    logits = jax.nn.relu(jnp.einsum("vsh,hk->vsk", h, w2) + b2)
    attn = jax.nn.softmax(logits, axis=0)
    return jnp.sum(attn * x, axis=0)


if __name__ == "__main__":
    # Small shapes consistent with the module's forward contract.
    V, S, K, H = 4, 512, 32, 64          # Nviews, Nsamples, dim_in, dim_hidden
    key = jax.random.PRNGKey(0)
    kx, kw1, kb1, kw2, kb2, kxb = jax.random.split(key, 6)

    x = jax.random.normal(kx, (V, S, K), dtype=jnp.float32)

    # Deterministic parameter init mimicking nn.Linear defaults
    # (uniform(-1/sqrt(fan_in), 1/sqrt(fan_in))). Stored pre-transposed as [in, out].
    lim1 = 1.0 / np.sqrt(K)
    lim2 = 1.0 / np.sqrt(H)
    w1 = jax.random.uniform(kw1, (K, H), jnp.float32, -lim1, lim1)
    b1 = jax.random.uniform(kb1, (1, H), jnp.float32, -lim1, lim1)
    w2 = jax.random.uniform(kw2, (H, K), jnp.float32, -lim2, lim2)
    b2 = jax.random.uniform(kb2, (1, K), jnp.float32, -lim2, lim2)

    # Single-set path (the PyTorch module's exact contract).
    y = jax.block_until_ready(attsets_batch(x, w1, b1, w2, b2))
    y_ref = jax.block_until_ready(attsets_reference(x, w1, b1, w2, b2))
    # Tolerance accounts for bf16 MXU operands + approximate EUP reciprocal;
    # all softmax / weighted-sum math stays f32.
    np.testing.assert_allclose(np.asarray(y), np.asarray(y_ref),
                               rtol=3e-2, atol=3e-2)
    assert y.shape == (S, K)

    # Batched path: many independent sets in a single pallas_call.
    B = 2
    xb = jax.random.normal(kxb, (B, V, S, K), dtype=jnp.float32)
    yb = jax.block_until_ready(attsets_batch_many(xb, w1, b1, w2, b2))
    yb_ref = jax.block_until_ready(
        jax.vmap(lambda xx: attsets_reference(xx, w1, b1, w2, b2))(xb))
    np.testing.assert_allclose(np.asarray(yb), np.asarray(yb_ref),
                               rtol=3e-2, atol=3e-2)
    assert yb.shape == (B, S, K)

    print("KERNEL_OK")
</pallas_src>

<mosaic_0001>
module attributes {stable_mosaic.version = 11 : i64} {
  func.func @attsets_kernel(%arg0: i32, %arg1: i32, %arg2: memref<1x4x64x256xf32, #tpu.memory_space<vmem>>, %arg3: memref<256x512xbf16, #tpu.memory_space<vmem>>, %arg4: memref<1x512xf32, #tpu.memory_space<vmem>>, %arg5: memref<512x256xbf16, #tpu.memory_space<vmem>>, %arg6: memref<1x256xf32, #tpu.memory_space<vmem>>, %arg7: memref<1x64x256xf32, #tpu.memory_space<vmem>>) attributes {dimension_semantics = [#tpu.dimension_semantics<parallel>, #tpu.dimension_semantics<parallel>], iteration_bounds = array<i64: 1, 1>, scalar_prefetch = 0 : i64, scratch_operands = 0 : i64, tpu.core_type = #tpu.core_type<tc>, window_params = [{transform_indices = @transform_0, window_bounds = array<i64: 1, 4, 64, 256>}, {pipeline_mode = #tpu.pipeline_mode<synchronous>, transform_indices = @transform_1, window_bounds = array<i64: 256, 512>}, {pipeline_mode = #tpu.pipeline_mode<synchronous>, transform_indices = @transform_2, window_bounds = array<i64: 1, 512>}, {pipeline_mode = #tpu.pipeline_mode<synchronous>, transform_indices = @transform_3, window_bounds = array<i64: 512, 256>}, {pipeline_mode = #tpu.pipeline_mode<synchronous>, transform_indices = @transform_4, window_bounds = array<i64: 1, 256>}, {transform_indices = @transform_5, window_bounds = array<i64: 1, 64, 256>}]} {
    %c0 = arith.constant 0 : index
    %c0_0 = arith.constant 0 : index
    %c0_1 = arith.constant 0 : index
    %c0_2 = arith.constant 0 : index
    %0 = vector.load %arg2[%c0, %c0_0, %c0_1, %c0_2] : memref<1x4x64x256xf32, #tpu.memory_space<vmem>>, vector<1x4x64x256xf32>
    %1 = vector.shape_cast %0 : vector<1x4x64x256xf32> to vector<4x64x256xf32>
    %2 = vector.shape_cast %1 : vector<4x64x256xf32> to vector<256x256xf32>
    %3 = arith.truncf %2 : vector<256x256xf32> to vector<256x256xbf16>
    %c0_3 = arith.constant 0 : index
    %c0_4 = arith.constant 0 : index
    %4 = vector.load %arg3[%c0_3, %c0_4] : memref<256x512xbf16, #tpu.memory_space<vmem>>, vector<256x512xbf16>
    %cst = arith.constant dense<0.000000e+00> : vector<256x512xf32>
    %5 = tpu.matmul %3, %4, %cst {dimension_numbers = #tpu.dot_dimension_numbers<[1], [0], [0], [1], [0, 0, 1, 1], [], []>} : vector<256x256xbf16>, vector<256x512xbf16>, vector<256x512xf32> -> vector<256x512xf32>
    %c0_5 = arith.constant 0 : index
    %c0_6 = arith.constant 0 : index
    %6 = vector.load %arg4[%c0_5, %c0_6] : memref<1x512xf32, #tpu.memory_space<vmem>>, vector<1x512xf32>
    %7 = vector.broadcast %6 : vector<1x512xf32> to vector<256x512xf32>
    %8 = arith.addf %5, %7 : vector<256x512xf32>
    %cst_7 = arith.constant 0.000000e+00 : f32
    %9 = vector.broadcast %cst_7 : f32 to vector<256x512xf32>
    %10 = arith.maximumf %8, %9 : vector<256x512xf32>
    %11 = arith.truncf %10 : vector<256x512xf32> to vector<256x512xbf16>
    %c0_8 = arith.constant 0 : index
    %c0_9 = arith.constant 0 : index
    %12 = vector.load %arg5[%c0_8, %c0_9] : memref<512x256xbf16, #tpu.memory_space<vmem>>, vector<512x256xbf16>
    %cst_10 = arith.constant dense<0.000000e+00> : vector<256x256xf32>
    %13 = tpu.matmul %11, %12, %cst_10 {dimension_numbers = #tpu.dot_dimension_numbers<[1], [0], [0], [1], [0, 0, 1, 1], [], []>} : vector<256x512xbf16>, vector<512x256xbf16>, vector<256x256xf32> -> vector<256x256xf32>
    %c0_11 = arith.constant 0 : index
    %c0_12 = arith.constant 0 : index
    %14 = vector.load %arg6[%c0_11, %c0_12] : memref<1x256xf32, #tpu.memory_space<vmem>>, vector<1x256xf32>
    %15 = vector.broadcast %14 : vector<1x256xf32> to vector<256x256xf32>
    %16 = arith.addf %13, %15 : vector<256x256xf32>
    %cst_13 = arith.constant 0.000000e+00 : f32
    %17 = vector.broadcast %cst_13 : f32 to vector<256x256xf32>
    %18 = arith.maximumf %16, %17 : vector<256x256xf32>
    %19 = vector.shape_cast %18 : vector<256x256xf32> to vector<4x64x256xf32>
    %cst_14 = arith.constant dense<0xFF800000> : vector<64x256xf32>
    %20 = vector.multi_reduction <maximumf>, %19, %cst_14 [0] : vector<4x64x256xf32> to vector<64x256xf32>
    %21 = vector.shape_cast %20 : vector<64x256xf32> to vector<1x64x256xf32>
    %22 = vector.broadcast %21 : vector<1x64x256xf32> to vector<4x64x256xf32>
    %23 = arith.subf %19, %22 : vector<4x64x256xf32>
    %24 = math.exp %23 : vector<4x64x256xf32>
    %cst_15 = arith.constant dense<0.000000e+00> : vector<64x256xf32>
    %25 = vector.multi_reduction <add>, %24, %cst_15 [0] : vector<4x64x256xf32> to vector<64x256xf32>
    %26 = vector.shape_cast %25 : vector<64x256xf32> to vector<1x64x256xf32>
    %27 = tpu.reciprocal %26 {approx = true} : vector<1x64x256xf32> -> vector<1x64x256xf32>
    %28 = vector.broadcast %27 : vector<1x64x256xf32> to vector<4x64x256xf32>
    %29 = arith.mulf %24, %28 : vector<4x64x256xf32>
    %30 = arith.mulf %29, %1 : vector<4x64x256xf32>
    %cst_16 = arith.constant dense<0.000000e+00> : vector<64x256xf32>
    %31 = vector.multi_reduction <add>, %30, %cst_16 [0] : vector<4x64x256xf32> to vector<64x256xf32>
    %c0_17 = arith.constant 0 : index
    %c0_18 = arith.constant 0 : index
    %c0_19 = arith.constant 0 : index
    %32 = vector.load %arg7[%c0_17, %c0_18, %c0_19] : memref<1x64x256xf32, #tpu.memory_space<vmem>>, vector<1x64x256xf32>
    %33 = vector.shape_cast %32 : vector<1x64x256xf32> to vector<64x256xf32>
    %34 = vector.shape_cast %31 : vector<64x256xf32> to vector<1x64x256xf32>
    tpu.vector_store %arg7[%c0_17, %c0_18, %c0_19], %34 {strides = array<i32>} : memref<1x64x256xf32, #tpu.memory_space<vmem>>, vector<1x64x256xf32>,
    return
  }
  func.func @transform_0(%arg0: i32, %arg1: i32) -> (i32, i32, i32, i32) {
    %c0_i32 = arith.constant 0 : i32
    %c0_i32_0 = arith.constant 0 : i32
    %c0_i32_1 = arith.constant 0 : i32
    return %arg0, %c0_i32, %arg1, %c0_i32_0 : i32, i32, i32, i32
  }
  func.func @transform_1(%arg0: i32, %arg1: i32) -> (i32, i32) {
    %c0_i32 = arith.constant 0 : i32
    %c0_i32_0 = arith.constant 0 : i32
    %c0_i32_1 = arith.constant 0 : i32
    return %c0_i32, %c0_i32_0 : i32, i32
  }
  func.func @transform_2(%arg0: i32, %arg1: i32) -> (i32, i32) {
    %c0_i32 = arith.constant 0 : i32
    %c0_i32_0 = arith.constant 0 : i32
    %c0_i32_1 = arith.constant 0 : i32
    return %c0_i32, %c0_i32_0 : i32, i32
  }
  func.func @transform_3(%arg0: i32, %arg1: i32) -> (i32, i32) {
    %c0_i32 = arith.constant 0 : i32
    %c0_i32_0 = arith.constant 0 : i32
    %c0_i32_1 = arith.constant 0 : i32
    return %c0_i32, %c0_i32_0 : i32, i32
  }
  func.func @transform_4(%arg0: i32, %arg1: i32) -> (i32, i32) {
    %c0_i32 = arith.constant 0 : i32
    %c0_i32_0 = arith.constant 0 : i32
    %c0_i32_1 = arith.constant 0 : i32
    return %c0_i32, %c0_i32_0 : i32, i32
  }
  func.func @transform_5(%arg0: i32, %arg1: i32) -> (i32, i32, i32) {
    %c0_i32 = arith.constant 0 : i32
    %c0_i32_0 = arith.constant 0 : i32
    return %arg0, %arg1, %c0_i32 : i32, i32, i32
  }
}

</mosaic_0001>

<bundles_post_ra>
// kernel: tpu_custom_call.1
= control target key start
LH: loop header
LB: loop body
LE: loop exit
PB: predicated region body
PF: predicated region fallthrough
CT: control target
= control target key end

     0   :  { %10 = vsyncpa [#allocation3], 0  ;;  %s5456_s0 = inlined_call_operand.hbm [shape: f32[1,4,64,256], index: 0, kind: input, shape index: {}]   ;;  %s5457_s1 = inlined_call_operand.hbm [shape: bf16[256,512], index: 1, kind: input, shape index: {}]   ;;  %s5458_s2 = inlined_call_operand.hbm [shape: f32[1,512], index: 2, kind: input, shape index: {}]   ;;  %s5459_s3 = inlined_call_operand.hbm [shape: bf16[512,256], index: 3, kind: input, shape index: {}]   ;;  %s5460_s4 = inlined_call_operand.vmem [shape: f32[1,256], index: 4, kind: input, shape index: {}]   ;;  %s5461_s5 = inlined_call_operand.hbm [shape: f32[1,64,256], index: 5, kind: output, shape index: {}]  }
   0x1   :  { %11 = vsyncpa [#allocation6], 0 }
   0x2   :  { %12 = vsyncpa [#allocation9], 0 }
   0x3   :  { %13 = vsyncpa [#allocation4], 0  ;;  %s31_s20 = sshll.u32 %s5457_s1, 4  ;;  %s4162_s21 = smov [#allocation5]   ;;  %s32_s20 = int_to_ptr.hbm [resolvable:$true] %s31_s20 }
   0x4   :  { %s33_s22 = sshll.u32 %s4162_s21, 4  ;;  %s18_s25 = sshll.u32 %s5456_s0, 4  ;;  %s34_s22 = int_to_ptr.vmem [resolvable:$true] %s33_s22  ;;  %s19_s25 = int_to_ptr.hbm [resolvable:$true] %s18_s25 }
   0x5   :  { %s4163_s26 = smov 256   ;;  %s4164_s27 = smov 16  }
   0x6   :  { %39 = dma.hbm_to_vmem [thread:$0]  %s32_s20, 8192, %s34_s22, [#allocation6], %s4163_s26, %s4163_s26, %s4164_s27  }
   0x7   :  { %s4165_s28 = smov [#allocation2]   ;;  %s45_s1 = sshll.u32 %s5458_s2, 4  ;;  %s46_s1 = int_to_ptr.hbm [resolvable:$true] %s45_s1 }
   0x8   :  { %s20_s29 = sshll.u32 %s4165_s28, 4  ;;  %s55_s8 = sshll.u32 %s5459_s3, 4  ;;  %s21_s29 = int_to_ptr.vmem [resolvable:$true] %s20_s29  ;;  %s56_s8 = int_to_ptr.hbm [resolvable:$true] %s55_s8 }
   0x9   :  { %26 = dma.hbm_to_vmem [thread:$0]  %s19_s25, 8192, %s21_s29, [#allocation3], %s4163_s26, %s4163_s26, %s4164_s27  }
   0xa   :  { %s4166_s9 = smov [#allocation7]   ;;  %s4167_s11 = smov [#allocation8]  }
   0xb   :  { %s47_s10 = sshll.u32 %s4166_s9, 4  ;;  %s57_s12 = sshll.u32 %s4167_s11, 4  ;;  %s48_s10 = int_to_ptr.vmem [resolvable:$true] %s47_s10  ;;  %s58_s12 = int_to_ptr.vmem [resolvable:$true] %s57_s12 }
   0xc   :  { %50 = dma.hbm_to_vmem [thread:$0]  %s46_s1, 64, %s48_s10, [#allocation6]  }
   0xd   :  { %s4168_s13 = smov 128   ;;  %s4169_s2 = smov 8  }
   0xe   :  { %63 = dma.hbm_to_vmem [thread:$0]  %s56_s8, 8192, %s58_s12, [#allocation9], %s4168_s13, %s4168_s13, %s4169_s2  }
   0xf   :  { %4154 = dma.done.wait [#allocation3], 8192  }
  0x10   :  { %4155 = vsyncadd [#allocation3], 4294959104 }
  0x11   :  { %4156 = dma.done.wait [#allocation6], 8256  }
  0x12   :  { %4157 = vsyncadd [#allocation6], 4294959040 }
  0x13   :  { %4158 = dma.done.wait [#allocation9], 8192  }
  0x14   :  { %4159 = vsyncadd [#allocation9], 4294959104  ;;  %v3273_v0 = vld [vmem:[#allocation5 + $0xe0] sm:$0xf]  ;;  %v3701_v1 = vld [vmem:[#allocation5 + $0xec] sm:$0xf0] }
  0x15   :  { %v3401_v2 = vld [vmem:[#allocation5 + $0x1e0] sm:$0xf]  ;;  %v3274_v3 = vor.u32 %v3701_v1, %v3273_v0  ;;  %v3733_v4 = vld [vmem:[#allocation5 + $0x1ec] sm:$0xf0]  ;;  %v3699_v5 = vld [vmem:[#allocation5 + $0xe4] sm:$0xf] }
  0x16   :  { %v3275_v6 = vld [vmem:[#allocation5 + $0xf0] sm:$0xf0]  ;;  %v3402_v7 = vor.u32 %v3733_v4, %v3401_v2  ;;  %v3731_v9 = vld [vmem:[#allocation5 + $0x1e4] sm:$0xf]  ;;  %v3257_v11 = vld [vmem:[#allocation5 + $0xc0] sm:$0xf] }
  0x17   :  { %v3278_v8 = vor.u32 %v3699_v5, %v3275_v6  ;;  %v3403_v10 = vld [vmem:[#allocation5 + $0x1f0] sm:$0xf0]  ;;  %572 = vmatpush.bf16.msra.mxu0 %v3274_v3  ;;  %v3697_v13 = vld [vmem:[#allocation5 + $0xcc] sm:$0xf0]  ;;  %v3385_v14 = vld [vmem:[#allocation5 + $0x1c0] sm:$0xf] }
  0x18   :  { %v3406_v12 = vor.u32 %v3731_v9, %v3403_v10  ;;  %v3729_v15 = vld [vmem:[#allocation5 + $0x1cc] sm:$0xf0]  ;;  %661 = vmatpush.bf16.msra.mxu1 %v3402_v7  ;;  %v3258_v16 = vor.u32 %v3697_v13, %v3257_v11  ;;  %v3695_v18 = vld [vmem:[#allocation5 + $0xc4] sm:$0xf]  ;;  %v3259_v19 = vld [vmem:[#allocation5 + $0xd0] sm:$0xf0] }
  0x19   :  { %750 = vmatpush.bf16.msra.mxu2 %v3278_v8  ;;  %v3386_v17 = vor.u32 %v3729_v15, %v3385_v14  ;;  %v3727_v20 = vld [vmem:[#allocation5 + $0x1c4] sm:$0xf]  ;;  %v3262_v21 = vor.u32 %v3695_v18, %v3259_v19  ;;  %v3387_v22 = vld [vmem:[#allocation5 + $0x1d0] sm:$0xf0]  ;;  %v3241_v23 = vld [vmem:[#allocation5 + $0xa0] sm:$0xf] }
  0x1a   :  { %839 = vmatpush.bf16.msra.mxu3 %v3406_v12  ;;  %v3693_v24 = vld [vmem:[#allocation5 + $0xac] sm:$0xf0]  ;;  %v3390_v25 = vor.u32 %v3727_v20, %v3387_v22  ;;  %v3369_v26 = vld [vmem:[#allocation5 + $0x1a0] sm:$0xf]  ;;  %v3691_v28 = vld [vmem:[#allocation5 + $0xa4] sm:$0xf] }
  0x1b   :  { %v3725_v27 = vld [vmem:[#allocation5 + $0x1ac] sm:$0xf0]  ;;  %573 = vmatpush.bf16.msra.mxu0 %v3258_v16  ;;  %v3242_v29 = vor.u32 %v3693_v24, %v3241_v23  ;;  %v3243_v30 = vld [vmem:[#allocation5 + $0xb0] sm:$0xf0]  ;;  %v3723_v31 = vld [vmem:[#allocation5 + $0x1a4] sm:$0xf] }
  0x1c   :  { %v3371_v32 = vld [vmem:[#allocation5 + $0x1b0] sm:$0xf0]  ;;  %662 = vmatpush.bf16.msra.mxu1 %v3386_v17  ;;  %v3370_v33 = vor.u32 %v3725_v27, %v3369_v26  ;;  %v3246_v34 = vor.u32 %v3691_v28, %v3243_v30  ;;  %v3225_v35 = vld [vmem:[#allocation5 + $0x80] sm:$0xf]  ;;  %v3689_v36 = vld [vmem:[#allocation5 + $0x8c] sm:$0xf0] }
  0x1d   :  { %751 = vmatpush.bf16.msra.mxu2 %v3262_v21  ;;  %v3353_v37 = vld [vmem:[#allocation5 + $0x180] sm:$0xf]  ;;  %v3374_v38 = vor.u32 %v3723_v31, %v3371_v32  ;;  %v3721_v39 = vld [vmem:[#allocation5 + $0x18c] sm:$0xf0]  ;;  %v3687_v40 = vld [vmem:[#allocation5 + $0x84] sm:$0xf]  ;;  %v3226_v44 = vor.u32 %v3689_v36, %v3225_v35 }
  0x1e   :  { %840 = vmatpush.bf16.msra.mxu3 %v3390_v25  ;;  %v3227_v41 = vld [vmem:[#allocation5 + $0x90] sm:$0xf0]  ;;  %v3719_v42 = vld [vmem:[#allocation5 + $0x184] sm:$0xf]  ;;  %v3354_v45 = vor.u32 %v3721_v39, %v3353_v37  ;;  %v3209_v47 = vld [vmem:[#allocation5 + $0x60] sm:$0xf] }
  0x1f   :  { %v3355_v43 = vld [vmem:[#allocation5 + $0x190] sm:$0xf0]  ;;  %574 = vmatpush.bf16.msra.mxu0 %v3242_v29  ;;  %v3230_v46 = vor.u32 %v3687_v40, %v3227_v41  ;;  %v3685_v48 = vld [vmem:[#allocation5 + $0x6c] sm:$0xf0]  ;;  %v3337_v49 = vld [vmem:[#allocation5 + $0x160] sm:$0xf] }
  0x20   :  { %663 = vmatpush.bf16.msra.mxu1 %v3370_v33  ;;  %v3358_v50 = vor.u32 %v3719_v42, %v3355_v43  ;;  %v3717_v51 = vld [vmem:[#allocation5 + $0x16c] sm:$0xf0]  ;;  %v3683_v52 = vld [vmem:[#allocation5 + $0x64] sm:$0xf]  ;;  %v3211_v53 = vld [vmem:[#allocation5 + $0x70] sm:$0xf0]  ;;  %v3210_v56 = vor.u32 %v3685_v48, %v3209_v47 }
  0x21   :  { %752 = vmatpush.bf16.msra.mxu2 %v3246_v34  ;;  %v3715_v54 = vld [vmem:[#allocation5 + $0x164] sm:$0xf]  ;;  %v3339_v55 = vld [vmem:[#allocation5 + $0x170] sm:$0xf0]  ;;  %v3338_v57 = vor.u32 %v3717_v51, %v3337_v49  ;;  %v3214_v58 = vor.u32 %v3683_v52, %v3211_v53  ;;  %v3193_v59 = vld [vmem:[#allocation5 + $0x40] sm:$0xf] }
  0x22   :  { %841 = vmatpush.bf16.msra.mxu3 %v3374_v38  ;;  %v3681_v60 = vld [vmem:[#allocation5 + $0x4c] sm:$0xf0]  ;;  %v3321_v61 = vld [vmem:[#allocation5 + $0x140] sm:$0xf]  ;;  %v3342_v62 = vor.u32 %v3715_v54, %v3339_v55  ;;  %v3679_v0 = vld [vmem:[#allocation5 + $0x44] sm:$0xf] }
  0x23   :  { %575 = vmatpush.bf16.msra.mxu0 %v3226_v44  ;;  %v3713_v63 = vld [vmem:[#allocation5 + $0x14c] sm:$0xf0]  ;;  %v3195_v1 = vld [vmem:[#allocation5 + $0x50] sm:$0xf0]  ;;  %v3711_v2 = vld [vmem:[#allocation5 + $0x144] sm:$0xf]  ;;  %v3194_v4 = vor.u32 %v3681_v60, %v3193_v59 }
  0x24   :  { %664 = vmatpush.bf16.msra.mxu1 %v3354_v45  ;;  %v3323_v3 = vld [vmem:[#allocation5 + $0x150] sm:$0xf0]  ;;  %v3322_v5 = vor.u32 %v3713_v63, %v3321_v61  ;;  %v3198_v6 = vor.u32 %v3679_v0, %v3195_v1  ;;  %v3177_v7 = vld [vmem:[#allocation5 + $0x20] sm:$0xf]  ;;  %v3677_v8 = vld [vmem:[#allocation5 + $0x2c] sm:$0xf0] }
  0x25   :  { %753 = vmatpush.bf16.msra.mxu2 %v3230_v46  ;;  %v3305_v9 = vld [vmem:[#allocation5 + $0x120] sm:$0xf]  ;;  %v3326_v10 = vor.u32 %v3711_v2, %v3323_v3  ;;  %v3709_v11 = vld [vmem:[#allocation5 + $0x12c] sm:$0xf0]  ;;  %v3675_v12 = vld [vmem:[#allocation5 + $0x24] sm:$0xf]  ;;  %v3178_v16 = vor.u32 %v3677_v8, %v3177_v7 }
  0x26   :  { %842 = vmatpush.bf16.msra.mxu3 %v3358_v50  ;;  %v3179_v13 = vld [vmem:[#allocation5 + $0x30] sm:$0xf0]  ;;  %v3707_v14 = vld [vmem:[#allocation5 + $0x124] sm:$0xf]  ;;  %v3161_v17 = vld [vmem:[#allocation5] sm:$0xf]  ;;  %v3306_v19 = vor.u32 %v3709_v11, %v3305_v9 }
  0x27   :  { %576 = vmatpush.bf16.msra.mxu0 %v3210_v56  ;;  %v3307_v15 = vld [vmem:[#allocation5 + $0x130] sm:$0xf0]  ;;  %v3673_v18 = vld [vmem:[#allocation5 + $0xc] sm:$0xf0]  ;;  %v3182_v20 = vor.u32 %v3675_v12, %v3179_v13  ;;  %v3289_v21 = vld [vmem:[#allocation5 + $0x100] sm:$0xf] }
  0x28   :  { %665 = vmatpush.bf16.msra.mxu1 %v3338_v57  ;;  %v3705_v22 = vld [vmem:[#allocation5 + $0x10c] sm:$0xf0]  ;;  %v3671_v23 = vld [vmem:[#allocation5 + $0x4] sm:$0xf]  ;;  %v3310_v24 = vor.u32 %v3707_v14, %v3307_v15  ;;  %v3163_v25 = vld [vmem:[#allocation5 + $0x10] sm:$0xf0]  ;;  %v3162_v31 = vor.u32 %v3673_v18, %v3161_v17 }
  0x29   :  { %754 = vmatpush.bf16.msra.mxu2 %v3214_v58  ;;  %v3703_v26 = vld [vmem:[#allocation5 + $0x104] sm:$0xf]  ;;  %v3291_v27 = vld [vmem:[#allocation5 + $0x110] sm:$0xf0]  ;;  %v3700_v29 = vld [vmem:[#allocation5 + $0xec] sm:$0xf]  ;;  %v3290_v35 = vor.u32 %v3705_v22, %v3289_v21  ;;  %v3166_v36 = vor.u32 %v3671_v23, %v3163_v25 }
  0x2a   :  { %843 = vmatpush.bf16.msra.mxu3 %v3342_v62  ;;  %v82_v28 = vld [vmem:[#allocation2] sm:$0xff]  ;;  %v3283_v30 = vld [vmem:[#allocation5 + $0xf8] sm:$0xf0]  ;;  %v84_v32 = vld [vmem:[#allocation2 + $0x10] sm:$0xff]  ;;  %v3294_v39 = vor.u32 %v3703_v26, %v3291_v27  ;;  %s3144_s20 = sshll.u32 %s5461_s5, 4  ;;  %s3145_s20 = int_to_ptr.hbm [resolvable:$true] %s3144_s20 }
  0x2b   :  { %577 = vmatpush.bf16.msra.mxu0 %v3194_v4  ;;  %v3732_v33 = vld [vmem:[#allocation5 + $0x1ec] sm:$0xf]  ;;  %v3411_v34 = vld [vmem:[#allocation5 + $0x1f8] sm:$0xf0]  ;;  %v3286_v40 = vor.u32 %v3700_v29, %v3283_v30  ;;  %v3281_v41 = vld [vmem:[#allocation5 + $0xe8] sm:$0xf]  ;;  %v4219_v43 = vpack.c.bf16 %v84_v32, %v82_v28 }
  0x2c   :  { %666 = vmatpush.bf16.msra.mxu1 %v3322_v5  ;;  %v83_v37 = vld [vmem:[#allocation2 + $0x8] sm:$0xff]  ;;  %v85_v38 = vld [vmem:[#allocation2 + $0x18] sm:$0xff]  ;;  %v3414_v44 = vor.u32 %v3732_v33, %v3411_v34  ;;  %v86_v62 = vld [vmem:[#allocation2 + $0x20] sm:$0xff] }
  0x2d   :  { %755 = vmatpush.bf16.msra.mxu2 %v3198_v6  ;;  %v3702_v42 = vld [vmem:[#allocation5 + $0xf4] sm:$0xf0]  ;;  %v3409_v45 = vld [vmem:[#allocation5 + $0x1e8] sm:$0xf]  ;;  %v4221_v47 = vpack.c.bf16 %v85_v38, %v83_v37  ;;  %v3696_v50 = vld [vmem:[#allocation5 + $0xcc] sm:$0xf] }
  0x2e   :  { %844 = vmatpush.bf16.msra.mxu3 %v3326_v10  ;;  %v3734_v46 = vld [vmem:[#allocation5 + $0x1f4] sm:$0xf0]  ;;  %v3282_v48 = vor.u32 %v3702_v42, %v3281_v41  ;;  %v3267_v51 = vld [vmem:[#allocation5 + $0xd8] sm:$0xf0]  ;;  %v3265_v52 = vld [vmem:[#allocation5 + $0xc8] sm:$0xf] }
  0x2f   :  { %578 = vmatpush.bf16.msra.mxu0 %v3178_v16  ;;  %v3410_v49 = vor.u32 %v3734_v46, %v3409_v45  ;;  %v3270_v53 = vor.u32 %v3696_v50, %v3267_v51  ;;  %v3698_v54 = vld [vmem:[#allocation5 + $0xd4] sm:$0xf0]  ;;  %v3728_v55 = vld [vmem:[#allocation5 + $0x1cc] sm:$0xf]  ;;  %v3395_v56 = vld [vmem:[#allocation5 + $0x1d8] sm:$0xf0] }
  0x30   :  { %667 = vmatpush.bf16.msra.mxu1 %v3306_v19  ;;  %v3266_v57 = vor.u32 %v3698_v54, %v3265_v52  ;;  %v3398_v58 = vor.u32 %v3728_v55, %v3395_v56  ;;  %v3393_v59 = vld [vmem:[#allocation5 + $0x1c8] sm:$0xf]  ;;  %v3730_v60 = vld [vmem:[#allocation5 + $0x1d4] sm:$0xf0]  ;;  %v88_v63 = vld [vmem:[#allocation2 + $0x30] sm:$0xff] }
  0x31   :  { %756 = vmatpush.bf16.msra.mxu2 %v3182_v20  ;;  %v3394_v61 = vor.u32 %v3730_v60, %v3393_v59  ;;  %v87_v0 = vld [vmem:[#allocation2 + $0x28] sm:$0xff]  ;;  %v89_v1 = vld [vmem:[#allocation2 + $0x38] sm:$0xff]  ;;  %v4227_v2 = vpack.c.bf16 %v88_v63, %v86_v62  ;;  %v90_v4 = vld [vmem:[#allocation2 + $0x40] sm:$0xff] }
  0x32   :  { %845 = vmatpush.bf16.msra.mxu3 %v3310_v24  ;;  %v4229_v3 = vpack.c.bf16 %v89_v1, %v87_v0  ;;  %v92_v5 = vld [vmem:[#allocation2 + $0x50] sm:$0xff]  ;;  %v91_v6 = vld [vmem:[#allocation2 + $0x48] sm:$0xff]  ;;  %v93_v7 = vld [vmem:[#allocation2 + $0x58] sm:$0xff] }
  0x33   :  { %579 = vmatpush.bf16.msra.mxu0 %v3162_v31  ;;  %v4235_v8 = vpack.c.bf16 %v92_v5, %v90_v4  ;;  %v4237_v9 = vpack.c.bf16 %v93_v7, %v91_v6  ;;  %v3692_v10 = vld [vmem:[#allocation5 + $0xac] sm:$0xf]  ;;  %v3251_v11 = vld [vmem:[#allocation5 + $0xb8] sm:$0xf0]  ;;  %v3249_v12 = vld [vmem:[#allocation5 + $0xa8] sm:$0xf] }
  0x34   :  { %668 = vmatpush.bf16.msra.mxu1 %v3290_v35  ;;  %v3254_v13 = vor.u32 %v3692_v10, %v3251_v11  ;;  %v3694_v14 = vld [vmem:[#allocation5 + $0xb4] sm:$0xf0]  ;;  %v3724_v15 = vld [vmem:[#allocation5 + $0x1ac] sm:$0xf]  ;;  %v3379_v16 = vld [vmem:[#allocation5 + $0x1b8] sm:$0xf0] }
  0x35   :  { %757 = vmatpush.bf16.msra.mxu2 %v3166_v36  ;;  %v3250_v17 = vor.u32 %v3694_v14, %v3249_v12  ;;  %v3382_v18 = vor.u32 %v3724_v15, %v3379_v16  ;;  %v3377_v19 = vld [vmem:[#allocation5 + $0x1a8] sm:$0xf]  ;;  %v3726_v20 = vld [vmem:[#allocation5 + $0x1b4] sm:$0xf0]  ;;  %v94_v22 = vld [vmem:[#allocation2 + $0x60] sm:$0xff] }
  0x36   :  { %846 = vmatpush.bf16.msra.mxu3 %v3294_v39  ;;  %580 = vmatmul.bf16.vlgmr.msra.gmra.mxu0 %v4219_v43  ;;  %v3378_v21 = vor.u32 %v3726_v20, %v3377_v19  ;;  %v96_v23 = vld [vmem:[#allocation2 + $0x70] sm:$0xff]  ;;  %v95_v24 = vld [vmem:[#allocation2 + $0x68] sm:$0xff]  ;;  %v97_v25 = vld [vmem:[#allocation2 + $0x78] sm:$0xff] }
  0x37   :  { %669 = vmatmul.bf16.vlgmr.msra.gmra.mxu1 %v4221_v47  ;;  %928 = vmatpush.bf16.msrb.mxu0 %v3282_v48  ;;  %v4243_v26 = vpack.c.bf16 %v96_v23, %v94_v22  ;;  %v4245_v27 = vpack.c.bf16 %v97_v25, %v95_v24  ;;  %v98_v28 = vld [vmem:[#allocation2 + $0x80] sm:$0xff]  ;;  %v100_v29 = vld [vmem:[#allocation2 + $0x90] sm:$0xff]  ;;  %v99_v30 = vld [vmem:[#allocation2 + $0x88] sm:$0xff] }
  0x38   :  { %758 = vmatmul.bf16.vlgmr.msra.gmra.mxu2 %v4219_v43  ;;  %1017 = vmatpush.bf16.msrb.mxu1 %v3410_v49  ;;  %v101_v31 = vld [vmem:[#allocation2 + $0x98] sm:$0xff]  ;;  %v4251_v32 = vpack.c.bf16 %v100_v29, %v98_v28  ;;  %v3688_v34 = vld [vmem:[#allocation5 + $0x8c] sm:$0xf]  ;;  %v3233_v36 = vld [vmem:[#allocation5 + $0x88] sm:$0xf] }
  0x39   :  { %1106 = vmatpush.bf16.msrb.mxu2 %v3286_v40  ;;  %847 = vmatmul.bf16.vlgmr.msra.gmra.mxu3 %v4221_v47  ;;  %v4253_v33 = vpack.c.bf16 %v101_v31, %v99_v30  ;;  %v3235_v35 = vld [vmem:[#allocation5 + $0x98] sm:$0xf0]  ;;  %v3690_v38 = vld [vmem:[#allocation5 + $0x94] sm:$0xf0]  ;;  %v3720_v39 = vld [vmem:[#allocation5 + $0x18c] sm:$0xf] }
  0x3a   :  { %1195 = vmatpush.bf16.msrb.mxu3 %v3414_v44  ;;  %v3238_v37 = vor.u32 %v3688_v34, %v3235_v35  ;;  %v3363_v40 = vld [vmem:[#allocation5 + $0x198] sm:$0xf0]  ;;  %v3234_v41 = vor.u32 %v3690_v38, %v3233_v36  ;;  %v3361_v44 = vld [vmem:[#allocation5 + $0x188] sm:$0xf]  ;;  %v3722_v45 = vld [vmem:[#allocation5 + $0x194] sm:$0xf0] }
  0x3b   :  { %929 = vmatpush.bf16.msrb.mxu0 %v3266_v57  ;;  %v3366_v42 = vor.u32 %v3720_v39, %v3363_v40  ;;  %v3362_v46 = vor.u32 %v3722_v45, %v3361_v44  ;;  %v102_v48 = vld [vmem:[#allocation2 + $0xa0] sm:$0xff]  ;;  %v104_v49 = vld [vmem:[#allocation2 + $0xb0] sm:$0xff]  ;;  %v103_v50 = vld [vmem:[#allocation2 + $0xa8] sm:$0xff] }
  0x3c   :  { %1018 = vmatpush.bf16.msrb.mxu1 %v3394_v61  ;;  %v105_v51 = vld [vmem:[#allocation2 + $0xb8] sm:$0xff]  ;;  %v4259_v52 = vpack.c.bf16 %v104_v49, %v102_v48  ;;  %v106_v54 = vld [vmem:[#allocation2 + $0xc0] sm:$0xff]  ;;  %v108_v55 = vld [vmem:[#allocation2 + $0xd0] sm:$0xff] }
  0x3d   :  { %1107 = vmatpush.bf16.msrb.mxu2 %v3270_v53  ;;  %v4261_v53 = vpack.c.bf16 %v105_v51, %v103_v50  ;;  %v107_v56 = vld [vmem:[#allocation2 + $0xc8] sm:$0xff]  ;;  %v109_v57 = vld [vmem:[#allocation2 + $0xd8] sm:$0xff]  ;;  %v110_v7 = vld [vmem:[#allocation2 + $0xe0] sm:$0xff] }
  0x3e   :  { %1196 = vmatpush.bf16.msrb.mxu3 %v3398_v58  ;;  %v4267_v58 = vpack.c.bf16 %v108_v55, %v106_v54  ;;  %v4269_v59 = vpack.c.bf16 %v109_v57, %v107_v56  ;;  %v3684_v60 = vld [vmem:[#allocation5 + $0x6c] sm:$0xf]  ;;  %v3219_v61 = vld [vmem:[#allocation5 + $0x78] sm:$0xf0]  ;;  %v3217_v62 = vld [vmem:[#allocation5 + $0x68] sm:$0xf] }
  0x3f   :  { %930 = vmatpush.bf16.msrb.mxu0 %v3250_v17  ;;  %v3222_v63 = vor.u32 %v3684_v60, %v3219_v61  ;;  %v3686_v0 = vld [vmem:[#allocation5 + $0x74] sm:$0xf0]  ;;  %v3716_v1 = vld [vmem:[#allocation5 + $0x16c] sm:$0xf]  ;;  %v3347_v4 = vld [vmem:[#allocation5 + $0x178] sm:$0xf0] }
  0x40   :  { %1019 = vmatpush.bf16.msrb.mxu1 %v3378_v21  ;;  %v3218_v5 = vor.u32 %v3686_v0, %v3217_v62  ;;  %v3350_v6 = vor.u32 %v3716_v1, %v3347_v4  ;;  %v112_v10 = vld [vmem:[#allocation2 + $0xf0] sm:$0xff]  ;;  %v3345_v11 = vld [vmem:[#allocation5 + $0x168] sm:$0xf]  ;;  %v3718_v12 = vld [vmem:[#allocation5 + $0x174] sm:$0xf0] }
  0x41   :  { %1108 = vmatpush.bf16.msrb.mxu2 %v3254_v13  ;;  %v111_v13 = vld [vmem:[#allocation2 + $0xe8] sm:$0xff]  ;;  %v113_v14 = vld [vmem:[#allocation2 + $0xf8] sm:$0xff]  ;;  %v3346_v15 = vor.u32 %v3718_v12, %v3345_v11  ;;  %v4275_v16 = vpack.c.bf16 %v112_v10, %v110_v7  ;;  %v114_v19 = vld [vmem:[#allocation2 + $0x100] sm:$0xff] }
  0x42   :  { %1197 = vmatpush.bf16.msrb.mxu3 %v3382_v18  ;;  %v4277_v17 = vpack.c.bf16 %v113_v14, %v111_v13  ;;  %v242_v18 = vld [vmem:[#allocation7] sm:$0xf]  ;;  %v116_v20 = vld [vmem:[#allocation2 + $0x110] sm:$0xff]  ;;  %v115_v22 = vld [vmem:[#allocation2 + $0x108] sm:$0xff] }
  0x43   :  { %931 = vmatpush.bf16.msrb.mxu0 %v3234_v41  ;;  %v4283_v21 = vperm.slane %v242_v18, 0  ;;  %v117_v23 = vld [vmem:[#allocation2 + $0x118] sm:$0xff]  ;;  %v4285_v24 = vpack.c.bf16 %v116_v20, %v114_v19  ;;  %v4293_v34 = vperm.slane %v242_v18, 1  ;;  %v3680_v35 = vld [vmem:[#allocation5 + $0x4c] sm:$0xf]  ;;  %v118_v56 = vld [vmem:[#allocation2 + $0x120] sm:$0xff] }
  0x44   :  { %1020 = vmatpush.bf16.msrb.mxu1 %v3362_v46  ;;  %v4287_v28 = vpack.c.bf16 %v117_v23, %v115_v22  ;;  %v3203_v36 = vld [vmem:[#allocation5 + $0x58] sm:$0xf0]  ;;  %v3201_v38 = vld [vmem:[#allocation5 + $0x48] sm:$0xf]  ;;  %v3682_v39 = vld [vmem:[#allocation5 + $0x54] sm:$0xf0] }
  0x45   :  { %1109 = vmatpush.bf16.msrb.mxu2 %v3238_v37  ;;  %v3206_v37 = vor.u32 %v3680_v35, %v3203_v36  ;;  %v3712_v40 = vld [vmem:[#allocation5 + $0x14c] sm:$0xf]  ;;  %v3331_v44 = vld [vmem:[#allocation5 + $0x158] sm:$0xf0]  ;;  %v120_v57 = vld [vmem:[#allocation2 + $0x130] sm:$0xff] }
  0x46   :  { %585 = vmatmul.bf16.gmra.mxu0 %v4227_v2  ;;  %1198 = vmatpush.bf16.msrb.mxu3 %v3366_v42  ;;  %v3202_v42 = vor.u32 %v3682_v39, %v3201_v38  ;;  %v3334_v49 = vor.u32 %v3712_v40, %v3331_v44  ;;  %v3329_v60 = vld [vmem:[#allocation5 + $0x148] sm:$0xf]  ;;  %v3714_v61 = vld [vmem:[#allocation5 + $0x154] sm:$0xf0]  ;;  %v4300_v7 = vpack.c.bf16 %v120_v57, %v118_v56  ;;  %v122_v39 = vld [vmem:[#allocation2 + $0x140] sm:$0xff] }
  0x47   :  { %674 = vmatmul.bf16.gmra.mxu1 %v4229_v3  ;;  %932 = vmatpush.bf16.msrb.mxu0 %v3218_v5  ;;  %v119_v0 = vld [vmem:[#allocation2 + $0x128] sm:$0xff]  ;;  %v121_v1 = vld [vmem:[#allocation2 + $0x138] sm:$0xff]  ;;  %v3330_v4 = vor.u32 %v3714_v61, %v3329_v60  ;;  %v124_v40 = vld [vmem:[#allocation2 + $0x150] sm:$0xff] }
  0x48   :  { %763 = vmatmul.bf16.gmra.mxu2 %v4227_v2  ;;  %1021 = vmatpush.bf16.msrb.mxu1 %v3346_v15  ;;  %v4303_v13 = vpack.c.bf16 %v121_v1, %v119_v0  ;;  %v123_v44 = vld [vmem:[#allocation2 + $0x148] sm:$0xff]  ;;  %v3187_v1 = vld [vmem:[#allocation5 + $0x38] sm:$0xf0] }
  0x49   :  { %852 = vmatmul.bf16.gmra.mxu3 %v4229_v3  ;;  %1110 = vmatpush.bf16.msrb.mxu2 %v3222_v63  ;;  %v3676_v0 = vld [vmem:[#allocation5 + $0x2c] sm:$0xf] }
  0x4a   :  { %1199 = vmatpush.bf16.msrb.mxu3 %v3350_v6 }
  0x4b   :  { %933 = vmatpush.bf16.msrb.mxu0 %v3202_v42 }
  0x4c   :  { %1022 = vmatpush.bf16.msrb.mxu1 %v3330_v4  ;;  %v3190_v4 = vor.u32 %v3676_v0, %v3187_v1 }
  0x4d   :  { %1111 = vmatpush.bf16.msrb.mxu2 %v3206_v37 }
  0x4e   :  { %1200 = vmatpush.bf16.msrb.mxu3 %v3334_v49 }
  0x51   :  { %1112 = vmatpush.bf16.msrb.mxu2 %v3190_v4 }
  0x56   :  { %590 = vmatmul.bf16.gmra.mxu0 %v4235_v8 }
  0x57   :  { %679 = vmatmul.bf16.gmra.mxu1 %v4237_v9 }
  0x58   :  { %768 = vmatmul.bf16.gmra.mxu2 %v4235_v8 }
  0x59   :  { %857 = vmatmul.bf16.gmra.mxu3 %v4237_v9 }
  0x66   :  { %595 = vmatmul.bf16.gmra.mxu0 %v4243_v26 }
  0x67   :  { %684 = vmatmul.bf16.gmra.mxu1 %v4245_v27 }
  0x68   :  { %773 = vmatmul.bf16.gmra.mxu2 %v4243_v26 }
  0x69   :  { %862 = vmatmul.bf16.gmra.mxu3 %v4245_v27 }
  0x76   :  { %600 = vmatmul.bf16.gmra.mxu0 %v4251_v32 }
  0x77   :  { %689 = vmatmul.bf16.gmra.mxu1 %v4253_v33 }
  0x78   :  { %778 = vmatmul.bf16.gmra.mxu2 %v4251_v32 }
  0x79   :  { %867 = vmatmul.bf16.gmra.mxu3 %v4253_v33 }
  0x86   :  { %605 = vmatmul.bf16.gmra.mxu0 %v4259_v52 }
  0x87   :  { %694 = vmatmul.bf16.gmra.mxu1 %v4261_v53 }
  0x88   :  { %783 = vmatmul.bf16.gmra.mxu2 %v4259_v52 }
  0x89   :  { %872 = vmatmul.bf16.gmra.mxu3 %v4261_v53 }
  0x96   :  { %610 = vmatmul.bf16.gmra.mxu0 %v4267_v58 }
  0x97   :  { %699 = vmatmul.bf16.gmra.mxu1 %v4269_v59 }
  0x98   :  { %788 = vmatmul.bf16.gmra.mxu2 %v4267_v58 }
  0x99   :  { %877 = vmatmul.bf16.gmra.mxu3 %v4269_v59 }
  0xa6   :  { %615 = vmatmul.bf16.gmra.mxu0 %v4275_v16 }
  0xa7   :  { %704 = vmatmul.bf16.gmra.mxu1 %v4277_v17 }
  0xa8   :  { %793 = vmatmul.bf16.gmra.mxu2 %v4275_v16 }
  0xa9   :  { %882 = vmatmul.bf16.gmra.mxu3 %v4277_v17 }
  0xb3   :  { %v581_v25 = vpop.f32.mrf.mxu0 }
  0xb4   :  { %v582_v29 = vadd.f32 %v581_v25, %v4283_v21  ;;  %v670_v30 = vpop.f32.mrf.mxu1 }
  0xb6   :  { %v671_v31 = vadd.f32 %v670_v30, %v582_v29  ;;  %620 = vmatmul.bf16.gmra.mxu0 %v4285_v24 }
  0xb7   :  { %709 = vmatmul.bf16.gmra.mxu1 %v4287_v28 }
  0xb8   :  { %798 = vmatmul.bf16.gmra.mxu2 %v4285_v24  ;;  %v1284_v62 = vmax.f32 %v671_v31, 0.0 }
  0xb9   :  { %887 = vmatmul.bf16.gmra.mxu3 %v4287_v28 }
  0xbb   :  { %v759_v41 = vpop.f32.mrf.mxu2  ;;  %v583_v48 = vpop.f32.mrf.mxu0 }
  0xbc   :  { %v760_v45 = vadd.f32 %v759_v41, %v4293_v34  ;;  %v848_v46 = vpop.f32.mrf.mxu3  ;;  %v584_v50 = vadd.f32 %v583_v48, %v4283_v21  ;;  %v672_v51 = vpop.f32.mrf.mxu1  ;;  %v4314_v48 = vpack.c.bf16 %v124_v40, %v122_v39  ;;  %v3710_v39 = vld [vmem:[#allocation5 + $0x134] sm:$0xf0] }
  0xbe   :  { %v849_v54 = vadd.f32 %v848_v46, %v760_v45  ;;  %v673_v55 = vadd.f32 %v672_v51, %v584_v50  ;;  %v125_v45 = vld [vmem:[#allocation2 + $0x158] sm:$0xff] }
  0xc0   :  { %v1288_v63 = vmax.f32 %v673_v55, 0.0  ;;  %v1285_v20 = vmax.f32 %v849_v54, 0.0  ;;  %v4319_v55 = vpack.c.bf16 %v125_v45, %v123_v44  ;;  %v129_v44 = vld [vmem:[#allocation2 + $0x178] sm:$0xff] }
  0xc2   :  { %v4298_v5 = vpack.c.bf16 %v1288_v63, %v1284_v62 }
  0xc3   :  { %v761_v6 = vpop.f32.mrf.mxu2  ;;  %v586_v12 = vpop.f32.mrf.mxu0 }
  0xc4   :  { %v762_v10 = vadd.f32 %v761_v6, %v4293_v34  ;;  %v850_v11 = vpop.f32.mrf.mxu3  ;;  %v587_v14 = vadd.f32 %v586_v12, %v4283_v21  ;;  %v675_v15 = vpop.f32.mrf.mxu1  ;;  %v3185_v6 = vld [vmem:[#allocation5 + $0x28] sm:$0xf] }
  0xc6   :  { %v851_v18 = vadd.f32 %v850_v11, %v762_v10  ;;  %v676_v19 = vadd.f32 %v675_v15, %v587_v14  ;;  %625 = vmatmul.bf16.gmra.mxu0 %v4300_v7  ;;  %v3678_v10 = vld [vmem:[#allocation5 + $0x34] sm:$0xf0]  ;;  %v3708_v11 = vld [vmem:[#allocation5 + $0x12c] sm:$0xf] }
  0xc7   :  { %714 = vmatmul.bf16.gmra.mxu1 %v4303_v13  ;;  %v3186_v15 = vor.u32 %v3678_v10, %v3185_v6 }
  0xc8   :  { %v1289_v22 = vmax.f32 %v851_v18, 0.0  ;;  %803 = vmatmul.bf16.gmra.mxu2 %v4300_v7  ;;  %v1292_v41 = vmax.f32 %v676_v19, 0.0  ;;  %v3315_v18 = vld [vmem:[#allocation5 + $0x138] sm:$0xf0] }
  0xc9   :  { %892 = vmatmul.bf16.gmra.mxu3 %v4303_v13  ;;  %934 = vmatpush.bf16.msrb.mxu0 %v3186_v15 }
  0xca   :  { %v4310_v23 = vpack.c.bf16 %v1289_v22, %v1285_v20 }
  0xcb   :  { %v764_v25 = vpop.f32.mrf.mxu2  ;;  %v588_v31 = vpop.f32.mrf.mxu0 }
  0xcc   :  { %v765_v29 = vadd.f32 %v764_v25, %v4293_v34  ;;  %v853_v30 = vpop.f32.mrf.mxu3  ;;  %v589_v35 = vadd.f32 %v588_v31, %v4283_v21  ;;  %v677_v36 = vpop.f32.mrf.mxu1  ;;  %v3318_v25 = vor.u32 %v3708_v11, %v3315_v18 }
  0xce   :  { %v854_v37 = vadd.f32 %v853_v30, %v765_v29  ;;  %v678_v38 = vadd.f32 %v677_v36, %v589_v35  ;;  %1201 = vmatpush.bf16.msrb.mxu3 %v3318_v25  ;;  %v126_v36 = vld [vmem:[#allocation2 + $0x160] sm:$0xff] }
  0xcf   :  { %v130_v25 = vld [vmem:[#allocation2 + $0x180] sm:$0xff] }
  0xd0   :  { %v1296_v42 = vmax.f32 %v678_v38, 0.0  ;;  %v1293_v62 = vmax.f32 %v854_v37, 0.0  ;;  %v128_v37 = vld [vmem:[#allocation2 + $0x170] sm:$0xff]  ;;  %v3313_v38 = vld [vmem:[#allocation5 + $0x128] sm:$0xf] }
  0xd1   :  { %v3314_v45 = vor.u32 %v3710_v39, %v3313_v38 }
  0xd2   :  { %v4316_v49 = vpack.c.bf16 %v1296_v42, %v1292_v41  ;;  %v127_v42 = vld [vmem:[#allocation2 + $0x168] sm:$0xff] }
  0xd3   :  { %v766_v46 = vpop.f32.mrf.mxu2  ;;  %v591_v54 = vpop.f32.mrf.mxu0  ;;  %1023 = vmatpush.bf16.msrb.mxu1 %v3314_v45 }
  0xd4   :  { %v767_v50 = vadd.f32 %v766_v46, %v4293_v34  ;;  %v855_v51 = vpop.f32.mrf.mxu3  ;;  %v592_v56 = vadd.f32 %v591_v54, %v4283_v21  ;;  %v680_v57 = vpop.f32.mrf.mxu1 }
  0xd6   :  { %v856_v60 = vadd.f32 %v855_v51, %v767_v50  ;;  %v681_v61 = vadd.f32 %v680_v57, %v592_v56  ;;  %630 = vmatmul.bf16.gmra.mxu0 %v4314_v48  ;;  %v4330_v50 = vpack.c.bf16 %v128_v37, %v126_v36  ;;  %v133_v36 = vld [vmem:[#allocation2 + $0x198] sm:$0xff] }
  0xd7   :  { %719 = vmatmul.bf16.gmra.mxu1 %v4319_v55 }
  0xd8   :  { %v1297_v63 = vmax.f32 %v856_v60, 0.0  ;;  %808 = vmatmul.bf16.gmra.mxu2 %v4314_v48  ;;  %v1300_v40 = vmax.f32 %v681_v61, 0.0  ;;  %v4335_v60 = vpack.c.bf16 %v129_v44, %v127_v42 }
  0xd9   :  { %897 = vmatmul.bf16.gmra.mxu3 %v4319_v55 }
  0xda   :  { %v4326_v12 = vpack.c.bf16 %v1297_v63, %v1293_v62 }
  0xdb   :  { %v769_v14 = vpop.f32.mrf.mxu2  ;;  %v593_v22 = vpop.f32.mrf.mxu0 }
  0xdc   :  { %v770_v19 = vadd.f32 %v769_v14, %v4293_v34  ;;  %v858_v20 = vpop.f32.mrf.mxu3  ;;  %v594_v29 = vadd.f32 %v593_v22, %v4283_v21  ;;  %v682_v30 = vpop.f32.mrf.mxu1 }
  0xde   :  { %v859_v31 = vadd.f32 %v858_v20, %v770_v19  ;;  %v683_v35 = vadd.f32 %v682_v30, %v594_v29  ;;  %v132_v29 = vld [vmem:[#allocation2 + $0x190] sm:$0xff] }
  0xdf   :  { %v4346_v38 = vpack.c.bf16 %v132_v29, %v130_v25 }
  0xe0   :  { %v1304_v41 = vmax.f32 %v683_v35, 0.0  ;;  %v1301_v1 = vmax.f32 %v859_v31, 0.0  ;;  %v131_v35 = vld [vmem:[#allocation2 + $0x188] sm:$0xff] }
  0xe1   :  { %v4351_v44 = vpack.c.bf16 %v133_v36, %v131_v35  ;;  %v134_v36 = vld [vmem:[#allocation2 + $0x1a0] sm:$0xff] }
  0xe2   :  { %v4332_v51 = vpack.c.bf16 %v1304_v41, %v1300_v40 }
  0xe3   :  { %v771_v46 = vpop.f32.mrf.mxu2  ;;  %v596_v57 = vpop.f32.mrf.mxu0 }
  0xe4   :  { %v772_v54 = vadd.f32 %v771_v46, %v4293_v34  ;;  %v860_v56 = vpop.f32.mrf.mxu3  ;;  %v597_v62 = vadd.f32 %v596_v57, %v4283_v21  ;;  %v685_v63 = vpop.f32.mrf.mxu1 }
  0xe6   :  { %v861_v61 = vadd.f32 %v860_v56, %v772_v54  ;;  %v686_v0 = vadd.f32 %v685_v63, %v597_v62  ;;  %635 = vmatmul.bf16.gmra.mxu0 %v4330_v50  ;;  %v3672_v63 = vld [vmem:[#allocation5 + $0xc] sm:$0xf] }
  0xe7   :  { %724 = vmatmul.bf16.gmra.mxu1 %v4335_v60 }
  0xe8   :  { %v1305_v4 = vmax.f32 %v861_v61, 0.0  ;;  %813 = vmatmul.bf16.gmra.mxu2 %v4330_v50  ;;  %v1308_v30 = vmax.f32 %v686_v0, 0.0  ;;  %v3171_v61 = vld [vmem:[#allocation5 + $0x18] sm:$0xf0] }
  0xe9   :  { %902 = vmatmul.bf16.gmra.mxu3 %v4335_v60  ;;  %v3174_v0 = vor.u32 %v3672_v63, %v3171_v61 }
  0xea   :  { %v4342_v6 = vpack.c.bf16 %v1305_v4, %v1301_v1  ;;  %v3169_v1 = vld [vmem:[#allocation5 + $0x8] sm:$0xf]  ;;  %v3674_v4 = vld [vmem:[#allocation5 + $0x14] sm:$0xf0] }
  0xeb   :  { %v774_v10 = vpop.f32.mrf.mxu2  ;;  %v598_v15 = vpop.f32.mrf.mxu0  ;;  %1113 = vmatpush.bf16.msrb.mxu2 %v3174_v0 }
  0xec   :  { %5546 = vst [vmem:[#allocation15_spill] sm:$0xff] %v4342_v6  ;;  %v775_v11 = vadd.f32 %v774_v10, %v4293_v34  ;;  %v863_v14 = vpop.f32.mrf.mxu3  ;;  %v599_v18 = vadd.f32 %v598_v15, %v4283_v21  ;;  %v687_v19 = vpop.f32.mrf.mxu1  ;;  %v3704_v10 = vld [vmem:[#allocation5 + $0x10c] sm:$0xf]  ;;  %v3170_v15 = vor.u32 %v3674_v4, %v3169_v1 }
  0xee   :  { %v864_v20 = vadd.f32 %v863_v14, %v775_v11  ;;  %v688_v22 = vadd.f32 %v687_v19, %v599_v18  ;;  %v3299_v18 = vld [vmem:[#allocation5 + $0x118] sm:$0xf0]  ;;  %935 = vmatpush.bf16.msrb.mxu0 %v3170_v15 }
  0xef   :  { %v3302_v25 = vor.u32 %v3704_v10, %v3299_v18 }
  0xf0   :  { %v1312_v31 = vmax.f32 %v688_v22, 0.0  ;;  %v1309_v57 = vmax.f32 %v864_v20, 0.0 }
  0xf1   :  { %1202 = vmatpush.bf16.msrb.mxu3 %v3302_v25 }
  0xf2   :  { %v4348_v39 = vpack.c.bf16 %v1312_v31, %v1308_v30 }
  0xf3   :  { %v776_v37 = vpop.f32.mrf.mxu2  ;;  %v601_v42 = vpop.f32.mrf.mxu0 }
  0xf4   :  { %v777_v40 = vadd.f32 %v776_v37, %v4293_v34  ;;  %v865_v41 = vpop.f32.mrf.mxu3  ;;  %v602_v45 = vadd.f32 %v601_v42, %v4283_v21  ;;  %v690_v46 = vpop.f32.mrf.mxu1  ;;  %v136_v37 = vld [vmem:[#allocation2 + $0x1b0] sm:$0xff] }
  0xf5   :  { %v4362_v63 = vpack.c.bf16 %v136_v37, %v134_v36 }
  0xf6   :  { %v866_v54 = vadd.f32 %v865_v41, %v777_v40  ;;  %v691_v56 = vadd.f32 %v690_v46, %v602_v45  ;;  %640 = vmatmul.bf16.gmra.mxu0 %v4346_v38  ;;  %v3297_v40 = vld [vmem:[#allocation5 + $0x108] sm:$0xf]  ;;  %v3706_v41 = vld [vmem:[#allocation5 + $0x114] sm:$0xf0] }
  0xf7   :  { %729 = vmatmul.bf16.gmra.mxu1 %v4351_v44  ;;  %v135_v46 = vld [vmem:[#allocation2 + $0x1a8] sm:$0xff] }
  0xf8   :  { %v1313_v62 = vmax.f32 %v866_v54, 0.0  ;;  %818 = vmatmul.bf16.gmra.mxu2 %v4346_v38  ;;  %v1316_v42 = vmax.f32 %v691_v56, 0.0  ;;  %v137_v54 = vld [vmem:[#allocation2 + $0x1b8] sm:$0xff] }
  0xf9   :  { %907 = vmatmul.bf16.gmra.mxu3 %v4351_v44  ;;  %v4367_v10 = vpack.c.bf16 %v137_v54, %v135_v46  ;;  %v139_v54 = vld [vmem:[#allocation2 + $0x1c8] sm:$0xff] }
  0xfa   :  { %v4358_v11 = vpack.c.bf16 %v1313_v62, %v1309_v57  ;;  %v3298_v57 = vor.u32 %v3706_v41, %v3297_v40 }
  0xfb   :  { %v779_v14 = vpop.f32.mrf.mxu2  ;;  %v603_v22 = vpop.f32.mrf.mxu0 }
  0xfc   :  { %v780_v19 = vadd.f32 %v779_v14, %v4293_v34  ;;  %v868_v20 = vpop.f32.mrf.mxu3  ;;  %v604_v29 = vadd.f32 %v603_v22, %v4283_v21  ;;  %v692_v30 = vpop.f32.mrf.mxu1  ;;  %1024 = vmatpush.bf16.msrb.mxu1 %v3298_v57  ;;  %v141_v57 = vld [vmem:[#allocation2 + $0x1d8] sm:$0xff] }
  0xfe   :  { %v869_v31 = vadd.f32 %v868_v20, %v780_v19  ;;  %v693_v35 = vadd.f32 %v692_v30, %v604_v29 }
 0x100   :  { %v1320_v45 = vmax.f32 %v693_v35, 0.0  ;;  %v1317_v19 = vmax.f32 %v869_v31, 0.0  ;;  %v138_v31 = vld [vmem:[#allocation2 + $0x1c0] sm:$0xff] }
 0x102   :  { %v4364_v61 = vpack.c.bf16 %v1320_v45, %v1316_v42  ;;  %v140_v42 = vld [vmem:[#allocation2 + $0x1d0] sm:$0xff] }
 0x103   :  { %v781_v62 = vpop.f32.mrf.mxu2  ;;  %v606_v4 = vpop.f32.mrf.mxu0 }
 0x104   :  { %5547 = vst [vmem:[#allocation16_spill] sm:$0xff] %v4364_v61  ;;  %v782_v0 = vadd.f32 %v781_v62, %v4293_v34  ;;  %v870_v1 = vpop.f32.mrf.mxu3  ;;  %v607_v14 = vadd.f32 %v606_v4, %v4283_v21  ;;  %v695_v15 = vpop.f32.mrf.mxu1 }
 0x106   :  { %v871_v56 = vadd.f32 %v870_v1, %v782_v0  ;;  %v696_v18 = vadd.f32 %v695_v15, %v607_v14  ;;  %645 = vmatmul.bf16.gmra.mxu0 %v4362_v63  ;;  %v4378_v0 = vpack.c.bf16 %v140_v42, %v138_v31  ;;  %v3750_v31 = vld [vmem:[#allocation8 + $0x74] sm:$0xf0]  ;;  %v3665_v42 = vld [vmem:[#allocation8 + $0x1f0] sm:$0xf] }
 0x107   :  { %734 = vmatmul.bf16.gmra.mxu1 %v4367_v10 }
 0x108   :  { %v1321_v20 = vmax.f32 %v871_v56, 0.0  ;;  %823 = vmatmul.bf16.gmra.mxu2 %v4362_v63  ;;  %v1324_v45 = vmax.f32 %v696_v18, 0.0  ;;  %v4383_v56 = vpack.c.bf16 %v141_v57, %v139_v54  ;;  %v3798_v57 = vld [vmem:[#allocation8 + $0x1f4] sm:$0xf0] }
 0x109   :  { %912 = vmatmul.bf16.gmra.mxu3 %v4367_v10 }
 0x10a   :  { %v4374_v22 = vpack.c.bf16 %v1321_v20, %v1317_v19 }
 0x10b   :  { %v784_v25 = vpop.f32.mrf.mxu2  ;;  %v608_v35 = vpop.f32.mrf.mxu0 }
 0x10c   :  { %5548 = vst [vmem:[#allocation17_spill] sm:$0xff] %v4374_v22  ;;  %v785_v29 = vadd.f32 %v784_v25, %v4293_v34  ;;  %v873_v30 = vpop.f32.mrf.mxu3  ;;  %v609_v36 = vadd.f32 %v608_v35, %v4283_v21  ;;  %v697_v37 = vpop.f32.mrf.mxu1  ;;  %v3601_v35 = vld [vmem:[#allocation8 + $0x170] sm:$0xf] }
 0x10e   :  { %v874_v40 = vadd.f32 %v873_v30, %v785_v29  ;;  %v698_v41 = vadd.f32 %v697_v37, %v609_v36  ;;  %v3782_v36 = vld [vmem:[#allocation8 + $0x174] sm:$0xf0] }
 0x10f   :  { %v3602_v37 = vor.u32 %v3782_v36, %v3601_v35  ;;  %v142_v35 = vld [vmem:[#allocation2 + $0x1e0] sm:$0xff]  ;;  %v144_v36 = vld [vmem:[#allocation2 + $0x1f0] sm:$0xff] }
 0x110   :  { %v1328_v46 = vmax.f32 %v698_v41, 0.0  ;;  %v1325_v18 = vmax.f32 %v874_v40, 0.0  ;;  %v3473_v41 = vld [vmem:[#allocation8 + $0x70] sm:$0xf]  ;;  %v4394_v61 = vpack.c.bf16 %v144_v36, %v142_v35 }
 0x111   :  { %v3474_v54 = vor.u32 %v3750_v31, %v3473_v41  ;;  %2044 = vmatpush.bf16.msra.mxu2 %v3602_v37  ;;  %v143_v31 = vld [vmem:[#allocation2 + $0x1e8] sm:$0xff] }
 0x112   :  { %v4380_v1 = vpack.c.bf16 %v1328_v46, %v1324_v45 }
 0x113   :  { %v786_v62 = vpop.f32.mrf.mxu2  ;;  %v611_v15 = vpop.f32.mrf.mxu0  ;;  %1866 = vmatpush.bf16.msra.mxu0 %v3474_v54 }
 0x114   :  { %5549 = vst [vmem:[#allocation18_spill] sm:$0xff] %v4380_v1  ;;  %v787_v4 = vadd.f32 %v786_v62, %v4293_v34  ;;  %v875_v14 = vpop.f32.mrf.mxu3  ;;  %v612_v19 = vadd.f32 %v611_v15, %v4283_v21  ;;  %v700_v20 = vpop.f32.mrf.mxu1  ;;  %v145_v1 = vld [vmem:[#allocation2 + $0x1f8] sm:$0xff] }
 0x116   :  { %v876_v25 = vadd.f32 %v875_v14, %v787_v4  ;;  %v701_v29 = vadd.f32 %v700_v20, %v612_v19  ;;  %650 = vmatmul.bf16.gmra.mxu0 %v4378_v0  ;;  %v3666_v14 = vor.u32 %v3798_v57, %v3665_v42 }
 0x117   :  { %739 = vmatmul.bf16.gmra.mxu1 %v4383_v56 }
 0x118   :  { %v1329_v30 = vmax.f32 %v876_v25, 0.0  ;;  %828 = vmatmul.bf16.gmra.mxu2 %v4378_v0  ;;  %2133 = vmatpush.bf16.msra.mxu3 %v3666_v14 }
 0x119   :  { %917 = vmatmul.bf16.gmra.mxu3 %v4383_v56 }
 0x11a   :  { %v4390_v45 = vpack.c.bf16 %v1329_v30, %v1325_v18  ;;  %v3537_v18 = vld [vmem:[#allocation8 + $0xf0] sm:$0xf]  ;;  %v3766_v30 = vld [vmem:[#allocation8 + $0xf4] sm:$0xf0] }
 0x11b   :  { %v789_v46 = vpop.f32.mrf.mxu2  ;;  %v613_v4 = vpop.f32.mrf.mxu0 }
 0x11c   :  { %5550 = vst [vmem:[#allocation19_spill] sm:$0xff] %v4390_v45  ;;  %v790_v40 = vadd.f32 %v789_v46, %v4293_v34  ;;  %v878_v62 = vpop.f32.mrf.mxu3  ;;  %v614_v15 = vadd.f32 %v613_v4, %v4283_v21  ;;  %v702_v19 = vpop.f32.mrf.mxu1  ;;  %v1332_v45 = vmax.f32 %v701_v29, 0.0  ;;  %v3538_v46 = vor.u32 %v3766_v30, %v3537_v18 }
 0x11e   :  { %v879_v20 = vadd.f32 %v878_v62, %v790_v40  ;;  %v703_v25 = vadd.f32 %v702_v19, %v614_v15  ;;  %1955 = vmatpush.bf16.msra.mxu1 %v3538_v46  ;;  %v4399_v40 = vpack.c.bf16 %v145_v1, %v143_v31 }
 0x120   :  { %v1336_v41 = vmax.f32 %v703_v25, 0.0  ;;  %v1333_v15 = vmax.f32 %v879_v20, 0.0 }
 0x122   :  { %v4396_v37 = vpack.c.bf16 %v1336_v41, %v1332_v45 }
 0x123   :  { %v791_v22 = vpop.f32.mrf.mxu2  ;;  %v616_v57 = vpop.f32.mrf.mxu0 }
 0x124   :  { %v792_v42 = vadd.f32 %v791_v22, %v4293_v34  ;;  %v880_v54 = vpop.f32.mrf.mxu3  ;;  %v617_v62 = vadd.f32 %v616_v57, %v4283_v21  ;;  %v705_v4 = vpop.f32.mrf.mxu1 }
 0x126   :  { %v881_v29 = vadd.f32 %v880_v54, %v792_v42  ;;  %v706_v14 = vadd.f32 %v705_v4, %v617_v62  ;;  %655 = vmatmul.bf16.gmra.mxu0 %v4394_v61 }
 0x127   :  { %744 = vmatmul.bf16.gmra.mxu1 %v4399_v40 }
 0x128   :  { %v1337_v19 = vmax.f32 %v881_v29, 0.0  ;;  %833 = vmatmul.bf16.gmra.mxu2 %v4394_v61  ;;  %v1340_v20 = vmax.f32 %v706_v14, 0.0  ;;  %v3593_v14 = vld [vmem:[#allocation8 + $0x160] sm:$0xf] }
 0x129   :  { %922 = vmatmul.bf16.gmra.mxu3 %v4399_v40 }
 0x12a   :  { %v4406_v22 = vpack.c.bf16 %v1337_v19, %v1333_v15 }
 0x12b   :  { %v794_v45 = vpop.f32.mrf.mxu2  ;;  %v618_v35 = vpop.f32.mrf.mxu0 }
 0x12c   :  { %5551 = vst [vmem:[#allocation20_spill] sm:$0xff] %v4406_v22  ;;  %v795_v1 = vadd.f32 %v794_v45, %v4293_v34  ;;  %v883_v25 = vpop.f32.mrf.mxu3  ;;  %v619_v36 = vadd.f32 %v618_v35, %v4283_v21  ;;  %v707_v18 = vpop.f32.mrf.mxu1 }
 0x12e   :  { %v884_v30 = vadd.f32 %v883_v25, %v795_v1  ;;  %v708_v41 = vadd.f32 %v707_v18, %v619_v36  ;;  %v3780_v1 = vld [vmem:[#allocation8 + $0x164] sm:$0xf0]  ;;  %v3465_v36 = vld [vmem:[#allocation8 + $0x60] sm:$0xf] }
 0x12f   :  { %v3594_v25 = vor.u32 %v3780_v1, %v3593_v14  ;;  %v3748_v18 = vld [vmem:[#allocation8 + $0x64] sm:$0xf0]  ;;  %v3529_v14 = vld [vmem:[#allocation8 + $0xe0] sm:$0xf] }
 0x130   :  { %v1344_v31 = vmax.f32 %v708_v41, 0.0  ;;  %v1341_v45 = vmax.f32 %v884_v30, 0.0  ;;  %v3657_v41 = vld [vmem:[#allocation8 + $0x1e0] sm:$0xf]  ;;  %v3764_v1 = vld [vmem:[#allocation8 + $0xe4] sm:$0xf0] }
 0x131   :  { %2045 = vmatpush.bf16.msra.mxu2 %v3594_v25 }
 0x132   :  { %v4410_v42 = vpack.c.bf16 %v1344_v31, %v1340_v20 }
 0x133   :  { %v796_v46 = vpop.f32.mrf.mxu2  ;;  %v621_v62 = vpop.f32.mrf.mxu0 }
 0x134   :  { %v797_v54 = vadd.f32 %v796_v46, %v4293_v34  ;;  %v885_v57 = vpop.f32.mrf.mxu3  ;;  %v622_v4 = vadd.f32 %v621_v62, %v4283_v21  ;;  %v710_v29 = vpop.f32.mrf.mxu1  ;;  %v3466_v46 = vor.u32 %v3748_v18, %v3465_v36 }
 0x136   :  { %v886_v15 = vadd.f32 %v885_v57, %v797_v54  ;;  %v711_v19 = vadd.f32 %v710_v29, %v622_v4  ;;  %936 = vmatmul.bf16.vlgmr.msrb.gmra.mxu0 %v4219_v43  ;;  %v3796_v54 = vld [vmem:[#allocation8 + $0x1e4] sm:$0xf0] }
 0x137   :  { %1025 = vmatmul.bf16.vlgmr.msrb.gmra.mxu1 %v4221_v47  ;;  %v3658_v4 = vor.u32 %v3796_v54, %v3657_v41  ;;  %1867 = vmatpush.bf16.msra.mxu0 %v3466_v46 }
 0x138   :  { %v1345_v35 = vmax.f32 %v886_v15, 0.0  ;;  %1114 = vmatmul.bf16.vlgmr.msrb.gmra.mxu2 %v4219_v43 }
 0x139   :  { %1203 = vmatmul.bf16.vlgmr.msrb.gmra.mxu3 %v4221_v47 }
 0x13a   :  { %v4418_v20 = vpack.c.bf16 %v1345_v35, %v1341_v45  ;;  %2134 = vmatpush.bf16.msra.mxu3 %v3658_v4  ;;  %v1348_v45 = vmax.f32 %v711_v19, 0.0 }
 0x13b   :  { %v799_v31 = vpop.f32.mrf.mxu2  ;;  %v623_v62 = vpop.f32.mrf.mxu0 }
 0x13c   :  { %5552 = vst [vmem:[#allocation21_spill] sm:$0xff] %v4418_v20  ;;  %v800_v30 = vadd.f32 %v799_v31, %v4293_v34  ;;  %v888_v57 = vpop.f32.mrf.mxu3  ;;  %v624_v43 = vadd.f32 %v623_v62, %v4283_v21  ;;  %v712_v47 = vpop.f32.mrf.mxu1  ;;  %v3530_v20 = vor.u32 %v3764_v1, %v3529_v14 }
 0x13e   :  { %v889_v29 = vadd.f32 %v888_v57, %v800_v30  ;;  %v713_v15 = vadd.f32 %v712_v47, %v624_v43  ;;  %1956 = vmatpush.bf16.msra.mxu1 %v3530_v20 }
 0x140   :  { %v1352_v35 = vmax.f32 %v713_v15, 0.0  ;;  %v1349_v57 = vmax.f32 %v889_v29, 0.0 }
 0x142   :  { %v4422_v18 = vpack.c.bf16 %v1352_v35, %v1348_v45 }
 0x143   :  { %v801_v36 = vpop.f32.mrf.mxu2  ;;  %v626_v41 = vpop.f32.mrf.mxu0 }
 0x144   :  { %5553 = vst [vmem:[#allocation22_spill] sm:$0xff] %v4422_v18  ;;  %v802_v31 = vadd.f32 %v801_v36, %v4293_v34  ;;  %v890_v25 = vpop.f32.mrf.mxu3  ;;  %v627_v54 = vadd.f32 %v626_v41, %v4283_v21  ;;  %v715_v62 = vpop.f32.mrf.mxu1 }
 0x146   :  { %v891_v46 = vadd.f32 %v890_v25, %v802_v31  ;;  %v716_v30 = vadd.f32 %v715_v62, %v627_v54  ;;  %941 = vmatmul.bf16.gmra.mxu0 %v4227_v2 }
 0x147   :  { %1030 = vmatmul.bf16.gmra.mxu1 %v4229_v3 }
 0x148   :  { %v1353_v4 = vmax.f32 %v891_v46, 0.0  ;;  %1119 = vmatmul.bf16.gmra.mxu2 %v4227_v2  ;;  %v1356_v29 = vmax.f32 %v716_v30, 0.0  ;;  %v3585_v30 = vld [vmem:[#allocation8 + $0x150] sm:$0xf] }
 0x149   :  { %1208 = vmatmul.bf16.gmra.mxu3 %v4229_v3 }
 0x14a   :  { %v4430_v19 = vpack.c.bf16 %v1353_v4, %v1349_v57 }
 0x14b   :  { %v804_v20 = vpop.f32.mrf.mxu2  ;;  %v628_v15 = vpop.f32.mrf.mxu0 }
 0x14c   :  { %5554 = vst [vmem:[#allocation23_spill] sm:$0xff] %v4430_v19  ;;  %v805_v43 = vadd.f32 %v804_v20, %v4293_v34  ;;  %v893_v47 = vpop.f32.mrf.mxu3  ;;  %v629_v14 = vadd.f32 %v628_v15, %v4283_v21  ;;  %v717_v1 = vpop.f32.mrf.mxu1  ;;  %v3457_v15 = vld [vmem:[#allocation8 + $0x50] sm:$0xf] }
 0x14e   :  { %v894_v45 = vadd.f32 %v893_v47, %v805_v43  ;;  %v718_v35 = vadd.f32 %v717_v1, %v629_v14  ;;  %v3778_v43 = vld [vmem:[#allocation8 + $0x154] sm:$0xf0]  ;;  %v3649_v1 = vld [vmem:[#allocation8 + $0x1d0] sm:$0xf] }
 0x14f   :  { %v3586_v47 = vor.u32 %v3778_v43, %v3585_v30  ;;  %v3746_v14 = vld [vmem:[#allocation8 + $0x54] sm:$0xf0] }
 0x150   :  { %v1360_v36 = vmax.f32 %v718_v35, 0.0  ;;  %v1357_v4 = vmax.f32 %v894_v45, 0.0  ;;  %v3762_v30 = vld [vmem:[#allocation8 + $0xd4] sm:$0xf0] }
 0x151   :  { %2046 = vmatpush.bf16.msra.mxu2 %v3586_v47 }
 0x152   :  { %v4434_v25 = vpack.c.bf16 %v1360_v36, %v1356_v29  ;;  %v3458_v36 = vor.u32 %v3746_v14, %v3457_v15 }
 0x153   :  { %v806_v31 = vpop.f32.mrf.mxu2  ;;  %v631_v41 = vpop.f32.mrf.mxu0 }
 0x154   :  { %v807_v2 = vadd.f32 %v806_v31, %v4293_v34  ;;  %v895_v3 = vpop.f32.mrf.mxu3  ;;  %v632_v54 = vadd.f32 %v631_v41, %v4283_v21  ;;  %v720_v62 = vpop.f32.mrf.mxu1  ;;  %v3794_v31 = vld [vmem:[#allocation8 + $0x1d4] sm:$0xf0]  ;;  %1868 = vmatpush.bf16.msra.mxu0 %v3458_v36 }
 0x155   :  { %v3650_v41 = vor.u32 %v3794_v31, %v3649_v1 }
 0x156   :  { %v896_v46 = vadd.f32 %v895_v3, %v807_v2  ;;  %v721_v57 = vadd.f32 %v720_v62, %v632_v54  ;;  %946 = vmatmul.bf16.gmra.mxu0 %v4235_v8 }
 0x157   :  { %1035 = vmatmul.bf16.gmra.mxu1 %v4237_v9  ;;  %2135 = vmatpush.bf16.msra.mxu3 %v3650_v41 }
 0x158   :  { %v1361_v20 = vmax.f32 %v896_v46, 0.0  ;;  %1124 = vmatmul.bf16.gmra.mxu2 %v4235_v8  ;;  %v3521_v46 = vld [vmem:[#allocation8 + $0xd0] sm:$0xf] }
 0x159   :  { %1213 = vmatmul.bf16.gmra.mxu3 %v4237_v9  ;;  %v3522_v43 = vor.u32 %v3762_v30, %v3521_v46 }
 0x15a   :  { %v4442_v35 = vpack.c.bf16 %v1361_v20, %v1357_v4  ;;  %v1364_v4 = vmax.f32 %v721_v57, 0.0 }
 0x15b   :  { %v809_v29 = vpop.f32.mrf.mxu2  ;;  %v633_v3 = vpop.f32.mrf.mxu0  ;;  %1957 = vmatpush.bf16.msra.mxu1 %v3522_v43 }
 0x15c   :  { %v810_v45 = vadd.f32 %v809_v29, %v4293_v34  ;;  %v898_v2 = vpop.f32.mrf.mxu3  ;;  %v634_v8 = vadd.f32 %v633_v3, %v4283_v21  ;;  %v722_v9 = vpop.f32.mrf.mxu1 }
 0x15e   :  { %v899_v54 = vadd.f32 %v898_v2, %v810_v45  ;;  %v723_v62 = vadd.f32 %v722_v9, %v634_v8 }
 0x160   :  { %v1368_v20 = vmax.f32 %v723_v62, 0.0  ;;  %v1365_v2 = vmax.f32 %v899_v54, 0.0 }
 0x162   :  { %v4446_v14 = vpack.c.bf16 %v1368_v20, %v1364_v4 }
 0x163   :  { %v811_v15 = vpop.f32.mrf.mxu2  ;;  %v636_v1 = vpop.f32.mrf.mxu0 }
 0x164   :  { %5555 = vst [vmem:[#allocation24_spill] sm:$0xff] %v4446_v14  ;;  %v812_v29 = vadd.f32 %v811_v15, %v4293_v34  ;;  %v900_v47 = vpop.f32.mrf.mxu3  ;;  %v637_v31 = vadd.f32 %v636_v1, %v4283_v21  ;;  %v725_v3 = vpop.f32.mrf.mxu1 }
 0x166   :  { %v901_v36 = vadd.f32 %v900_v47, %v812_v29  ;;  %v726_v45 = vadd.f32 %v725_v3, %v637_v31  ;;  %951 = vmatmul.bf16.gmra.mxu0 %v4243_v26 }
 0x167   :  { %1040 = vmatmul.bf16.gmra.mxu1 %v4245_v27 }
 0x168   :  { %v1369_v41 = vmax.f32 %v901_v36, 0.0  ;;  %1129 = vmatmul.bf16.gmra.mxu2 %v4243_v26  ;;  %v1372_v54 = vmax.f32 %v726_v45, 0.0  ;;  %v3577_v45 = vld [vmem:[#allocation8 + $0x140] sm:$0xf] }
 0x169   :  { %1218 = vmatmul.bf16.gmra.mxu3 %v4245_v27 }
 0x16a   :  { %v4454_v57 = vpack.c.bf16 %v1369_v41, %v1365_v2 }
 0x16b   :  { %v814_v8 = vpop.f32.mrf.mxu2  ;;  %v638_v46 = vpop.f32.mrf.mxu0 }
 0x16c   :  { %5556 = vst [vmem:[#allocation25_spill] sm:$0xff] %v4454_v57  ;;  %v815_v9 = vadd.f32 %v814_v8, %v4293_v34  ;;  %v903_v62 = vpop.f32.mrf.mxu3  ;;  %v639_v30 = vadd.f32 %v638_v46, %v4283_v21  ;;  %v727_v4 = vpop.f32.mrf.mxu1  ;;  %v3449_v46 = vld [vmem:[#allocation8 + $0x40] sm:$0xf] }
 0x16e   :  { %v904_v20 = vadd.f32 %v903_v62, %v815_v9  ;;  %v728_v43 = vadd.f32 %v727_v4, %v639_v30  ;;  %v3776_v9 = vld [vmem:[#allocation8 + $0x144] sm:$0xf0]  ;;  %v3641_v4 = vld [vmem:[#allocation8 + $0x1c0] sm:$0xf] }
 0x16f   :  { %v3578_v62 = vor.u32 %v3776_v9, %v3577_v45  ;;  %v3744_v30 = vld [vmem:[#allocation8 + $0x44] sm:$0xf0] }
 0x170   :  { %v1376_v15 = vmax.f32 %v728_v43, 0.0  ;;  %v1373_v41 = vmax.f32 %v904_v20, 0.0  ;;  %v3760_v45 = vld [vmem:[#allocation8 + $0xc4] sm:$0xf0] }
 0x171   :  { %2047 = vmatpush.bf16.msra.mxu2 %v3578_v62 }
 0x172   :  { %v4458_v47 = vpack.c.bf16 %v1376_v15, %v1372_v54  ;;  %v3450_v15 = vor.u32 %v3744_v30, %v3449_v46 }
 0x173   :  { %v816_v29 = vpop.f32.mrf.mxu2  ;;  %v641_v1 = vpop.f32.mrf.mxu0 }
 0x174   :  { %5557 = vst [vmem:[#allocation26_spill] sm:$0xff] %v4458_v47  ;;  %v817_v26 = vadd.f32 %v816_v29, %v4293_v34  ;;  %v905_v27 = vpop.f32.mrf.mxu3  ;;  %v642_v31 = vadd.f32 %v641_v1, %v4283_v21  ;;  %v730_v3 = vpop.f32.mrf.mxu1  ;;  %v3792_v29 = vld [vmem:[#allocation8 + $0x1c4] sm:$0xf0]  ;;  %1869 = vmatpush.bf16.msra.mxu0 %v3450_v15 }
 0x175   :  { %v3642_v1 = vor.u32 %v3792_v29, %v3641_v4 }
 0x176   :  { %v906_v36 = vadd.f32 %v905_v27, %v817_v26  ;;  %v731_v2 = vadd.f32 %v730_v3, %v642_v31  ;;  %956 = vmatmul.bf16.gmra.mxu0 %v4251_v32 }
 0x177   :  { %1045 = vmatmul.bf16.gmra.mxu1 %v4253_v33  ;;  %2136 = vmatpush.bf16.msra.mxu3 %v3642_v1 }
 0x178   :  { %v1377_v8 = vmax.f32 %v906_v36, 0.0  ;;  %1134 = vmatmul.bf16.gmra.mxu2 %v4251_v32  ;;  %v3513_v36 = vld [vmem:[#allocation8 + $0xc0] sm:$0xf] }
 0x179   :  { %1223 = vmatmul.bf16.gmra.mxu3 %v4253_v33  ;;  %v3514_v9 = vor.u32 %v3760_v45, %v3513_v36 }
 0x17a   :  { %v4466_v43 = vpack.c.bf16 %v1377_v8, %v1373_v41  ;;  %v1380_v41 = vmax.f32 %v731_v2, 0.0 }
 0x17b   :  { %v819_v54 = vpop.f32.mrf.mxu2  ;;  %v643_v27 = vpop.f32.mrf.mxu0  ;;  %1958 = vmatpush.bf16.msra.mxu1 %v3514_v9 }
 0x17c   :  { %5558 = vst [vmem:[#allocation27_spill] sm:$0xff] %v4466_v43  ;;  %v820_v20 = vadd.f32 %v819_v54, %v4293_v34  ;;  %v908_v26 = vpop.f32.mrf.mxu3  ;;  %v644_v32 = vadd.f32 %v643_v27, %v4283_v21  ;;  %v732_v33 = vpop.f32.mrf.mxu1 }
 0x17e   :  { %v909_v31 = vadd.f32 %v908_v26, %v820_v20  ;;  %v733_v3 = vadd.f32 %v732_v33, %v644_v32 }
 0x180   :  { %v1384_v8 = vmax.f32 %v733_v3, 0.0  ;;  %v1381_v26 = vmax.f32 %v909_v31, 0.0 }
 0x182   :  { %v4470_v30 = vpack.c.bf16 %v1384_v8, %v1380_v41 }
 0x183   :  { %v821_v46 = vpop.f32.mrf.mxu2  ;;  %v646_v4 = vpop.f32.mrf.mxu0 }
 0x184   :  { %5559 = vst [vmem:[#allocation28_spill] sm:$0xff] %v4470_v30  ;;  %v822_v54 = vadd.f32 %v821_v46, %v4293_v34  ;;  %v910_v62 = vpop.f32.mrf.mxu3  ;;  %v647_v29 = vadd.f32 %v646_v4, %v4283_v21  ;;  %v735_v27 = vpop.f32.mrf.mxu1 }
 0x186   :  { %v911_v15 = vadd.f32 %v910_v62, %v822_v54  ;;  %v736_v20 = vadd.f32 %v735_v27, %v647_v29  ;;  %961 = vmatmul.bf16.gmra.mxu0 %v4259_v52 }
 0x187   :  { %1050 = vmatmul.bf16.gmra.mxu1 %v4261_v53 }
 0x188   :  { %v1385_v1 = vmax.f32 %v911_v15, 0.0  ;;  %1139 = vmatmul.bf16.gmra.mxu2 %v4259_v52  ;;  %v1388_v31 = vmax.f32 %v736_v20, 0.0  ;;  %v3569_v20 = vld [vmem:[#allocation8 + $0x130] sm:$0xf] }
 0x189   :  { %1228 = vmatmul.bf16.gmra.mxu3 %v4261_v53 }
 0x18a   :  { %v4478_v2 = vpack.c.bf16 %v1385_v1, %v1381_v26 }
 0x18b   :  { %v824_v32 = vpop.f32.mrf.mxu2  ;;  %v648_v36 = vpop.f32.mrf.mxu0 }
 0x18c   :  { %5560 = vst [vmem:[#allocation29_spill] sm:$0xff] %v4478_v2  ;;  %v825_v33 = vadd.f32 %v824_v32, %v4293_v34  ;;  %v913_v3 = vpop.f32.mrf.mxu3  ;;  %v649_v45 = vadd.f32 %v648_v36, %v4283_v21  ;;  %v737_v41 = vpop.f32.mrf.mxu1  ;;  %v3441_v36 = vld [vmem:[#allocation8 + $0x30] sm:$0xf] }
 0x18e   :  { %v914_v8 = vadd.f32 %v913_v3, %v825_v33  ;;  %v738_v9 = vadd.f32 %v737_v41, %v649_v45  ;;  %v3774_v33 = vld [vmem:[#allocation8 + $0x134] sm:$0xf0]  ;;  %v3633_v41 = vld [vmem:[#allocation8 + $0x1b0] sm:$0xf] }
 0x18f   :  { %v3570_v3 = vor.u32 %v3774_v33, %v3569_v20  ;;  %v3742_v45 = vld [vmem:[#allocation8 + $0x34] sm:$0xf0] }
 0x190   :  { %v1392_v46 = vmax.f32 %v738_v9, 0.0  ;;  %v1389_v1 = vmax.f32 %v914_v8, 0.0  ;;  %v3758_v20 = vld [vmem:[#allocation8 + $0xb4] sm:$0xf0] }
 0x191   :  { %2048 = vmatpush.bf16.msra.mxu2 %v3570_v3 }
 0x192   :  { %v4482_v62 = vpack.c.bf16 %v1392_v46, %v1388_v31  ;;  %v3442_v46 = vor.u32 %v3742_v45, %v3441_v36 }
 0x193   :  { %v826_v54 = vpop.f32.mrf.mxu2  ;;  %v651_v4 = vpop.f32.mrf.mxu0 }
 0x194   :  { %5561 = vst [vmem:[#allocation30_spill] sm:$0xff] %v4482_v62  ;;  %v827_v52 = vadd.f32 %v826_v54, %v4293_v34  ;;  %v915_v53 = vpop.f32.mrf.mxu3  ;;  %v652_v29 = vadd.f32 %v651_v4, %v4283_v21  ;;  %v740_v27 = vpop.f32.mrf.mxu1  ;;  %v3790_v54 = vld [vmem:[#allocation8 + $0x1b4] sm:$0xf0]  ;;  %1870 = vmatpush.bf16.msra.mxu0 %v3442_v46 }
 0x195   :  { %v3634_v4 = vor.u32 %v3790_v54, %v3633_v41 }
 0x196   :  { %v916_v15 = vadd.f32 %v915_v53, %v827_v52  ;;  %v741_v26 = vadd.f32 %v740_v27, %v652_v29  ;;  %966 = vmatmul.bf16.gmra.mxu0 %v4267_v58 }
 0x197   :  { %1055 = vmatmul.bf16.gmra.mxu1 %v4269_v59  ;;  %2137 = vmatpush.bf16.msra.mxu3 %v3634_v4 }
 0x198   :  { %v1393_v32 = vmax.f32 %v916_v15, 0.0  ;;  %1144 = vmatmul.bf16.gmra.mxu2 %v4267_v58  ;;  %v3505_v15 = vld [vmem:[#allocation8 + $0xb0] sm:$0xf] }
 0x199   :  { %1233 = vmatmul.bf16.gmra.mxu3 %v4269_v59  ;;  %v3506_v33 = vor.u32 %v3758_v20, %v3505_v15 }
 0x19a   :  { %v4490_v9 = vpack.c.bf16 %v1393_v32, %v1389_v1  ;;  %v1396_v1 = vmax.f32 %v741_v26, 0.0 }
 0x19b   :  { %v829_v31 = vpop.f32.mrf.mxu2  ;;  %v653_v53 = vpop.f32.mrf.mxu0  ;;  %1959 = vmatpush.bf16.msra.mxu1 %v3506_v33 }
 0x19c   :  { %5562 = vst [vmem:[#allocation31_spill] sm:$0xff] %v4490_v9  ;;  %v830_v8 = vadd.f32 %v829_v31, %v4293_v34  ;;  %v918_v52 = vpop.f32.mrf.mxu3  ;;  %v654_v58 = vadd.f32 %v653_v53, %v4283_v21  ;;  %v742_v59 = vpop.f32.mrf.mxu1 }
 0x19e   :  { %v919_v29 = vadd.f32 %v918_v52, %v830_v8  ;;  %v743_v27 = vadd.f32 %v742_v59, %v654_v58 }
 0x1a0   :  { %v1400_v32 = vmax.f32 %v743_v27, 0.0  ;;  %v1397_v52 = vmax.f32 %v919_v29, 0.0 }
 0x1a2   :  { %v4494_v45 = vpack.c.bf16 %v1400_v32, %v1396_v1 }
 0x1a3   :  { %v831_v36 = vpop.f32.mrf.mxu2  ;;  %v656_v41 = vpop.f32.mrf.mxu0 }
 0x1a4   :  { %5563 = vst [vmem:[#allocation32_spill] sm:$0xff] %v4494_v45  ;;  %v832_v31 = vadd.f32 %v831_v36, %v4293_v34  ;;  %v920_v3 = vpop.f32.mrf.mxu3  ;;  %v657_v54 = vadd.f32 %v656_v41, %v4283_v21  ;;  %v745_v53 = vpop.f32.mrf.mxu1 }
 0x1a6   :  { %v921_v46 = vadd.f32 %v920_v3, %v832_v31  ;;  %v746_v8 = vadd.f32 %v745_v53, %v657_v54  ;;  %971 = vmatmul.bf16.gmra.mxu0 %v4275_v16  ;;  %v3968_v31 = vld [vmem:[#allocation7] sm:$0xf] }
 0x1a7   :  { %1060 = vmatmul.bf16.gmra.mxu1 %v4277_v17  ;;  %v4506_v3 = vperm.slane %v3968_v31, 2 }
 0x1a8   :  { %v1401_v4 = vmax.f32 %v921_v46, 0.0  ;;  %1149 = vmatmul.bf16.gmra.mxu2 %v4275_v16  ;;  %v1404_v29 = vmax.f32 %v746_v8, 0.0 }
 0x1a9   :  { %1238 = vmatmul.bf16.gmra.mxu3 %v4277_v17 }
 0x1aa   :  { %v4502_v26 = vpack.c.bf16 %v1401_v4, %v1397_v52 }
 0x1ab   :  { %v834_v58 = vpop.f32.mrf.mxu2  ;;  %v658_v15 = vpop.f32.mrf.mxu0 }
 0x1ac   :  { %5564 = vst [vmem:[#allocation33_spill] sm:$0xff] %v4502_v26  ;;  %v835_v59 = vadd.f32 %v834_v58, %v4293_v34  ;;  %v923_v27 = vpop.f32.mrf.mxu3  ;;  %v659_v20 = vadd.f32 %v658_v15, %v4283_v21  ;;  %v747_v1 = vpop.f32.mrf.mxu1 }
 0x1ae   :  { %v924_v32 = vadd.f32 %v923_v27, %v835_v59  ;;  %v748_v33 = vadd.f32 %v747_v1, %v659_v20  ;;  %v4515_v59 = vperm.slane %v3968_v31, 3  ;;  %v3772_v27 = vld [vmem:[#allocation8 + $0x124] sm:$0xf0]  ;;  %v3433_v20 = vld [vmem:[#allocation8 + $0x20] sm:$0xf] }
 0x1af   :  { %v3740_v1 = vld [vmem:[#allocation8 + $0x24] sm:$0xf0] }
 0x1b0   :  { %v1408_v36 = vmax.f32 %v748_v33, 0.0  ;;  %v1405_v58 = vmax.f32 %v924_v32, 0.0  ;;  %v3625_v33 = vld [vmem:[#allocation8 + $0x1a0] sm:$0xf]  ;;  %v3788_v32 = vld [vmem:[#allocation8 + $0x1a4] sm:$0xf0] }
 0x1b2   :  { %v4508_v41 = vpack.c.bf16 %v1408_v36, %v1404_v29 }
 0x1b3   :  { %v836_v16 = vpop.f32.mrf.mxu2  ;;  %v937_v53 = vpop.f32.mrf.mxu0 }
 0x1b4   :  { %5565 = vst [vmem:[#allocation34_spill] sm:$0xff] %v4508_v41  ;;  %v837_v17 = vadd.f32 %v836_v16, %v4293_v34  ;;  %v925_v54 = vpop.f32.mrf.mxu3  ;;  %v938_v46 = vadd.f32 %v937_v53, %v4506_v3  ;;  %v1026_v52 = vpop.f32.mrf.mxu1  ;;  %v3561_v34 = vld [vmem:[#allocation8 + $0x120] sm:$0xf]  ;;  %v3434_v16 = vor.u32 %v3740_v1, %v3433_v20 }
 0x1b5   :  { %v3562_v15 = vor.u32 %v3772_v27, %v3561_v34  ;;  %v3756_v34 = vld [vmem:[#allocation8 + $0xa4] sm:$0xf0] }
 0x1b6   :  { %v926_v4 = vadd.f32 %v925_v54, %v837_v17  ;;  %v1027_v21 = vadd.f32 %v1026_v52, %v938_v46  ;;  %976 = vmatmul.bf16.gmra.mxu0 %v4285_v24 }
 0x1b7   :  { %1065 = vmatmul.bf16.gmra.mxu1 %v4287_v28  ;;  %2049 = vmatpush.bf16.msra.mxu2 %v3562_v15 }
 0x1b8   :  { %v1409_v8 = vmax.f32 %v926_v4, 0.0  ;;  %1154 = vmatmul.bf16.gmra.mxu2 %v4285_v24  ;;  %v3626_v24 = vor.u32 %v3788_v32, %v3625_v33  ;;  %1871 = vmatpush.bf16.msra.mxu0 %v3434_v16  ;;  %v3497_v4 = vld [vmem:[#allocation8 + $0xa0] sm:$0xf] }
 0x1b9   :  { %1243 = vmatmul.bf16.gmra.mxu3 %v4287_v28  ;;  %v3498_v27 = vor.u32 %v3756_v34, %v3497_v4 }
 0x1ba   :  { %v4518_v29 = vpack.c.bf16 %v1409_v8, %v1405_v58  ;;  %2138 = vmatpush.bf16.msra.mxu3 %v3626_v24  ;;  %v1286_v58 = vmax.f32 %v1027_v21, 0.0 }
 0x1bb   :  { %v1115_v36 = vpop.f32.mrf.mxu2  ;;  %v939_v53 = vpop.f32.mrf.mxu0  ;;  %1960 = vmatpush.bf16.msra.mxu1 %v3498_v27 }
 0x1bc   :  { %5566 = vst [vmem:[#allocation35_spill] sm:$0xff] %v4518_v29  ;;  %v1116_v17 = vadd.f32 %v1115_v36, %v4515_v59  ;;  %v1204_v54 = vpop.f32.mrf.mxu3  ;;  %v940_v31 = vadd.f32 %v939_v53, %v4506_v3  ;;  %v1028_v28 = vpop.f32.mrf.mxu1 }
 0x1be   :  { %v1205_v46 = vadd.f32 %v1204_v54, %v1116_v17  ;;  %v1029_v52 = vadd.f32 %v1028_v28, %v940_v31 }
 0x1c0   :  { %v1290_v8 = vmax.f32 %v1029_v52, 0.0  ;;  %v1287_v54 = vmax.f32 %v1205_v46, 0.0 }
 0x1c2   :  { %v4522_v20 = vpack.c.bf16 %v1290_v8, %v1286_v58 }
 0x1c3   :  { %v1117_v1 = vpop.f32.mrf.mxu2  ;;  %v942_v33 = vpop.f32.mrf.mxu0 }
 0x1c4   :  { %5567 = vst [vmem:[#allocation36_spill] sm:$0xff] %v4522_v20  ;;  %v1118_v36 = vadd.f32 %v1117_v1, %v4515_v59  ;;  %v1206_v15 = vpop.f32.mrf.mxu3  ;;  %v943_v32 = vadd.f32 %v942_v33, %v4506_v3  ;;  %v1031_v53 = vpop.f32.mrf.mxu1 }
 0x1c6   :  { %v1207_v16 = vadd.f32 %v1206_v15, %v1118_v36  ;;  %v1032_v17 = vadd.f32 %v1031_v53, %v943_v32  ;;  %981 = vmatmul.bf16.gmra.mxu0 %v4300_v7 }
 0x1c7   :  { %1070 = vmatmul.bf16.gmra.mxu1 %v4303_v13 }
 0x1c8   :  { %v1291_v24 = vmax.f32 %v1207_v16, 0.0  ;;  %1159 = vmatmul.bf16.gmra.mxu2 %v4300_v7  ;;  %v1294_v46 = vmax.f32 %v1032_v17, 0.0  ;;  %v3553_v17 = vld [vmem:[#allocation8 + $0x110] sm:$0xf] }
 0x1c9   :  { %1248 = vmatmul.bf16.gmra.mxu3 %v4303_v13 }
 0x1ca   :  { %v4530_v21 = vpack.c.bf16 %v1291_v24, %v1287_v54 }
 0x1cb   :  { %v1120_v31 = vpop.f32.mrf.mxu2  ;;  %v944_v4 = vpop.f32.mrf.mxu0 }
 0x1cc   :  { %5568 = vst [vmem:[#allocation37_spill] sm:$0xff] %v4530_v21  ;;  %v1121_v28 = vadd.f32 %v1120_v31, %v4515_v59  ;;  %v1209_v52 = vpop.f32.mrf.mxu3  ;;  %v945_v34 = vadd.f32 %v944_v4, %v4506_v3  ;;  %v1033_v58 = vpop.f32.mrf.mxu1  ;;  %v3425_v4 = vld [vmem:[#allocation8 + $0x10] sm:$0xf] }
 0x1ce   :  { %v1210_v8 = vadd.f32 %v1209_v52, %v1121_v28  ;;  %v1034_v27 = vadd.f32 %v1033_v58, %v945_v34  ;;  %v3770_v28 = vld [vmem:[#allocation8 + $0x114] sm:$0xf0]  ;;  %v3617_v58 = vld [vmem:[#allocation8 + $0x190] sm:$0xf] }
 0x1cf   :  { %v3554_v52 = vor.u32 %v3770_v28, %v3553_v17  ;;  %v3738_v34 = vld [vmem:[#allocation8 + $0x14] sm:$0xf0] }
 0x1d0   :  { %v1298_v1 = vmax.f32 %v1034_v27, 0.0  ;;  %v1295_v24 = vmax.f32 %v1210_v8, 0.0  ;;  %v3754_v17 = vld [vmem:[#allocation8 + $0x94] sm:$0xf0] }
 0x1d1   :  { %2050 = vmatpush.bf16.msra.mxu2 %v3554_v52 }
 0x1d2   :  { %v4534_v15 = vpack.c.bf16 %v1298_v1, %v1294_v46  ;;  %v3426_v1 = vor.u32 %v3738_v34, %v3425_v4 }
 0x1d3   :  { %v1122_v36 = vpop.f32.mrf.mxu2  ;;  %v947_v33 = vpop.f32.mrf.mxu0 }
 0x1d4   :  { %v1123_v7 = vadd.f32 %v1122_v36, %v4515_v59  ;;  %v1211_v13 = vpop.f32.mrf.mxu3  ;;  %v948_v32 = vadd.f32 %v947_v33, %v4506_v3  ;;  %v1036_v53 = vpop.f32.mrf.mxu1  ;;  %v3786_v36 = vld [vmem:[#allocation8 + $0x194] sm:$0xf0]  ;;  %1872 = vmatpush.bf16.msra.mxu0 %v3426_v1 }
 0x1d5   :  { %v3618_v33 = vor.u32 %v3786_v36, %v3617_v58 }
 0x1d6   :  { %v1212_v16 = vadd.f32 %v1211_v13, %v1123_v7  ;;  %v1037_v54 = vadd.f32 %v1036_v53, %v948_v32  ;;  %986 = vmatmul.bf16.gmra.mxu0 %v4314_v48 }
 0x1d7   :  { %1075 = vmatmul.bf16.gmra.mxu1 %v4319_v55  ;;  %2139 = vmatpush.bf16.msra.mxu3 %v3618_v33 }
 0x1d8   :  { %v1299_v31 = vmax.f32 %v1212_v16, 0.0  ;;  %1164 = vmatmul.bf16.gmra.mxu2 %v4314_v48  ;;  %v3489_v16 = vld [vmem:[#allocation8 + $0x90] sm:$0xf] }
 0x1d9   :  { %1253 = vmatmul.bf16.gmra.mxu3 %v4319_v55  ;;  %v3490_v28 = vor.u32 %v3754_v17, %v3489_v16 }
 0x1da   :  { %v4542_v27 = vpack.c.bf16 %v1299_v31, %v1295_v24  ;;  %v1302_v24 = vmax.f32 %v1037_v54, 0.0 }
 0x1db   :  { %v1125_v46 = vpop.f32.mrf.mxu2  ;;  %v949_v13 = vpop.f32.mrf.mxu0  ;;  %1961 = vmatpush.bf16.msra.mxu1 %v3490_v28 }
 0x1dc   :  { %5569 = vst [vmem:[#allocation38_spill] sm:$0xff] %v4542_v27  ;;  %v1126_v8 = vadd.f32 %v1125_v46, %v4515_v59  ;;  %v1214_v7 = vpop.f32.mrf.mxu3  ;;  %v950_v48 = vadd.f32 %v949_v13, %v4506_v3  ;;  %v1038_v55 = vpop.f32.mrf.mxu1 }
 0x1de   :  { %v1215_v32 = vadd.f32 %v1214_v7, %v1126_v8  ;;  %v1039_v53 = vadd.f32 %v1038_v55, %v950_v48 }
 0x1e0   :  { %v1306_v31 = vmax.f32 %v1039_v53, 0.0  ;;  %v1303_v7 = vmax.f32 %v1215_v32, 0.0 }
 0x1e2   :  { %v4546_v34 = vpack.c.bf16 %v1306_v31, %v1302_v24 }
 0x1e3   :  { %v1127_v4 = vpop.f32.mrf.mxu2  ;;  %v952_v58 = vpop.f32.mrf.mxu0 }
 0x1e4   :  { %5570 = vst [vmem:[#allocation39_spill] sm:$0xff] %v4546_v34  ;;  %v1128_v46 = vadd.f32 %v1127_v4, %v4515_v59  ;;  %v1216_v52 = vpop.f32.mrf.mxu3  ;;  %v953_v36 = vadd.f32 %v952_v58, %v4506_v3  ;;  %v1041_v13 = vpop.f32.mrf.mxu1 }
 0x1e6   :  { %v1217_v1 = vadd.f32 %v1216_v52, %v1128_v46  ;;  %v1042_v8 = vadd.f32 %v1041_v13, %v953_v36  ;;  %991 = vmatmul.bf16.gmra.mxu0 %v4330_v50 }
 0x1e7   :  { %1080 = vmatmul.bf16.gmra.mxu1 %v4335_v60 }
 0x1e8   :  { %v1307_v33 = vmax.f32 %v1217_v1, 0.0  ;;  %1169 = vmatmul.bf16.gmra.mxu2 %v4330_v50  ;;  %v1310_v32 = vmax.f32 %v1042_v8, 0.0  ;;  %v3545_v8 = vld [vmem:[#allocation8 + $0x100] sm:$0xf] }
 0x1e9   :  { %1258 = vmatmul.bf16.gmra.mxu3 %v4335_v60 }
 0x1ea   :  { %v4554_v54 = vpack.c.bf16 %v1307_v33, %v1303_v7 }
 0x1eb   :  { %v1130_v48 = vpop.f32.mrf.mxu2  ;;  %v954_v16 = vpop.f32.mrf.mxu0 }
 0x1ec   :  { %5571 = vst [vmem:[#allocation40_spill] sm:$0xff] %v4554_v54  ;;  %v1131_v55 = vadd.f32 %v1130_v48, %v4515_v59  ;;  %v1219_v53 = vpop.f32.mrf.mxu3  ;;  %v955_v17 = vadd.f32 %v954_v16, %v4506_v3  ;;  %v1043_v24 = vpop.f32.mrf.mxu1  ;;  %v3417_v16 = vld [vmem:[#allocation8] sm:$0xf] }
 0x1ee   :  { %v1220_v31 = vadd.f32 %v1219_v53, %v1131_v55  ;;  %v1044_v28 = vadd.f32 %v1043_v24, %v955_v17  ;;  %v3768_v55 = vld [vmem:[#allocation8 + $0x104] sm:$0xf0]  ;;  %v3609_v24 = vld [vmem:[#allocation8 + $0x180] sm:$0xf] }
 0x1ef   :  { %v3546_v53 = vor.u32 %v3768_v55, %v3545_v8  ;;  %v3736_v17 = vld [vmem:[#allocation8 + $0x4] sm:$0xf0] }
 0x1f0   :  { %v1314_v4 = vmax.f32 %v1044_v28, 0.0  ;;  %v1311_v33 = vmax.f32 %v1220_v31, 0.0  ;;  %v3752_v8 = vld [vmem:[#allocation8 + $0x84] sm:$0xf0] }
 0x1f1   :  { %2051 = vmatpush.bf16.msra.mxu2 %v3546_v53 }
 0x1f2   :  { %v4558_v52 = vpack.c.bf16 %v1314_v4, %v1310_v32  ;;  %v3418_v4 = vor.u32 %v3736_v17, %v3417_v16 }
 0x1f3   :  { %v1132_v46 = vpop.f32.mrf.mxu2  ;;  %v957_v58 = vpop.f32.mrf.mxu0 }
 0x1f4   :  { %5572 = vst [vmem:[#allocation41_spill] sm:$0xff] %v4558_v52  ;;  %v1133_v50 = vadd.f32 %v1132_v46, %v4515_v59  ;;  %v1221_v60 = vpop.f32.mrf.mxu3  ;;  %v958_v36 = vadd.f32 %v957_v58, %v4506_v3  ;;  %v1046_v13 = vpop.f32.mrf.mxu1  ;;  %v3784_v46 = vld [vmem:[#allocation8 + $0x184] sm:$0xf0]  ;;  %1873 = vmatpush.bf16.msra.mxu0 %v3418_v4 }
 0x1f5   :  { %v3610_v58 = vor.u32 %v3784_v46, %v3609_v24 }
 0x1f6   :  { %v1222_v1 = vadd.f32 %v1221_v60, %v1133_v50  ;;  %v1047_v7 = vadd.f32 %v1046_v13, %v958_v36  ;;  %996 = vmatmul.bf16.gmra.mxu0 %v4346_v38 }
 0x1f7   :  { %1085 = vmatmul.bf16.gmra.mxu1 %v4351_v44  ;;  %2140 = vmatpush.bf16.msra.mxu3 %v3610_v58 }
 0x1f8   :  { %v1315_v48 = vmax.f32 %v1222_v1, 0.0  ;;  %1174 = vmatmul.bf16.gmra.mxu2 %v4346_v38  ;;  %v3481_v1 = vld [vmem:[#allocation8 + $0x80] sm:$0xf] }
 0x1f9   :  { %1263 = vmatmul.bf16.gmra.mxu3 %v4351_v44  ;;  %v3482_v55 = vor.u32 %v3752_v8, %v3481_v1 }
 0x1fa   :  { %v4566_v28 = vpack.c.bf16 %v1315_v48, %v1311_v33  ;;  %v1318_v33 = vmax.f32 %v1047_v7, 0.0 }
 0x1fb   :  { %v1135_v32 = vpop.f32.mrf.mxu2  ;;  %v959_v60 = vpop.f32.mrf.mxu0  ;;  %1962 = vmatpush.bf16.msra.mxu1 %v3482_v55 }
 0x1fc   :  { %5573 = vst [vmem:[#allocation42_spill] sm:$0xff] %v4566_v28  ;;  %v1136_v31 = vadd.f32 %v1135_v32, %v4515_v59  ;;  %v1224_v50 = vpop.f32.mrf.mxu3  ;;  %v960_v38 = vadd.f32 %v959_v60, %v4506_v3  ;;  %v1048_v44 = vpop.f32.mrf.mxu1 }
 0x1fe   :  { %v1225_v36 = vadd.f32 %v1224_v50, %v1136_v31  ;;  %v1049_v13 = vadd.f32 %v1048_v44, %v960_v38 }
 0x200   :  { %v1322_v48 = vmax.f32 %v1049_v13, 0.0  ;;  %v1319_v50 = vmax.f32 %v1225_v36, 0.0 }
 0x202   :  { %v4570_v17 = vpack.c.bf16 %v1322_v48, %v1318_v33 }
 0x203   :  { %v1137_v16 = vpop.f32.mrf.mxu2  ;;  %v962_v24 = vpop.f32.mrf.mxu0 }
 0x204   :  { %5574 = vst [vmem:[#allocation43_spill] sm:$0xff] %v4570_v17  ;;  %v1138_v32 = vadd.f32 %v1137_v16, %v4515_v59  ;;  %v1226_v53 = vpop.f32.mrf.mxu3  ;;  %v963_v46 = vadd.f32 %v962_v24, %v4506_v3  ;;  %v1051_v60 = vpop.f32.mrf.mxu1 }
 0x206   :  { %v1227_v4 = vadd.f32 %v1226_v53, %v1138_v32  ;;  %v1052_v31 = vadd.f32 %v1051_v60, %v963_v46  ;;  %1001 = vmatmul.bf16.gmra.mxu0 %v4362_v63 }
 0x207   :  { %1090 = vmatmul.bf16.gmra.mxu1 %v4367_v10 }
 0x208   :  { %v1323_v58 = vmax.f32 %v1227_v4, 0.0  ;;  %1179 = vmatmul.bf16.gmra.mxu2 %v4362_v63  ;;  %v1326_v36 = vmax.f32 %v1052_v31, 0.0  ;;  %v3781_v31 = vld [vmem:[#allocation8 + $0x174] sm:$0xf] }
 0x209   :  { %1268 = vmatmul.bf16.gmra.mxu3 %v4367_v10 }
 0x20a   :  { %v4578_v7 = vpack.c.bf16 %v1323_v58, %v1319_v50 }
 0x20b   :  { %v1140_v38 = vpop.f32.mrf.mxu2  ;;  %v964_v1 = vpop.f32.mrf.mxu0 }
 0x20c   :  { %5575 = vst [vmem:[#allocation44_spill] sm:$0xff] %v4578_v7  ;;  %v1141_v44 = vadd.f32 %v1140_v38, %v4515_v59  ;;  %v1229_v13 = vpop.f32.mrf.mxu3  ;;  %v965_v8 = vadd.f32 %v964_v1, %v4506_v3  ;;  %v1053_v33 = vpop.f32.mrf.mxu1  ;;  %v3749_v1 = vld [vmem:[#allocation8 + $0x74] sm:$0xf] }
 0x20e   :  { %v1230_v48 = vadd.f32 %v1229_v13, %v1141_v44  ;;  %v1054_v55 = vadd.f32 %v1053_v33, %v965_v8  ;;  %v3603_v44 = vld [vmem:[#allocation8 + $0x178] sm:$0xf0]  ;;  %v3797_v33 = vld [vmem:[#allocation8 + $0x1f4] sm:$0xf] }
 0x20f   :  { %v3606_v13 = vor.u32 %v3781_v31, %v3603_v44  ;;  %v3475_v8 = vld [vmem:[#allocation8 + $0x78] sm:$0xf0] }
 0x210   :  { %v1330_v16 = vmax.f32 %v1054_v55, 0.0  ;;  %v1327_v58 = vmax.f32 %v1230_v48, 0.0  ;;  %v3539_v31 = vld [vmem:[#allocation8 + $0xf8] sm:$0xf0] }
 0x211   :  { %2400 = vmatpush.bf16.msrb.mxu2 %v3606_v13 }
 0x212   :  { %v4582_v53 = vpack.c.bf16 %v1330_v16, %v1326_v36  ;;  %v3478_v16 = vor.u32 %v3749_v1, %v3475_v8 }
 0x213   :  { %v1142_v32 = vpop.f32.mrf.mxu2  ;;  %v967_v24 = vpop.f32.mrf.mxu0 }
 0x214   :  { %5576 = vst [vmem:[#allocation45_spill] sm:$0xff] %v4582_v53  ;;  %v1143_v63 = vadd.f32 %v1142_v32, %v4515_v59  ;;  %v1231_v10 = vpop.f32.mrf.mxu3  ;;  %v968_v46 = vadd.f32 %v967_v24, %v4506_v3  ;;  %v1056_v60 = vpop.f32.mrf.mxu1  ;;  %v3667_v32 = vld [vmem:[#allocation8 + $0x1f8] sm:$0xf0]  ;;  %2222 = vmatpush.bf16.msrb.mxu0 %v3478_v16 }
 0x215   :  { %v3670_v24 = vor.u32 %v3797_v33, %v3667_v32 }
 0x216   :  { %v1232_v4 = vadd.f32 %v1231_v10, %v1143_v63  ;;  %v1057_v50 = vadd.f32 %v1056_v60, %v968_v46  ;;  %1006 = vmatmul.bf16.gmra.mxu0 %v4378_v0 }
 0x217   :  { %1095 = vmatmul.bf16.gmra.mxu1 %v4383_v56  ;;  %2489 = vmatpush.bf16.msrb.mxu3 %v3670_v24 }
 0x218   :  { %v1331_v38 = vmax.f32 %v1232_v4, 0.0  ;;  %1184 = vmatmul.bf16.gmra.mxu2 %v4378_v0  ;;  %v3765_v4 = vld [vmem:[#allocation8 + $0xf4] sm:$0xf] }
 0x219   :  { %1273 = vmatmul.bf16.gmra.mxu3 %v4383_v56  ;;  %v3542_v44 = vor.u32 %v3765_v4, %v3539_v31 }
 0x21a   :  { %v4590_v55 = vpack.c.bf16 %v1331_v38, %v1327_v58  ;;  %v1334_v58 = vmax.f32 %v1057_v50, 0.0 }
 0x21b   :  { %v1145_v36 = vpop.f32.mrf.mxu2  ;;  %v969_v10 = vpop.f32.mrf.mxu0  ;;  %2311 = vmatpush.bf16.msrb.mxu1 %v3542_v44 }
 0x21c   :  { %5577 = vst [vmem:[#allocation46_spill] sm:$0xff] %v4590_v55  ;;  %v1146_v48 = vadd.f32 %v1145_v36, %v4515_v59  ;;  %v1234_v63 = vpop.f32.mrf.mxu3  ;;  %v970_v0 = vadd.f32 %v969_v10, %v4506_v3  ;;  %v1058_v56 = vpop.f32.mrf.mxu1 }
 0x21e   :  { %v1235_v46 = vadd.f32 %v1234_v63, %v1146_v48  ;;  %v1059_v60 = vadd.f32 %v1058_v56, %v970_v0 }
 0x220   :  { %v1338_v38 = vmax.f32 %v1059_v60, 0.0  ;;  %v1335_v63 = vmax.f32 %v1235_v46, 0.0 }
 0x222   :  { %v4594_v8 = vpack.c.bf16 %v1338_v38, %v1334_v58 }
 0x223   :  { %v1147_v1 = vpop.f32.mrf.mxu2  ;;  %v972_v33 = vpop.f32.mrf.mxu0 }
 0x224   :  { %5578 = vst [vmem:[#allocation47_spill] sm:$0xff] %v4594_v8  ;;  %v1148_v36 = vadd.f32 %v1147_v1, %v4515_v59  ;;  %v1236_v13 = vpop.f32.mrf.mxu3  ;;  %v973_v32 = vadd.f32 %v972_v33, %v4506_v3  ;;  %v1061_v10 = vpop.f32.mrf.mxu1 }
 0x226   :  { %v1237_v16 = vadd.f32 %v1236_v13, %v1148_v36  ;;  %v1062_v48 = vadd.f32 %v1061_v10, %v973_v32  ;;  %1011 = vmatmul.bf16.gmra.mxu0 %v4394_v61 }
 0x227   :  { %1100 = vmatmul.bf16.gmra.mxu1 %v4399_v40 }
 0x228   :  { %v1339_v24 = vmax.f32 %v1237_v16, 0.0  ;;  %1189 = vmatmul.bf16.gmra.mxu2 %v4394_v61  ;;  %v1342_v46 = vmax.f32 %v1062_v48, 0.0  ;;  %v3779_v48 = vld [vmem:[#allocation8 + $0x164] sm:$0xf] }
 0x229   :  { %1278 = vmatmul.bf16.gmra.mxu3 %v4399_v40 }
 0x22a   :  { %v4602_v50 = vpack.c.bf16 %v1339_v24, %v1335_v63 }
 0x22b   :  { %v1150_v0 = vpop.f32.mrf.mxu2  ;;  %v974_v4 = vpop.f32.mrf.mxu0 }
 0x22c   :  { %5579 = vst [vmem:[#allocation48_spill] sm:$0xff] %v4602_v50  ;;  %v1151_v56 = vadd.f32 %v1150_v0, %v4515_v59  ;;  %v1239_v60 = vpop.f32.mrf.mxu3  ;;  %v975_v31 = vadd.f32 %v974_v4, %v4506_v3  ;;  %v1063_v58 = vpop.f32.mrf.mxu1  ;;  %v3747_v4 = vld [vmem:[#allocation8 + $0x64] sm:$0xf] }
 0x22e   :  { %v1240_v38 = vadd.f32 %v1239_v60, %v1151_v56  ;;  %v1064_v44 = vadd.f32 %v1063_v58, %v975_v31  ;;  %v3595_v56 = vld [vmem:[#allocation8 + $0x168] sm:$0xf0]  ;;  %v3795_v58 = vld [vmem:[#allocation8 + $0x1e4] sm:$0xf] }
 0x22f   :  { %v3598_v60 = vor.u32 %v3779_v48, %v3595_v56  ;;  %v3467_v31 = vld [vmem:[#allocation8 + $0x68] sm:$0xf0]  ;;  %v3763_v56 = vld [vmem:[#allocation8 + $0xe4] sm:$0xf] }
 0x230   :  { %v1346_v1 = vmax.f32 %v1064_v44, 0.0  ;;  %v1343_v24 = vmax.f32 %v1240_v38, 0.0 }
 0x231   :  { %2401 = vmatpush.bf16.msrb.mxu2 %v3598_v60 }
 0x232   :  { %v4606_v13 = vpack.c.bf16 %v1346_v1, %v1342_v46  ;;  %v3470_v1 = vor.u32 %v3747_v4, %v3467_v31 }
 0x233   :  { %v1152_v36 = vpop.f32.mrf.mxu2  ;;  %v977_v33 = vpop.f32.mrf.mxu0 }
 0x234   :  { %v1153_v61 = vadd.f32 %v1152_v36, %v4515_v59  ;;  %v1241_v40 = vpop.f32.mrf.mxu3  ;;  %v978_v32 = vadd.f32 %v977_v33, %v4506_v3  ;;  %v1066_v10 = vpop.f32.mrf.mxu1  ;;  %v3659_v36 = vld [vmem:[#allocation8 + $0x1e8] sm:$0xf0]  ;;  %2223 = vmatpush.bf16.msrb.mxu0 %v3470_v1 }
 0x235   :  { %v3662_v33 = vor.u32 %v3795_v58, %v3659_v36 }
 0x236   :  { %v1242_v16 = vadd.f32 %v1241_v40, %v1153_v61  ;;  %v1067_v63 = vadd.f32 %v1066_v10, %v978_v32  ;;  %1874 = vmatmul.bf16.vlgmr.msra.gmra.mxu0 %v4298_v5 }
 0x237   :  { %1963 = vmatmul.bf16.vlgmr.msra.gmra.mxu1 %v4310_v23  ;;  %2490 = vmatpush.bf16.msrb.mxu3 %v3662_v33 }
 0x238   :  { %v1347_v0 = vmax.f32 %v1242_v16, 0.0  ;;  %2052 = vmatmul.bf16.vlgmr.msra.gmra.mxu2 %v4522_v20 }
 0x239   :  { %2141 = vmatmul.bf16.vlgmr.msra.gmra.mxu3 %v4530_v21  ;;  %v3531_v21 = vld [vmem:[#allocation8 + $0xe8] sm:$0xf0] }
 0x23a   :  { %v4614_v44 = vpack.c.bf16 %v1347_v0, %v1343_v24  ;;  %v1350_v24 = vmax.f32 %v1067_v63, 0.0  ;;  %v3534_v20 = vor.u32 %v3763_v56, %v3531_v21 }
 0x23b   :  { %v1155_v46 = vpop.f32.mrf.mxu2  ;;  %v979_v40 = vpop.f32.mrf.mxu0 }
 0x23c   :  { %v1156_v38 = vadd.f32 %v1155_v46, %v4515_v59  ;;  %v1244_v61 = vpop.f32.mrf.mxu3  ;;  %v980_v32 = vadd.f32 %v979_v40, %v4506_v3  ;;  %v1068_v10 = vpop.f32.mrf.mxu1  ;;  %2312 = vmatpush.bf16.msrb.mxu1 %v3534_v20 }
 0x23e   :  { %v1245_v16 = vadd.f32 %v1244_v61, %v1156_v38  ;;  %v1069_v48 = vadd.f32 %v1068_v10, %v980_v32 }
 0x240   :  { %v1354_v0 = vmax.f32 %v1069_v48, 0.0  ;;  %v1351_v61 = vmax.f32 %v1245_v16, 0.0 }
 0x242   :  { %v4618_v31 = vpack.c.bf16 %v1354_v0, %v1350_v24 }
 0x243   :  { %v1157_v4 = vpop.f32.mrf.mxu2  ;;  %v982_v58 = vpop.f32.mrf.mxu0 }
 0x244   :  { %5580 = vst [vmem:[#allocation49_spill] sm:$0xff] %v4618_v31  ;;  %v1158_v46 = vadd.f32 %v1157_v4, %v4515_v59  ;;  %v1246_v60 = vpop.f32.mrf.mxu3  ;;  %v983_v36 = vadd.f32 %v982_v58, %v4506_v3  ;;  %v1071_v40 = vpop.f32.mrf.mxu1 }
 0x246   :  { %v1247_v1 = vadd.f32 %v1246_v60, %v1158_v46  ;;  %v1072_v38 = vadd.f32 %v1071_v40, %v983_v36  ;;  %1879 = vmatmul.bf16.gmra.mxu0 %v4316_v49 }
 0x247   :  { %1968 = vmatmul.bf16.gmra.mxu1 %v4326_v12 }
 0x248   :  { %v1355_v33 = vmax.f32 %v1247_v1, 0.0  ;;  %2057 = vmatmul.bf16.gmra.mxu2 %v4534_v15  ;;  %v1358_v16 = vmax.f32 %v1072_v38, 0.0  ;;  %v3777_v38 = vld [vmem:[#allocation8 + $0x154] sm:$0xf] }
 0x249   :  { %2146 = vmatmul.bf16.gmra.mxu3 %v4542_v27 }
 0x24a   :  { %v4626_v20 = vpack.c.bf16 %v1355_v33, %v1351_v61 }
 0x24b   :  { %v1160_v21 = vpop.f32.mrf.mxu2  ;;  %v984_v10 = vpop.f32.mrf.mxu0 }
 0x24c   :  { %5581 = vst [vmem:[#allocation50_spill] sm:$0xff] %v4626_v20  ;;  %v1161_v63 = vadd.f32 %v1160_v21, %v4515_v59  ;;  %v1249_v32 = vpop.f32.mrf.mxu3  ;;  %v985_v48 = vadd.f32 %v984_v10, %v4506_v3  ;;  %v1073_v56 = vpop.f32.mrf.mxu1 }
 0x24e   :  { %v1250_v24 = vadd.f32 %v1249_v32, %v1161_v63  ;;  %v1074_v0 = vadd.f32 %v1073_v56, %v985_v48  ;;  %v3587_v63 = vld [vmem:[#allocation8 + $0x158] sm:$0xf0]  ;;  %v3745_v48 = vld [vmem:[#allocation8 + $0x54] sm:$0xf] }
 0x24f   :  { %v3590_v32 = vor.u32 %v3777_v38, %v3587_v63  ;;  %v3459_v56 = vld [vmem:[#allocation8 + $0x58] sm:$0xf0]  ;;  %v3761_v63 = vld [vmem:[#allocation8 + $0xd4] sm:$0xf] }
 0x250   :  { %v1362_v4 = vmax.f32 %v1074_v0, 0.0  ;;  %v1359_v10 = vmax.f32 %v1250_v24, 0.0  ;;  %v3793_v0 = vld [vmem:[#allocation8 + $0x1d4] sm:$0xf] }
 0x251   :  { %2402 = vmatpush.bf16.msrb.mxu2 %v3590_v32 }
 0x252   :  { %v4630_v60 = vpack.c.bf16 %v1362_v4, %v1358_v16 }
 0x253   :  { %v1162_v46 = vpop.f32.mrf.mxu2  ;;  %v987_v40 = vpop.f32.mrf.mxu0 }
 0x254   :  { %5582 = vst [vmem:[#allocation51_spill] sm:$0xff] %v4630_v60  ;;  %v1163_v58 = vadd.f32 %v1162_v46, %v4515_v59  ;;  %v1251_v36 = vpop.f32.mrf.mxu3  ;;  %v988_v1 = vadd.f32 %v987_v40, %v4506_v3  ;;  %v1076_v61 = vpop.f32.mrf.mxu1  ;;  %v3462_v46 = vor.u32 %v3745_v48, %v3459_v56 }
 0x256   :  { %v1252_v33 = vadd.f32 %v1251_v36, %v1163_v58  ;;  %v1077_v21 = vadd.f32 %v1076_v61, %v988_v1  ;;  %1884 = vmatmul.bf16.gmra.mxu0 %v4332_v51  ;;  %v3651_v58 = vld [vmem:[#allocation8 + $0x1d8] sm:$0xf0] }
 0x257   :  { %1973 = vmatmul.bf16.gmra.mxu1 %v4342_v6  ;;  %v3654_v1 = vor.u32 %v3793_v0, %v3651_v58  ;;  %2224 = vmatpush.bf16.msrb.mxu0 %v3462_v46 }
 0x258   :  { %v1363_v27 = vmax.f32 %v1252_v33, 0.0  ;;  %2062 = vmatmul.bf16.gmra.mxu2 %v4546_v34  ;;  %v3523_v34 = vld [vmem:[#allocation8 + $0xd8] sm:$0xf0] }
 0x259   :  { %2151 = vmatmul.bf16.gmra.mxu3 %v4554_v54  ;;  %v3526_v6 = vor.u32 %v3761_v63, %v3523_v34 }
 0x25a   :  { %v4638_v16 = vpack.c.bf16 %v1363_v27, %v1359_v10  ;;  %2491 = vmatpush.bf16.msrb.mxu3 %v3654_v1  ;;  %v1366_v27 = vmax.f32 %v1077_v21, 0.0 }
 0x25b   :  { %v1165_v4 = vpop.f32.mrf.mxu2  ;;  %v989_v40 = vpop.f32.mrf.mxu0  ;;  %2313 = vmatpush.bf16.msrb.mxu1 %v3526_v6 }
 0x25c   :  { %5583 = vst [vmem:[#allocation52_spill] sm:$0xff] %v4638_v16  ;;  %v1166_v24 = vadd.f32 %v1165_v4, %v4515_v59  ;;  %v1254_v36 = vpop.f32.mrf.mxu3  ;;  %v990_v61 = vadd.f32 %v989_v40, %v4506_v3  ;;  %v1078_v33 = vpop.f32.mrf.mxu1 }
 0x25e   :  { %v1255_v54 = vadd.f32 %v1254_v36, %v1166_v24  ;;  %v1079_v38 = vadd.f32 %v1078_v33, %v990_v61 }
 0x260   :  { %v1370_v10 = vmax.f32 %v1079_v38, 0.0  ;;  %v1367_v36 = vmax.f32 %v1255_v54, 0.0 }
 0x262   :  { %v4642_v56 = vpack.c.bf16 %v1370_v10, %v1366_v27 }
 0x263   :  { %v1167_v48 = vpop.f32.mrf.mxu2  ;;  %v992_v0 = vpop.f32.mrf.mxu0 }
 0x264   :  { %5584 = vst [vmem:[#allocation53_spill] sm:$0xff] %v4642_v56  ;;  %v1168_v4 = vadd.f32 %v1167_v48, %v4515_v59  ;;  %v1256_v32 = vpop.f32.mrf.mxu3  ;;  %v993_v58 = vadd.f32 %v992_v0, %v4506_v3  ;;  %v1081_v40 = vpop.f32.mrf.mxu1 }
 0x266   :  { %v1257_v46 = vadd.f32 %v1256_v32, %v1168_v4  ;;  %v1082_v24 = vadd.f32 %v1081_v40, %v993_v58  ;;  %1889 = vmatmul.bf16.gmra.mxu0 %v4348_v39 }
 0x267   :  { %1978 = vmatmul.bf16.gmra.mxu1 %v4358_v11 }
 0x268   :  { %v1371_v1 = vmax.f32 %v1257_v46, 0.0  ;;  %2067 = vmatmul.bf16.gmra.mxu2 %v4558_v52  ;;  %v1374_v54 = vmax.f32 %v1082_v24, 0.0  ;;  %v3775_v24 = vld [vmem:[#allocation8 + $0x144] sm:$0xf] }
 0x269   :  { %2156 = vmatmul.bf16.gmra.mxu3 %v4566_v28  ;;  %v5587_v28 = vld [vmem:[#allocation16_spill] sm:$0xff] }
 0x26a   :  { %v4650_v6 = vpack.c.bf16 %v1371_v1, %v1367_v36 }
 0x26b   :  { %v1170_v34 = vpop.f32.mrf.mxu2  ;;  %v994_v33 = vpop.f32.mrf.mxu0 }
 0x26c   :  { %5585 = vst [vmem:[#allocation54_spill] sm:$0xff] %v4650_v6  ;;  %v1171_v21 = vadd.f32 %v1170_v34, %v4515_v59  ;;  %v1259_v61 = vpop.f32.mrf.mxu3  ;;  %v995_v38 = vadd.f32 %v994_v33, %v4506_v3  ;;  %v1083_v63 = vpop.f32.mrf.mxu1 }
 0x26e   :  { %v1260_v27 = vadd.f32 %v1259_v61, %v1171_v21  ;;  %v1084_v10 = vadd.f32 %v1083_v63, %v995_v38  ;;  %v5588_v21 = vld [vmem:[#allocation17_spill] sm:$0xff]  ;;  %v3579_v61 = vld [vmem:[#allocation8 + $0x148] sm:$0xf0]  ;;  %v3743_v63 = vld [vmem:[#allocation8 + $0x44] sm:$0xf] }
 0x26f   :  { %v3582_v38 = vor.u32 %v3775_v24, %v3579_v61  ;;  %v3759_v61 = vld [vmem:[#allocation8 + $0xc4] sm:$0xf] }
 0x270   :  { %v1378_v48 = vmax.f32 %v1084_v10, 0.0  ;;  %v1375_v33 = vmax.f32 %v1260_v27, 0.0  ;;  %v3451_v10 = vld [vmem:[#allocation8 + $0x48] sm:$0xf0] }
 0x271   :  { %2403 = vmatpush.bf16.msrb.mxu2 %v3582_v38 }
 0x272   :  { %v4654_v32 = vpack.c.bf16 %v1378_v48, %v1374_v54  ;;  %v3791_v54 = vld [vmem:[#allocation8 + $0x1c4] sm:$0xf] }
 0x273   :  { %v1172_v4 = vpop.f32.mrf.mxu2  ;;  %v997_v40 = vpop.f32.mrf.mxu0 }
 0x274   :  { %5586 = vst [vmem:[#allocation55_spill] sm:$0xff] %v4654_v32  ;;  %v1173_v0 = vadd.f32 %v1172_v4, %v4515_v59  ;;  %v1261_v58 = vpop.f32.mrf.mxu3  ;;  %v998_v46 = vadd.f32 %v997_v40, %v4506_v3  ;;  %v1086_v36 = vpop.f32.mrf.mxu1 }
 0x276   :  { %v1262_v1 = vadd.f32 %v1261_v58, %v1173_v0  ;;  %v1087_v34 = vadd.f32 %v1086_v36, %v998_v46  ;;  %1894 = vmatmul.bf16.gmra.mxu0 %v5587_v28  ;;  %v3454_v0 = vor.u32 %v3743_v63, %v3451_v10  ;;  %v3643_v58 = vld [vmem:[#allocation8 + $0x1c8] sm:$0xf0] }
 0x277   :  { %1983 = vmatmul.bf16.gmra.mxu1 %v5588_v21  ;;  %v3646_v36 = vor.u32 %v3791_v54, %v3643_v58  ;;  %v3515_v21 = vld [vmem:[#allocation8 + $0xc8] sm:$0xf0] }
 0x278   :  { %v1379_v52 = vmax.f32 %v1262_v1, 0.0  ;;  %2072 = vmatmul.bf16.gmra.mxu2 %v4570_v17  ;;  %2225 = vmatpush.bf16.msrb.mxu0 %v3454_v0  ;;  %v3518_v28 = vor.u32 %v3759_v61, %v3515_v21 }
 0x279   :  { %2161 = vmatmul.bf16.gmra.mxu3 %v4578_v7 }
 0x27a   :  { %v4662_v48 = vpack.c.bf16 %v1379_v52, %v1375_v33  ;;  %2492 = vmatpush.bf16.msrb.mxu3 %v3646_v36  ;;  %v1382_v52 = vmax.f32 %v1087_v34, 0.0  ;;  %2314 = vmatpush.bf16.msrb.mxu1 %v3518_v28  ;;  %v5592_v34 = vld [vmem:[#allocation19_spill] sm:$0xff] }
 0x27b   :  { %v1175_v4 = vpop.f32.mrf.mxu2  ;;  %v999_v46 = vpop.f32.mrf.mxu0 }
 0x27c   :  { %5589 = vst [vmem:[#allocation56_spill] sm:$0xff] %v4662_v48  ;;  %v1176_v27 = vadd.f32 %v1175_v4, %v4515_v59  ;;  %v1264_v40 = vpop.f32.mrf.mxu3  ;;  %v1000_v1 = vadd.f32 %v999_v46, %v4506_v3  ;;  %v1088_v7 = vpop.f32.mrf.mxu1 }
 0x27e   :  { %v1265_v17 = vadd.f32 %v1264_v40, %v1176_v27  ;;  %v1089_v24 = vadd.f32 %v1088_v7, %v1000_v1  ;;  %v5591_v40 = vld [vmem:[#allocation18_spill] sm:$0xff] }
 0x280   :  { %v1386_v33 = vmax.f32 %v1089_v24, 0.0  ;;  %v1383_v7 = vmax.f32 %v1265_v17, 0.0 }
 0x282   :  { %v4666_v10 = vpack.c.bf16 %v1386_v33, %v1382_v52 }
 0x283   :  { %v1177_v63 = vpop.f32.mrf.mxu2  ;;  %v1002_v54 = vpop.f32.mrf.mxu0 }
 0x284   :  { %5590 = vst [vmem:[#allocation57_spill] sm:$0xff] %v4666_v10  ;;  %v1178_v4 = vadd.f32 %v1177_v63, %v4515_v59  ;;  %v1266_v38 = vpop.f32.mrf.mxu3  ;;  %v1003_v58 = vadd.f32 %v1002_v54, %v4506_v3  ;;  %v1091_v46 = vpop.f32.mrf.mxu1 }
 0x286   :  { %v1267_v0 = vadd.f32 %v1266_v38, %v1178_v4  ;;  %v1092_v27 = vadd.f32 %v1091_v46, %v1003_v58  ;;  %1899 = vmatmul.bf16.gmra.mxu0 %v5591_v40 }
 0x287   :  { %1988 = vmatmul.bf16.gmra.mxu1 %v5592_v34 }
 0x288   :  { %v1387_v36 = vmax.f32 %v1267_v0, 0.0  ;;  %2077 = vmatmul.bf16.gmra.mxu2 %v4582_v53  ;;  %v1390_v17 = vmax.f32 %v1092_v27, 0.0  ;;  %v3773_v27 = vld [vmem:[#allocation8 + $0x134] sm:$0xf] }
 0x289   :  { %2166 = vmatmul.bf16.gmra.mxu3 %v4590_v55 }
 0x28a   :  { %v4674_v28 = vpack.c.bf16 %v1387_v36, %v1383_v7 }
 0x28b   :  { %v1180_v21 = vpop.f32.mrf.mxu2  ;;  %v1004_v61 = vpop.f32.mrf.mxu0 }
 0x28c   :  { %5593 = vst [vmem:[#allocation18_spill] sm:$0xff] %v4674_v28  ;;  %v1181_v1 = vadd.f32 %v1180_v21, %v4515_v59  ;;  %v1269_v24 = vpop.f32.mrf.mxu3  ;;  %v1005_v52 = vadd.f32 %v1004_v61, %v4506_v3  ;;  %v1093_v33 = vpop.f32.mrf.mxu1 }
 0x28e   :  { %v1270_v63 = vadd.f32 %v1269_v24, %v1181_v1  ;;  %v1094_v4 = vadd.f32 %v1093_v33, %v1005_v52  ;;  %v3571_v1 = vld [vmem:[#allocation8 + $0x138] sm:$0xf0]  ;;  %v3741_v52 = vld [vmem:[#allocation8 + $0x34] sm:$0xf] }
 0x28f   :  { %v3574_v24 = vor.u32 %v3773_v27, %v3571_v1  ;;  %v3443_v33 = vld [vmem:[#allocation8 + $0x38] sm:$0xf0]  ;;  %v3757_v1 = vld [vmem:[#allocation8 + $0xb4] sm:$0xf] }
 0x290   :  { %v1394_v38 = vmax.f32 %v1094_v4, 0.0  ;;  %v1391_v61 = vmax.f32 %v1270_v63, 0.0  ;;  %v3789_v4 = vld [vmem:[#allocation8 + $0x1b4] sm:$0xf] }
 0x291   :  { %2404 = vmatpush.bf16.msrb.mxu2 %v3574_v24 }
 0x292   :  { %v4678_v58 = vpack.c.bf16 %v1394_v38, %v1390_v17 }
 0x293   :  { %v1182_v54 = vpop.f32.mrf.mxu2  ;;  %v1007_v7 = vpop.f32.mrf.mxu0 }
 0x294   :  { %5594 = vst [vmem:[#allocation58_spill] sm:$0xff] %v4678_v58  ;;  %v1183_v46 = vadd.f32 %v1182_v54, %v4515_v59  ;;  %v1271_v0 = vpop.f32.mrf.mxu3  ;;  %v1008_v36 = vadd.f32 %v1007_v7, %v4506_v3  ;;  %v1096_v55 = vpop.f32.mrf.mxu1  ;;  %v3635_v54 = vld [vmem:[#allocation8 + $0x1b8] sm:$0xf0] }
 0x295   :  { %v3638_v7 = vor.u32 %v3789_v4, %v3635_v54 }
 0x296   :  { %v1272_v21 = vadd.f32 %v1271_v0, %v1183_v46  ;;  %v1097_v53 = vadd.f32 %v1096_v55, %v1008_v36  ;;  %1904 = vmatmul.bf16.gmra.mxu0 %v4396_v37  ;;  %v3446_v55 = vor.u32 %v3741_v52, %v3443_v33 }
 0x297   :  { %1993 = vmatmul.bf16.gmra.mxu1 %v4406_v22  ;;  %2493 = vmatpush.bf16.msrb.mxu3 %v3638_v7 }
 0x298   :  { %v1395_v34 = vmax.f32 %v1272_v21, 0.0  ;;  %2082 = vmatmul.bf16.gmra.mxu2 %v4594_v8  ;;  %2226 = vmatpush.bf16.msrb.mxu0 %v3446_v55  ;;  %v3507_v8 = vld [vmem:[#allocation8 + $0xb8] sm:$0xf0] }
 0x299   :  { %2171 = vmatmul.bf16.gmra.mxu3 %v4602_v50  ;;  %v3510_v22 = vor.u32 %v3757_v1, %v3507_v8 }
 0x29a   :  { %v4686_v17 = vpack.c.bf16 %v1395_v34, %v1391_v61  ;;  %v1398_v34 = vmax.f32 %v1097_v53, 0.0  ;;  %v5597_v53 = vld [vmem:[#allocation21_spill] sm:$0xff] }
 0x29b   :  { %v1185_v38 = vpop.f32.mrf.mxu2  ;;  %v1009_v0 = vpop.f32.mrf.mxu0  ;;  %2315 = vmatpush.bf16.msrb.mxu1 %v3510_v22 }
 0x29c   :  { %5595 = vst [vmem:[#allocation59_spill] sm:$0xff] %v4686_v17  ;;  %v1186_v63 = vadd.f32 %v1185_v38, %v4515_v59  ;;  %v1274_v46 = vpop.f32.mrf.mxu3  ;;  %v1010_v36 = vadd.f32 %v1009_v0, %v4506_v3  ;;  %v1098_v21 = vpop.f32.mrf.mxu1 }
 0x29e   :  { %v1275_v50 = vadd.f32 %v1274_v46, %v1186_v63  ;;  %v1099_v27 = vadd.f32 %v1098_v21, %v1010_v36 }
 0x2a0   :  { %v1402_v61 = vmax.f32 %v1099_v27, 0.0  ;;  %v1399_v46 = vmax.f32 %v1275_v50, 0.0  ;;  %v1540_v50 = vld [vmem:[%s5460_s4] sm:$0x3] }
 0x2a2   :  { %v4690_v33 = vpack.c.bf16 %v1402_v61, %v1398_v34 }
 0x2a3   :  { %v1187_v52 = vpop.f32.mrf.mxu2  ;;  %v1012_v4 = vpop.f32.mrf.mxu0 }
 0x2a4   :  { %5596 = vst [vmem:[#allocation60_spill] sm:$0xff] %v4690_v33  ;;  %v1188_v38 = vadd.f32 %v1187_v52, %v4515_v59  ;;  %v1276_v24 = vpop.f32.mrf.mxu3  ;;  %v1013_v54 = vadd.f32 %v1012_v4, %v4506_v3  ;;  %v1101_v0 = vpop.f32.mrf.mxu1  ;;  %v4705_v4 = vperm.slane %v1540_v50, 0 }
 0x2a6   :  { %v1277_v55 = vadd.f32 %v1276_v24, %v1188_v38  ;;  %v1102_v63 = vadd.f32 %v1101_v0, %v1013_v54  ;;  %1909 = vmatmul.bf16.gmra.mxu0 %v4410_v42 }
 0x2a7   :  { %1998 = vmatmul.bf16.gmra.mxu1 %v5597_v53 }
 0x2a8   :  { %v1403_v7 = vmax.f32 %v1277_v55, 0.0  ;;  %2087 = vmatmul.bf16.gmra.mxu2 %v4606_v13  ;;  %v1406_v38 = vmax.f32 %v1102_v63, 0.0  ;;  %v3771_v63 = vld [vmem:[#allocation8 + $0x124] sm:$0xf] }
 0x2a9   :  { %2176 = vmatmul.bf16.gmra.mxu3 %v4614_v44 }
 0x2aa   :  { %v4698_v22 = vpack.c.bf16 %v1403_v7, %v1399_v46 }
 0x2ab   :  { %v1190_v8 = vpop.f32.mrf.mxu2  ;;  %v1014_v27 = vpop.f32.mrf.mxu0 }
 0x2ac   :  { %5598 = vst [vmem:[#allocation21_spill] sm:$0xff] %v4698_v22  ;;  %v1191_v36 = vadd.f32 %v1190_v8, %v4515_v59  ;;  %v1279_v21 = vpop.f32.mrf.mxu3  ;;  %v1015_v1 = vadd.f32 %v1014_v27, %v4506_v3  ;;  %v1103_v34 = vpop.f32.mrf.mxu1 }
 0x2ae   :  { %v1280_v61 = vadd.f32 %v1279_v21, %v1191_v36  ;;  %v1104_v52 = vadd.f32 %v1103_v34, %v1015_v1  ;;  %v3563_v34 = vld [vmem:[#allocation8 + $0x128] sm:$0xf0] }
 0x2af   :  { %v3566_v50 = vor.u32 %v3771_v63, %v3563_v34  ;;  %v3755_v34 = vld [vmem:[#allocation8 + $0xa4] sm:$0xf] }
 0x2b0   :  { %v1410_v24 = vmax.f32 %v1104_v52, 0.0  ;;  %v1407_v27 = vmax.f32 %v1280_v61, 0.0  ;;  %v3435_v52 = vld [vmem:[#allocation8 + $0x28] sm:$0xf0] }
 0x2b1   :  { %2405 = vmatpush.bf16.msrb.mxu2 %v3566_v50 }
 0x2b2   :  { %v4707_v0 = vpack.c.bf16 %v1410_v24, %v1406_v38  ;;  %v3787_v38 = vld [vmem:[#allocation8 + $0x1a4] sm:$0xf]  ;;  %v3627_v24 = vld [vmem:[#allocation8 + $0x1a8] sm:$0xf0] }
 0x2b3   :  { %v1192_v54 = vpop.f32.mrf.mxu2  ;;  %v1875_v7 = vpop.f32.mrf.mxu0 }
 0x2b4   :  { %5599 = vst [vmem:[#allocation61_spill] sm:$0xff] %v4707_v0  ;;  %v1193_v55 = vadd.f32 %v1192_v54, %v4515_v59  ;;  %v1281_v46 = vpop.f32.mrf.mxu3  ;;  %v1876_v3 = vadd.f32 %v1875_v7, %v4705_v4  ;;  %v1964_v8 = vpop.f32.mrf.mxu1  ;;  %v3739_v59 = vld [vmem:[#allocation8 + $0x24] sm:$0xf]  ;;  %v3630_v7 = vor.u32 %v3787_v38, %v3627_v24 }
 0x2b6   :  { %v1282_v36 = vadd.f32 %v1281_v46, %v1193_v55  ;;  %v1965_v21 = vadd.f32 %v1964_v8, %v1876_v3  ;;  %1914 = vmatmul.bf16.gmra.mxu0 %v4422_v18  ;;  %v3438_v46 = vor.u32 %v3739_v59, %v3435_v52  ;;  %2494 = vmatpush.bf16.msrb.mxu3 %v3630_v7 }
 0x2b7   :  { %2003 = vmatmul.bf16.gmra.mxu1 %v4430_v19  ;;  %v3499_v19 = vld [vmem:[#allocation8 + $0xa8] sm:$0xf0] }
 0x2b8   :  { %v1411_v1 = vmax.f32 %v1282_v36, 0.0  ;;  %2092 = vmatmul.bf16.gmra.mxu2 %v4618_v31  ;;  %2227 = vmatpush.bf16.msrb.mxu0 %v3438_v46  ;;  %v3502_v18 = vor.u32 %v3755_v34, %v3499_v19 }
 0x2b9   :  { %2181 = vmatmul.bf16.gmra.mxu3 %v4626_v20 }
 0x2ba   :  { %v4715_v54 = vpack.c.bf16 %v1411_v1, %v1407_v27  ;;  %2316 = vmatpush.bf16.msrb.mxu1 %v3502_v18 }
 0x2bb   :  { %v2053_v55 = vpop.f32.mrf.mxu2  ;;  %v1877_v8 = vpop.f32.mrf.mxu0 }
 0x2bc   :  { %5600 = vst [vmem:[#allocation62_spill] sm:$0xff] %v4715_v54  ;;  %v2054_v61 = vadd.f32 %v2053_v55, %v1965_v21  ;;  %v2142_v3 = vpop.f32.mrf.mxu3  ;;  %v1878_v36 = vadd.f32 %v1877_v8, %v4705_v4  ;;  %v1966_v31 = vpop.f32.mrf.mxu1 }
 0x2be   :  { %v4718_v20 = vadd.f32 %v2142_v3, %v2054_v61  ;;  %v1967_v63 = vadd.f32 %v1966_v31, %v1878_v36 }
 0x2c3   :  { %v2055_v27 = vpop.f32.mrf.mxu2  ;;  %v1880_v52 = vpop.f32.mrf.mxu0 }
 0x2c4   :  { %v2056_v1 = vadd.f32 %v2055_v27, %v1967_v63  ;;  %v2144_v59 = vpop.f32.mrf.mxu3  ;;  %v1881_v21 = vadd.f32 %v1880_v52, %v4705_v4  ;;  %v1969_v38 = vpop.f32.mrf.mxu1 }
 0x2c6   :  { %v4721_v50 = vadd.f32 %v2144_v59, %v2056_v1  ;;  %v1970_v24 = vadd.f32 %v1969_v38, %v1881_v21  ;;  %1919 = vmatmul.bf16.gmra.mxu0 %v4434_v25  ;;  %v3769_v21 = vld [vmem:[#allocation8 + $0x114] sm:$0xf]  ;;  %v3555_v38 = vld [vmem:[#allocation8 + $0x118] sm:$0xf0] }
 0x2c7   :  { %2008 = vmatmul.bf16.gmra.mxu1 %v4442_v35 }
 0x2c8   :  { %2097 = vmatmul.bf16.gmra.mxu2 %v4630_v60 }
 0x2c9   :  { %2186 = vmatmul.bf16.gmra.mxu3 %v4638_v16 }
 0x2cb   :  { %v2058_v19 = vpop.f32.mrf.mxu2  ;;  %v1882_v55 = vpop.f32.mrf.mxu0 }
 0x2cc   :  { %v2059_v31 = vadd.f32 %v2058_v19, %v1970_v24  ;;  %v2147_v18 = vpop.f32.mrf.mxu3  ;;  %v1883_v46 = vadd.f32 %v1882_v55, %v4705_v4  ;;  %v1971_v7 = vpop.f32.mrf.mxu1  ;;  %v3737_v24 = vld [vmem:[#allocation8 + $0x14] sm:$0xf]  ;;  %v3558_v19 = vor.u32 %v3769_v21, %v3555_v38  ;;  %v3619_v55 = vld [vmem:[#allocation8 + $0x198] sm:$0xf0] }
 0x2cd   :  { %v3491_v21 = vld [vmem:[#allocation8 + $0x98] sm:$0xf0] }
 0x2ce   :  { %v4728_v61 = vadd.f32 %v2147_v18, %v2059_v31  ;;  %v1972_v3 = vadd.f32 %v1971_v7, %v1883_v46  ;;  %v3427_v31 = vld [vmem:[#allocation8 + $0x18] sm:$0xf0]  ;;  %v3785_v18 = vld [vmem:[#allocation8 + $0x194] sm:$0xf]  ;;  %2406 = vmatpush.bf16.msrb.mxu2 %v3558_v19 }
 0x2cf   :  { %v3430_v7 = vor.u32 %v3737_v24, %v3427_v31 }
 0x2d1   :  { %2228 = vmatpush.bf16.msrb.mxu0 %v3430_v7 }
 0x2d3   :  { %v2060_v8 = vpop.f32.mrf.mxu2  ;;  %v1885_v34 = vpop.f32.mrf.mxu0 }
 0x2d4   :  { %v2061_v36 = vadd.f32 %v2060_v8, %v1972_v3  ;;  %v2149_v63 = vpop.f32.mrf.mxu3  ;;  %v1886_v27 = vadd.f32 %v1885_v34, %v4705_v4  ;;  %v1974_v1 = vpop.f32.mrf.mxu1  ;;  %v3622_v3 = vor.u32 %v3785_v18, %v3619_v55 }
 0x2d6   :  { %v4731_v59 = vadd.f32 %v2149_v63, %v2061_v36  ;;  %v1975_v52 = vadd.f32 %v1974_v1, %v1886_v27  ;;  %1924 = vmatmul.bf16.gmra.mxu0 %v4446_v14  ;;  %2495 = vmatpush.bf16.msrb.mxu3 %v3622_v3 }
 0x2d7   :  { %2013 = vmatmul.bf16.gmra.mxu1 %v4454_v57 }
 0x2d8   :  { %2102 = vmatmul.bf16.gmra.mxu2 %v4642_v56  ;;  %v3753_v56 = vld [vmem:[#allocation8 + $0x94] sm:$0xf] }
 0x2d9   :  { %2191 = vmatmul.bf16.gmra.mxu3 %v4650_v6  ;;  %v3494_v57 = vor.u32 %v3753_v56, %v3491_v21 }
 0x2db   :  { %v2063_v46 = vpop.f32.mrf.mxu2  ;;  %v1887_v63 = vpop.f32.mrf.mxu0  ;;  %2317 = vmatpush.bf16.msrb.mxu1 %v3494_v57 }
 0x2dc   :  { %v2064_v8 = vadd.f32 %v2063_v46, %v1975_v52  ;;  %v2152_v36 = vpop.f32.mrf.mxu3  ;;  %v1888_v34 = vadd.f32 %v1887_v63, %v4705_v4  ;;  %v1976_v27 = vpop.f32.mrf.mxu1 }
 0x2de   :  { %v4738_v1 = vadd.f32 %v2152_v36, %v2064_v8  ;;  %v1977_v6 = vadd.f32 %v1976_v27, %v1888_v34 }
 0x2e3   :  { %v2065_v38 = vpop.f32.mrf.mxu2  ;;  %v1890_v24 = vpop.f32.mrf.mxu0 }
 0x2e4   :  { %v2066_v14 = vadd.f32 %v2065_v38, %v1977_v6  ;;  %v2154_v16 = vpop.f32.mrf.mxu3  ;;  %v1891_v52 = vadd.f32 %v1890_v24, %v4705_v4  ;;  %v1979_v31 = vpop.f32.mrf.mxu1  ;;  %v3767_v24 = vld [vmem:[#allocation8 + $0x104] sm:$0xf] }
 0x2e6   :  { %v4741_v19 = vadd.f32 %v2154_v16, %v2066_v14  ;;  %v1980_v18 = vadd.f32 %v1979_v31, %v1891_v52  ;;  %1929 = vmatmul.bf16.gmra.mxu0 %v4458_v47  ;;  %v3547_v52 = vld [vmem:[#allocation8 + $0x108] sm:$0xf0]  ;;  %v3735_v31 = vld [vmem:[#allocation8 + $0x4] sm:$0xf] }
 0x2e7   :  { %2018 = vmatmul.bf16.gmra.mxu1 %v4466_v43 }
 0x2e8   :  { %2107 = vmatmul.bf16.gmra.mxu2 %v4654_v32 }
 0x2e9   :  { %2196 = vmatmul.bf16.gmra.mxu3 %v4662_v48  ;;  %v5605_v48 = vld [vmem:[#allocation39_spill] sm:$0xff] }
 0x2eb   :  { %v2068_v55 = vpop.f32.mrf.mxu2  ;;  %v1892_v46 = vpop.f32.mrf.mxu0 }
 0x2ec   :  { %v2069_v56 = vadd.f32 %v2068_v55, %v1980_v18  ;;  %v2157_v6 = vpop.f32.mrf.mxu3  ;;  %v1893_v7 = vadd.f32 %v1892_v46, %v4705_v4  ;;  %v1981_v3 = vpop.f32.mrf.mxu1  ;;  %v3550_v55 = vor.u32 %v3767_v24, %v3547_v52  ;;  %v3611_v46 = vld [vmem:[#allocation8 + $0x188] sm:$0xf0]  ;;  %v3751_v52 = vld [vmem:[#allocation8 + $0x84] sm:$0xf] }
 0x2ee   :  { %v4748_v8 = vadd.f32 %v2157_v6, %v2069_v56  ;;  %v1982_v14 = vadd.f32 %v1981_v3, %v1893_v7  ;;  %v3419_v56 = vld [vmem:[#allocation8 + $0x8] sm:$0xf0]  ;;  %v3783_v6 = vld [vmem:[#allocation8 + $0x184] sm:$0xf]  ;;  %2407 = vmatpush.bf16.msrb.mxu2 %v3550_v55 }
 0x2f3   :  { %v2070_v57 = vpop.f32.mrf.mxu2  ;;  %v1895_v63 = vpop.f32.mrf.mxu0 }
 0x2f4   :  { %v2071_v16 = vadd.f32 %v2070_v57, %v1982_v14  ;;  %v2159_v36 = vpop.f32.mrf.mxu3  ;;  %v1896_v34 = vadd.f32 %v1895_v63, %v4705_v4  ;;  %v1984_v27 = vpop.f32.mrf.mxu1  ;;  %v3422_v57 = vor.u32 %v3735_v31, %v3419_v56  ;;  %v3483_v31 = vld [vmem:[#allocation8 + $0x88] sm:$0xf0] }
 0x2f5   :  { %v3486_v56 = vor.u32 %v3751_v52, %v3483_v31 }
 0x2f6   :  { %v4751_v21 = vadd.f32 %v2159_v36, %v2071_v16  ;;  %v1985_v38 = vadd.f32 %v1984_v27, %v1896_v34  ;;  %1934 = vmatmul.bf16.gmra.mxu0 %v4470_v30  ;;  %v3614_v16 = vor.u32 %v3783_v6, %v3611_v46  ;;  %v5604_v30 = vld [vmem:[#allocation15_spill] sm:$0xff] }
 0x2f7   :  { %2023 = vmatmul.bf16.gmra.mxu1 %v4478_v2  ;;  %2229 = vmatpush.bf16.msrb.mxu0 %v3422_v57 }
 0x2f8   :  { %2112 = vmatmul.bf16.gmra.mxu2 %v4666_v10  ;;  %2496 = vmatpush.bf16.msrb.mxu3 %v3614_v16  ;;  %v5493_v16 = vmax.f32 %v4721_v50, 0.0 }
 0x2f9   :  { %2201 = vmatmul.bf16.gmra.mxu3 %v4674_v28  ;;  %v5495_v28 = vmax.f32 %v4718_v20, 0.0  ;;  %2318 = vmatpush.bf16.msrb.mxu1 %v3486_v56 }
 0x2fb   :  { %v2073_v18 = vpop.f32.mrf.mxu2  ;;  %v1897_v14 = vpop.f32.mrf.mxu0 }
 0x2fc   :  { %v2074_v7 = vadd.f32 %v2073_v18, %v1985_v38  ;;  %v2162_v3 = vpop.f32.mrf.mxu3  ;;  %v1898_v36 = vadd.f32 %v1897_v14, %v4705_v4  ;;  %v1986_v63 = vpop.f32.mrf.mxu1 }
 0x2fe   :  { %v4758_v34 = vadd.f32 %v2162_v3, %v2074_v7  ;;  %v1987_v27 = vadd.f32 %v1986_v63, %v1898_v36 }
 0x300   :  { %v5494_v24 = vmax.f32 %v4758_v34, 0.0 }
 0x302   :  { %v4766_v38 = vmax.f32 %v5495_v28, %v5494_v24 }
 0x303   :  { %v2075_v18 = vpop.f32.mrf.mxu2  ;;  %v1900_v46 = vpop.f32.mrf.mxu0 }
 0x304   :  { %v2076_v55 = vadd.f32 %v2075_v18, %v1987_v27  ;;  %v2164_v6 = vpop.f32.mrf.mxu3  ;;  %v1901_v7 = vadd.f32 %v1900_v46, %v4705_v4  ;;  %v1989_v3 = vpop.f32.mrf.mxu1 }
 0x306   :  { %v4769_v14 = vadd.f32 %v2164_v6, %v2076_v55  ;;  %v1990_v57 = vadd.f32 %v1989_v3, %v1901_v7  ;;  %1939 = vmatmul.bf16.gmra.mxu0 %v4482_v62  ;;  %v5497_v7 = vmax.f32 %v4728_v61, 0.0 }
 0x307   :  { %2028 = vmatmul.bf16.gmra.mxu1 %v4490_v9 }
 0x308   :  { %v5492_v36 = vmax.f32 %v4769_v14, 0.0  ;;  %2117 = vmatmul.bf16.gmra.mxu2 %v4678_v58 }
 0x309   :  { %2206 = vmatmul.bf16.gmra.mxu3 %v4686_v17 }
 0x30a   :  { %v4781_v63 = vmax.f32 %v5493_v16, %v5492_v36 }
 0x30b   :  { %v2078_v27 = vpop.f32.mrf.mxu2  ;;  %v1902_v18 = vpop.f32.mrf.mxu0 }
 0x30c   :  { %v2079_v52 = vadd.f32 %v2078_v27, %v1990_v57  ;;  %v2167_v31 = vpop.f32.mrf.mxu3  ;;  %v1903_v56 = vadd.f32 %v1902_v18, %v4705_v4  ;;  %v1991_v55 = vpop.f32.mrf.mxu1 }
 0x30e   :  { %v4784_v6 = vadd.f32 %v2167_v31, %v2079_v52  ;;  %v1992_v46 = vadd.f32 %v1991_v55, %v1903_v56  ;;  %v5501_v56 = vmax.f32 %v4731_v59, 0.0 }
 0x310   :  { %v5496_v3 = vmax.f32 %v4784_v6, 0.0 }
 0x312   :  { %v4792_v36 = vmax.f32 %v5497_v7, %v5496_v3 }
 0x313   :  { %v2080_v16 = vpop.f32.mrf.mxu2  ;;  %v1905_v24 = vpop.f32.mrf.mxu0 }
 0x314   :  { %v2081_v57 = vadd.f32 %v2080_v16, %v1992_v46  ;;  %v2169_v27 = vpop.f32.mrf.mxu3  ;;  %v1906_v18 = vadd.f32 %v1905_v24, %v4705_v4  ;;  %v1994_v28 = vpop.f32.mrf.mxu1 }
 0x316   :  { %v4795_v52 = vadd.f32 %v2169_v27, %v2081_v57  ;;  %v1995_v31 = vadd.f32 %v1994_v28, %v1906_v18  ;;  %1944 = vmatmul.bf16.gmra.mxu0 %v4494_v45 }
 0x317   :  { %2033 = vmatmul.bf16.gmra.mxu1 %v4502_v26 }
 0x318   :  { %v5500_v55 = vmax.f32 %v4795_v52, 0.0  ;;  %2122 = vmatmul.bf16.gmra.mxu2 %v4690_v33  ;;  %v5505_v33 = vmax.f32 %v4738_v1, 0.0 }
 0x319   :  { %2211 = vmatmul.bf16.gmra.mxu3 %v4698_v22 }
 0x31a   :  { %v4807_v24 = vmax.f32 %v5501_v56, %v5500_v55 }
 0x31b   :  { %v2083_v16 = vpop.f32.mrf.mxu2  ;;  %v1907_v57 = vpop.f32.mrf.mxu0 }
 0x31c   :  { %v2084_v28 = vadd.f32 %v2083_v16, %v1995_v31  ;;  %v2172_v46 = vpop.f32.mrf.mxu3  ;;  %v1908_v27 = vadd.f32 %v1907_v57, %v4705_v4  ;;  %v1996_v18 = vpop.f32.mrf.mxu1 }
 0x31e   :  { %v4810_v3 = vadd.f32 %v2172_v46, %v2084_v28  ;;  %v1997_v7 = vadd.f32 %v1996_v18, %v1908_v27  ;;  %v5509_v27 = vmax.f32 %v4741_v19, 0.0 }
 0x320   :  { %v5504_v22 = vmax.f32 %v4810_v3, 0.0 }
 0x322   :  { %v4818_v55 = vmax.f32 %v5505_v33, %v5504_v22 }
 0x323   :  { %v2085_v56 = vpop.f32.mrf.mxu2  ;;  %v1910_v26 = vpop.f32.mrf.mxu0 }
 0x324   :  { %v2086_v31 = vadd.f32 %v2085_v56, %v1997_v7  ;;  %v2174_v16 = vpop.f32.mrf.mxu3  ;;  %v1911_v57 = vadd.f32 %v1910_v26, %v4705_v4  ;;  %v1999_v45 = vpop.f32.mrf.mxu1 }
 0x326   :  { %v4821_v28 = vadd.f32 %v2174_v16, %v2086_v31  ;;  %v2000_v46 = vadd.f32 %v1999_v45, %v1911_v57  ;;  %1949 = vmatmul.bf16.gmra.mxu0 %v4508_v41 }
 0x327   :  { %2038 = vmatmul.bf16.gmra.mxu1 %v4518_v29 }
 0x328   :  { %v5508_v18 = vmax.f32 %v4821_v28, 0.0  ;;  %2127 = vmatmul.bf16.gmra.mxu2 %v4707_v0  ;;  %v5512_v0 = vmax.f32 %v4748_v8, 0.0 }
 0x329   :  { %2216 = vmatmul.bf16.gmra.mxu3 %v4715_v54 }
 0x32a   :  { %v4833_v26 = vmax.f32 %v5509_v27, %v5508_v18 }
 0x32b   :  { %v2088_v7 = vpop.f32.mrf.mxu2  ;;  %v1912_v31 = vpop.f32.mrf.mxu0 }
 0x32c   :  { %v2089_v45 = vadd.f32 %v2088_v7, %v2000_v46  ;;  %v2177_v56 = vpop.f32.mrf.mxu3  ;;  %v1913_v16 = vadd.f32 %v1912_v31, %v4705_v4  ;;  %v2001_v57 = vpop.f32.mrf.mxu1 }
 0x32e   :  { %v4836_v22 = vadd.f32 %v2177_v56, %v2089_v45  ;;  %v2002_v33 = vadd.f32 %v2001_v57, %v1913_v16  ;;  %v5518_v56 = vmax.f32 %v4751_v21, 0.0  ;;  %v5601_v57 = vld [vmem:[#allocation36_spill] sm:$0xff] }
 0x330   :  { %v5511_v54 = vmax.f32 %v4836_v22, 0.0 }
 0x332   :  { %v4844_v18 = vmax.f32 %v5512_v0, %v5511_v54  ;;  %v5602_v54 = vld [vmem:[#allocation37_spill] sm:$0xff] }
 0x333   :  { %v2090_v27 = vpop.f32.mrf.mxu2  ;;  %v4846_v29 = vpop.f32.mrf.mxu0 }
 0x334   :  { %v2091_v46 = vadd.f32 %v2090_v27, %v2002_v33  ;;  %v2179_v7 = vpop.f32.mrf.mxu3  ;;  %v4848_v31 = vpop.f32.mrf.mxu1 }
 0x336   :  { %v4850_v45 = vadd.f32 %v2179_v7, %v2091_v46  ;;  %2230 = vmatmul.bf16.vlgmr.msrb.gmra.mxu0 %v4298_v5 }
 0x337   :  { %2319 = vmatmul.bf16.vlgmr.msrb.gmra.mxu1 %v4310_v23 }
 0x338   :  { %v5517_v16 = vmax.f32 %v4850_v45, 0.0  ;;  %2408 = vmatmul.bf16.vlgmr.msrb.gmra.mxu2 %v5601_v57 }
 0x339   :  { %2497 = vmatmul.bf16.vlgmr.msrb.gmra.mxu3 %v5602_v54 }
 0x33a   :  { %v4862_v33 = vmax.f32 %v5518_v56, %v5517_v16 }
 0x33b   :  { %v4864_v27 = vpop.f32.mrf.mxu2  ;;  %v1917_v5 = vpop.f32.mrf.mxu0 }
 0x33c   :  { %v4866_v46 = vpop.f32.mrf.mxu3  ;;  %v1918_v7 = vadd.f32 %v1917_v5, %v4705_v4  ;;  %v2006_v0 = vpop.f32.mrf.mxu1  ;;  %v5603_v5 = vld [vmem:[#allocation38_spill] sm:$0xff] }
 0x33e   :  { %v2007_v41 = vadd.f32 %v2006_v0, %v1918_v7 }
 0x343   :  { %v2095_v23 = vpop.f32.mrf.mxu2  ;;  %v4869_v58 = vpop.f32.mrf.mxu0 }
 0x344   :  { %v2096_v17 = vadd.f32 %v2095_v23, %v2007_v41  ;;  %v2184_v57 = vpop.f32.mrf.mxu3  ;;  %v4871_v54 = vpop.f32.mrf.mxu1 }
 0x346   :  { %v4873_v9 = vadd.f32 %v2184_v57, %v2096_v17  ;;  %2235 = vmatmul.bf16.gmra.mxu0 %v4316_v49 }
 0x347   :  { %2324 = vmatmul.bf16.gmra.mxu1 %v4326_v12 }
 0x348   :  { %v5522_v16 = vmax.f32 %v4873_v9, 0.0  ;;  %2413 = vmatmul.bf16.gmra.mxu2 %v4534_v15 }
 0x349   :  { %2502 = vmatmul.bf16.gmra.mxu3 %v5603_v5 }
 0x34a   :  { %v4883_v41 = vmax.f32 %v4781_v63, %v5522_v16 }
 0x34b   :  { %v4885_v0 = vpop.f32.mrf.mxu2  ;;  %v1922_v17 = vpop.f32.mrf.mxu0 }
 0x34c   :  { %v4887_v7 = vpop.f32.mrf.mxu3  ;;  %v1923_v49 = vadd.f32 %v1922_v17, %v4705_v4  ;;  %v2011_v23 = vpop.f32.mrf.mxu1  ;;  %v5606_v17 = vld [vmem:[#allocation40_spill] sm:$0xff] }
 0x34e   :  { %v2012_v57 = vadd.f32 %v2011_v23, %v1923_v49 }
 0x353   :  { %v2100_v56 = vpop.f32.mrf.mxu2  ;;  %v1925_v15 = vpop.f32.mrf.mxu0 }
 0x354   :  { %v2101_v12 = vadd.f32 %v2100_v56, %v2012_v57  ;;  %v2189_v62 = vpop.f32.mrf.mxu3  ;;  %v1926_v5 = vadd.f32 %v1925_v15, %v4705_v4  ;;  %v2014_v10 = vpop.f32.mrf.mxu1 }
 0x356   :  { %v4891_v2 = vadd.f32 %v2189_v62, %v2101_v12  ;;  %v2015_v63 = vadd.f32 %v2014_v10, %v1926_v5  ;;  %2240 = vmatmul.bf16.gmra.mxu0 %v4332_v51 }
 0x357   :  { %2329 = vmatmul.bf16.gmra.mxu1 %v5604_v30 }
 0x358   :  { %v5525_v16 = vmax.f32 %v4891_v2, 0.0  ;;  %2418 = vmatmul.bf16.gmra.mxu2 %v5605_v48 }
 0x359   :  { %2507 = vmatmul.bf16.gmra.mxu3 %v5606_v17 }
 0x35a   :  { %v4901_v56 = vmax.f32 %v4807_v24, %v5525_v16 }
 0x35b   :  { %v2103_v49 = vpop.f32.mrf.mxu2  ;;  %v1927_v57 = vpop.f32.mrf.mxu0 }
 0x35c   :  { %v2104_v23 = vadd.f32 %v2103_v49, %v2015_v63  ;;  %v2192_v62 = vpop.f32.mrf.mxu3  ;;  %v1928_v10 = vadd.f32 %v1927_v57, %v4705_v4  ;;  %v2016_v51 = vpop.f32.mrf.mxu1 }
 0x35e   :  { %v4904_v12 = vadd.f32 %v2192_v62, %v2104_v23  ;;  %v2017_v15 = vadd.f32 %v2016_v51, %v1928_v10  ;;  %v5607_v62 = vld [vmem:[#allocation41_spill] sm:$0xff] }
 0x360   :  { %v5528_v30 = vmax.f32 %v4904_v12, 0.0 }
 0x362   :  { %v4910_v48 = vmax.f32 %v4818_v55, %v5528_v30  ;;  %v5608_v55 = vld [vmem:[#allocation42_spill] sm:$0xff] }
 0x363   :  { %v2105_v5 = vpop.f32.mrf.mxu2  ;;  %v1930_v16 = vpop.f32.mrf.mxu0 }
 0x364   :  { %v2106_v24 = vadd.f32 %v2105_v5, %v2017_v15  ;;  %v2194_v17 = vpop.f32.mrf.mxu3  ;;  %v1931_v63 = vadd.f32 %v1930_v16, %v4705_v4  ;;  %v2019_v49 = vpop.f32.mrf.mxu1 }
 0x366   :  { %v4913_v32 = vadd.f32 %v2194_v17, %v2106_v24  ;;  %v2020_v57 = vadd.f32 %v2019_v49, %v1931_v63  ;;  %2245 = vmatmul.bf16.gmra.mxu0 %v4348_v39  ;;  %v1916_v17 = vadd.f32 %v4846_v29, %v4705_v4 }
 0x367   :  { %2334 = vmatmul.bf16.gmra.mxu1 %v4358_v11 }
 0x368   :  { %v5527_v23 = vmax.f32 %v4913_v32, 0.0  ;;  %2423 = vmatmul.bf16.gmra.mxu2 %v5607_v62  ;;  %v2005_v62 = vadd.f32 %v4848_v31, %v1916_v17  ;;  %v5612_v17 = vld [vmem:[#allocation44_spill] sm:$0xff] }
 0x369   :  { %2512 = vmatmul.bf16.gmra.mxu3 %v5608_v55 }
 0x36a   :  { %v4923_v10 = vmax.f32 %v4833_v26, %v5527_v23  ;;  %v2094_v55 = vadd.f32 %v4864_v27, %v2005_v62 }
 0x36b   :  { %v2108_v16 = vpop.f32.mrf.mxu2  ;;  %v1932_v5 = vpop.f32.mrf.mxu0 }
 0x36c   :  { %v2109_v51 = vadd.f32 %v2108_v16, %v2020_v57  ;;  %v2197_v15 = vpop.f32.mrf.mxu3  ;;  %v1933_v24 = vadd.f32 %v1932_v5, %v4705_v4  ;;  %v2021_v39 = vpop.f32.mrf.mxu1  ;;  %v2183_v31 = vadd.f32 %v4866_v46, %v2094_v55  ;;  %v1921_v55 = vadd.f32 %v4869_v58, %v4705_v4 }
 0x36e   :  { %v4928_v11 = vadd.f32 %v2197_v15, %v2109_v51  ;;  %v2022_v63 = vadd.f32 %v2021_v39, %v1933_v24  ;;  %v5609_v15 = vld [vmem:[#allocation16_spill] sm:$0xff]  ;;  %v5610_v39 = vld [vmem:[#allocation17_spill] sm:$0xff] }
 0x370   :  { %v5529_v49 = vmax.f32 %v4928_v11, 0.0 }
 0x372   :  { %v4935_v26 = vmax.f32 %v4844_v18, %v5529_v49  ;;  %v5611_v18 = vld [vmem:[#allocation43_spill] sm:$0xff]  ;;  %v2010_v49 = vadd.f32 %v4871_v54, %v1921_v55 }
 0x373   :  { %v2110_v57 = vpop.f32.mrf.mxu2  ;;  %v1935_v23 = vpop.f32.mrf.mxu0 }
 0x374   :  { %v2111_v16 = vadd.f32 %v2110_v57, %v2022_v63  ;;  %v2199_v5 = vpop.f32.mrf.mxu3  ;;  %v2024_v30 = vpop.f32.mrf.mxu1  ;;  %v1936_v51 = vadd.f32 %v1935_v23, %v4705_v4  ;;  %v2610_v23 = vmax.f32 %v2183_v31, 0.0  ;;  %v5613_v31 = vmax.f32 %v4718_v20, 0.0 }
 0x376   :  { %v4938_v29 = vadd.f32 %v2199_v5, %v2111_v16  ;;  %2250 = vmatmul.bf16.gmra.mxu0 %v5609_v15  ;;  %v2025_v63 = vadd.f32 %v2024_v30, %v1936_v51  ;;  %v2099_v51 = vadd.f32 %v4885_v0, %v2010_v49  ;;  %v5615_v0 = vld [vmem:[#allocation19_spill] sm:$0xff] }
 0x377   :  { %2339 = vmatmul.bf16.gmra.mxu1 %v5610_v39 }
 0x378   :  { %v5530_v24 = vmax.f32 %v4938_v29, 0.0  ;;  %2428 = vmatmul.bf16.gmra.mxu2 %v5611_v18  ;;  %v2643_v18 = vmax.f32 %v4766_v38, %v2610_v23  ;;  %v2188_v20 = vadd.f32 %v4887_v7, %v2099_v51  ;;  %v5618_v7 = vmax.f32 %v4721_v50, 0.0 }
 0x379   :  { %2517 = vmatmul.bf16.gmra.mxu3 %v5612_v17  ;;  %v5619_v51 = vmax.f32 %v4769_v14, 0.0 }
 0x37a   :  { %v4950_v27 = vmax.f32 %v4862_v33, %v5530_v24 }
 0x37b   :  { %v2113_v62 = vpop.f32.mrf.mxu2  ;;  %v1937_v5 = vpop.f32.mrf.mxu0 }
 0x37c   :  { %v2114_v57 = vadd.f32 %v2113_v62, %v2025_v63  ;;  %v2202_v16 = vpop.f32.mrf.mxu3  ;;  %v2026_v46 = vpop.f32.mrf.mxu1  ;;  %v1938_v39 = vadd.f32 %v1937_v5, %v4705_v4  ;;  %v5614_v62 = vmax.f32 %v4758_v34, 0.0  ;;  %v5616_v34 = vld [vmem:[#allocation45_spill] sm:$0xff] }
 0x37e   :  { %v2203_v15 = vadd.f32 %v2202_v16, %v2114_v57  ;;  %v2027_v24 = vadd.f32 %v2026_v46, %v1938_v39 }
 0x380   :  { %v2626_v17 = vmax.f32 %v2203_v15, 0.0 }
 0x382   :  { %v2644_v33 = vmax.f32 %v2643_v18, %v2626_v17 }
 0x383   :  { %v2115_v30 = vpop.f32.mrf.mxu2  ;;  %v1940_v16 = vpop.f32.mrf.mxu0 }
 0x384   :  { %v2690_v63 = vsub.f32 %v5613_v31, %v2644_v33  ;;  %v2706_v43 = vsub.f32 %v5614_v62, %v2644_v33  ;;  %v2722_v58 = vsub.f32 %v2610_v23, %v2644_v33  ;;  %v2204_v57 = vpop.f32.mrf.mxu3  ;;  %v2738_v5 = vsub.f32 %v2626_v17, %v2644_v33  ;;  %v2029_v38 = vpop.f32.mrf.mxu1 }
 0x385   :  { %v2116_v47 = vadd.f32 %v2115_v30, %v2027_v24  ;;  %v1941_v54 = vadd.f32 %v1940_v16, %v4705_v4  ;;  %v5617_v24 = vld [vmem:[#allocation46_spill] sm:$0xff]  ;;  %v5620_v31 = vmax.f32 %v4873_v9, 0.0 }
 0x386   :  { %v2754_v15 = vmul.f32 1.442695, %v2690_v63  ;;  %v2786_v60 = vmul.f32 1.442695, %v2706_v43  ;;  %v2818_v46 = vmul.f32 1.442695, %v2722_v58  ;;  %2255 = vmatmul.bf16.gmra.mxu0 %v5591_v40 }
 0x387   :  { %v2205_v55 = vadd.f32 %v2204_v57, %v2116_v47  ;;  %2344 = vmatmul.bf16.gmra.mxu1 %v5615_v0  ;;  %v2850_v49 = vmul.f32 1.442695, %v2738_v5  ;;  %v2030_v39 = vadd.f32 %v2029_v38, %v1941_v54  ;;  %v2614_v47 = vmax.f32 %v2188_v20, 0.0 }
 0x388   :  { %3808 = vpow2.f32 %v2754_v15  ;;  %2433 = vmatmul.bf16.gmra.mxu2 %v5616_v34 }
 0x389   :  { %3810 = vpow2.f32 %v2786_v60  ;;  %v2628_v23 = vmax.f32 %v2205_v55, 0.0  ;;  %2522 = vmatmul.bf16.gmra.mxu3 %v5617_v24  ;;  %v2655_v54 = vmax.f32 %v4792_v36, %v2614_v47 }
 0x38a   :  { %3812 = vpow2.f32 %v2818_v46 }
 0x38b   :  { %v2650_v43 = vmax.f32 %v4883_v41, %v2628_v23  ;;  %v2118_v18 = vpop.f32.mrf.mxu2  ;;  %v1942_v33 = vpop.f32.mrf.mxu0  ;;  %3814 = vpow2.f32 %v2850_v49 }
 0x38c   :  { %v2119_v17 = vadd.f32 %v2118_v18, %v2030_v39  ;;  %v2207_v40 = vpop.f32.mrf.mxu3  ;;  %v2031_v62 = vpop.f32.mrf.mxu1  ;;  %v1943_v15 = vadd.f32 %v1942_v33, %v4705_v4  ;;  %v5622_v18 = vmax.f32 %v4784_v6, 0.0 }
 0x38d   :  { %v2692_v30 = vsub.f32 %v5618_v7, %v2650_v43  ;;  %v2708_v60 = vsub.f32 %v5619_v51, %v2650_v43  ;;  %v2724_v63 = vsub.f32 %v5620_v31, %v2650_v43  ;;  %v2740_v41 = vsub.f32 %v2628_v23, %v2650_v43 }
 0x38e   :  { %v3809_v58 = vpop.eup %3808  ;;  %v2208_v57 = vadd.f32 %v2207_v40, %v2119_v17  ;;  %v2032_v49 = vadd.f32 %v2031_v62, %v1943_v15  ;;  %v5621_v23 = vmax.f32 %v4728_v61, 0.0 }
 0x38f   :  { %v3811_v16 = vpop.eup %3810  ;;  %v2758_v5 = vmul.f32 1.442695, %v2692_v30  ;;  %v2790_v38 = vmul.f32 1.442695, %v2708_v60  ;;  %v2822_v50 = vmul.f32 1.442695, %v2724_v63 }
 0x390   :  { %v2882_v46 = vadd.f32 %v3811_v16, %v3809_v58  ;;  %v2630_v55 = vmax.f32 %v2208_v57, 0.0  ;;  %v3813_v20 = vpop.eup %3812  ;;  %v2854_v34 = vmul.f32 1.442695, %v2740_v41 }
 0x391   :  { %3816 = vpow2.f32 %v2758_v5  ;;  %v3815_v0 = vpop.eup %3814  ;;  %v5624_v5 = vld [vmem:[#allocation47_spill] sm:$0xff] }
 0x392   :  { %v2883_v14 = vadd.f32 %v3813_v20, %v2882_v46  ;;  %3818 = vpow2.f32 %v2790_v38  ;;  %v2656_v9 = vmax.f32 %v2655_v54, %v2630_v55  ;;  %v5625_v54 = vld [vmem:[#allocation48_spill] sm:$0xff] }
 0x393   :  { %v2120_v24 = vpop.f32.mrf.mxu2  ;;  %3820 = vpow2.f32 %v2822_v50  ;;  %v1945_v40 = vpop.f32.mrf.mxu0 }
 0x394   :  { %v2884_v39 = vadd.f32 %v3815_v0, %v2883_v14  ;;  %v2694_v43 = vsub.f32 %v5621_v23, %v2656_v9  ;;  %v2710_v36 = vsub.f32 %v5622_v18, %v2656_v9  ;;  %v2209_v17 = vpop.f32.mrf.mxu3  ;;  %v2726_v33 = vsub.f32 %v2614_v47, %v2656_v9  ;;  %v2034_v51 = vpop.f32.mrf.mxu1  ;;  %v5623_v47 = vld [vmem:[#allocation20_spill] sm:$0xff] }
 0x395   :  { %v2742_v7 = vsub.f32 %v2630_v55, %v2656_v9  ;;  %v2121_v30 = vadd.f32 %v2120_v24, %v2032_v49  ;;  %v1946_v63 = vadd.f32 %v1945_v40, %v4705_v4 }
 0x396   :  { %3822 = vrcp.f32 %v2884_v39  ;;  %v2762_v60 = vmul.f32 1.442695, %v2694_v43  ;;  %v2794_v31 = vmul.f32 1.442695, %v2710_v36  ;;  %v2826_v57 = vmul.f32 1.442695, %v2726_v33  ;;  %2260 = vmatmul.bf16.gmra.mxu0 %v4396_v37 }
 0x397   :  { %v4982_v62 = vpop.eup %3816  ;;  %3824 = vpow2.f32 %v2854_v34  ;;  %v2210_v61 = vadd.f32 %v2209_v17, %v2121_v30  ;;  %v2858_v41 = vmul.f32 1.442695, %v2742_v7  ;;  %2349 = vmatmul.bf16.gmra.mxu1 %v5623_v47  ;;  %v2035_v50 = vadd.f32 %v2034_v51, %v1946_v63 }
 0x398   :  { %v4985_v6 = vpop.eup %3818  ;;  %3826 = vpow2.f32 %v2762_v60  ;;  %2438 = vmatmul.bf16.gmra.mxu2 %v5624_v5  ;;  %v5626_v7 = vmax.f32 %v4731_v59, 0.0  ;;  %v5628_v60 = vmax.f32 %v4891_v2, 0.0 }
 0x399   :  { %v2888_v38 = vadd.f32 %v4985_v6, %v4982_v62  ;;  %3828 = vpow2.f32 %v2794_v31  ;;  %v2632_v15 = vmax.f32 %v2210_v61, 0.0  ;;  %2527 = vmatmul.bf16.gmra.mxu3 %v5625_v54  ;;  %v4992_v46 = vpop.eup %3820 }
 0x39a   :  { %3830 = vpow2.f32 %v2826_v57  ;;  %v3969_v57 = vld [vmem:[#allocation2] sm:$0xff] }
 0x39b   :  { %v2889_v37 = vadd.f32 %v4992_v46, %v2888_v38  ;;  %v2662_v55 = vmax.f32 %v4901_v56, %v2632_v15  ;;  %v2123_v14 = vpop.f32.mrf.mxu2  ;;  %3832 = vpow2.f32 %v2858_v41  ;;  %v1947_v24 = vpop.f32.mrf.mxu0  ;;  %v5627_v56 = vmax.f32 %v4795_v52, 0.0 }
 0x39c   :  { %v3823_v9 = vpop.eup %3822  ;;  %v2124_v34 = vadd.f32 %v2123_v14, %v2035_v50  ;;  %v2212_v49 = vpop.f32.mrf.mxu3 }
 0x39d   :  { %v3825_v39 = vpop.eup %3824  ;;  %v2946_v23 = vmul.f32 %v3823_v9, %v3809_v58  ;;  %v2962_v43 = vmul.f32 %v3823_v9, %v3811_v16  ;;  %v2978_v18 = vmul.f32 %v3823_v9, %v3813_v20  ;;  %v2994_v36 = vmul.f32 %v3823_v9, %v3815_v0  ;;  %v2036_v17 = vpop.f32.mrf.mxu1  ;;  %v3970_v16 = vld [vmem:[#allocation2 + $0x80] sm:$0xff] }
 0x39e   :  { %v4996_v40 = vpop.eup %3826  ;;  %v2890_v33 = vadd.f32 %v3825_v39, %v2889_v37  ;;  %v2696_v30 = vsub.f32 %v5626_v7, %v2662_v55  ;;  %v2712_v51 = vsub.f32 %v5627_v56, %v2662_v55  ;;  %v2728_v31 = vsub.f32 %v5628_v60, %v2662_v55  ;;  %v3971_v0 = vld [vmem:[#allocation2 + $0x100] sm:$0xff] }
 0x39f   :  { %v5004_v63 = vpop.eup %3828  ;;  %v3010_v58 = vmul.f32 %v3969_v57, %v2946_v23  ;;  %v3026_v20 = vmul.f32 %v3970_v16, %v2962_v43  ;;  %v3042_v61 = vmul.f32 %v3971_v0, %v2978_v18  ;;  %v2744_v59 = vsub.f32 %v2632_v15, %v2662_v55  ;;  %v3972_v23 = vld [vmem:[#allocation2 + $0x180] sm:$0xff] }
 0x3a0   :  { %3834 = vrcp.f32 %v2890_v33  ;;  %v2894_v41 = vadd.f32 %v5004_v63, %v4996_v40  ;;  %v2766_v47 = vmul.f32 1.442695, %v2696_v30  ;;  %v5008_v5 = vpop.eup %3830  ;;  %v2798_v38 = vmul.f32 1.442695, %v2712_v51 }
 0x3a1   :  { %v3074_v52 = vadd.f32 %v3026_v20, %v3010_v58  ;;  %v2830_v2 = vmul.f32 1.442695, %v2728_v31  ;;  %v2213_v54 = vadd.f32 %v2212_v49, %v2124_v34  ;;  %v5010_v50 = vpop.eup %3832  ;;  %v2862_v14 = vmul.f32 1.442695, %v2744_v59 }
 0x3a2   :  { %v2895_v37 = vadd.f32 %v5008_v5, %v2894_v41  ;;  %3836 = vpow2.f32 %v2766_v47  ;;  %v1948_v9 = vadd.f32 %v1947_v24, %v4705_v4  ;;  %v3058_v43 = vmul.f32 %v3972_v23, %v2994_v36 }
 0x3a3   :  { %v3075_v18 = vadd.f32 %v3074_v52, %v3042_v61  ;;  %3838 = vpow2.f32 %v2798_v38  ;;  %v2634_v15 = vmax.f32 %v2213_v54, 0.0  ;;  %v2125_v55 = vpop.f32.mrf.mxu2  ;;  %v1950_v34 = vpop.f32.mrf.mxu0  ;;  %v5630_v0 = vmax.f32 %v4810_v3, 0.0 }
 0x3a4   :  { %v2896_v33 = vadd.f32 %v5010_v50, %v2895_v37  ;;  %3840 = vpow2.f32 %v2830_v2  ;;  %v2037_v7 = vadd.f32 %v2036_v17, %v1948_v9  ;;  %v2214_v30 = vpop.f32.mrf.mxu3  ;;  %v5629_v17 = vmax.f32 %v4738_v1, 0.0  ;;  %v3975_v2 = vld [vmem:[#allocation2 + $0x110] sm:$0xff] }
 0x3a5   :  { %v3076_v49 = vadd.f32 %v3075_v18, %v3058_v43  ;;  %3842 = vpow2.f32 %v2862_v14  ;;  %v2668_v56 = vmax.f32 %v4910_v48, %v2634_v15  ;;  %v2039_v51 = vpop.f32.mrf.mxu1  ;;  %v5631_v61 = vmax.f32 %v4904_v12, 0.0  ;;  %v3976_v37 = vld [vmem:[#allocation2 + $0x190] sm:$0xff] }
 0x3a6   :  { %v3835_v60 = vpop.eup %3834  ;;  %3844 = vrcp.f32 %v2896_v33  ;;  %v2126_v24 = vadd.f32 %v2125_v55, %v2037_v7  ;;  %v1951_v59 = vadd.f32 %v1950_v34, %v4705_v4  ;;  %2265 = vmatmul.bf16.gmra.mxu0 %v4410_v42 }
 0x3a7   :  { %3122 = vst [vmem:[#allocation10] sm:$0xff] %v3076_v49  ;;  %v2948_v36 = vmul.f32 %v3835_v60, %v4982_v62  ;;  %v2964_v31 = vmul.f32 %v3835_v60, %v4985_v6  ;;  %v2980_v57 = vmul.f32 %v3835_v60, %v4992_v46  ;;  %v2996_v58 = vmul.f32 %v3835_v60, %v3825_v39  ;;  %v3973_v6 = vld [vmem:[#allocation2 + $0x10] sm:$0xff] }
 0x3a8   :  { %v5019_v16 = vpop.eup %3836  ;;  %v2698_v20 = vsub.f32 %v5629_v17, %v2668_v56  ;;  %v2714_v48 = vsub.f32 %v5630_v0, %v2668_v56  ;;  %v2730_v41 = vsub.f32 %v5631_v61, %v2668_v56  ;;  %v3974_v39 = vld [vmem:[#allocation2 + $0x90] sm:$0xff]  ;;  %2354 = vmatmul.bf16.gmra.mxu1 %v5597_v53  ;;  %v2746_v52 = vsub.f32 %v2634_v15, %v2668_v56 }
 0x3a9   :  { %v5029_v62 = vpop.eup %3838  ;;  %v3012_v46 = vmul.f32 %v3973_v6, %v2948_v36  ;;  %v3028_v47 = vmul.f32 %v3974_v39, %v2964_v31  ;;  %2443 = vmatmul.bf16.gmra.mxu2 %v4606_v13  ;;  %2532 = vmatmul.bf16.gmra.mxu3 %v4614_v44  ;;  %v3044_v54 = vmul.f32 %v3975_v2, %v2980_v57  ;;  %v3977_v31 = vld [vmem:[#allocation2 + $0x20] sm:$0xff]  ;;  %v5633_v39 = vmax.f32 %v4821_v28, 0.0 }
 0x3aa   :  { %v5032_v1 = vpop.eup %3840  ;;  %v2900_v3 = vadd.f32 %v5029_v62, %v5019_v16  ;;  %v2770_v12 = vmul.f32 1.442695, %v2698_v20  ;;  %v2802_v38 = vmul.f32 1.442695, %v2714_v48  ;;  %v3060_v14 = vmul.f32 %v3976_v37, %v2996_v58 }
 0x3ab   :  { %v5038_v42 = vpop.eup %3842  ;;  %v3080_v9 = vadd.f32 %v3028_v47, %v3012_v46  ;;  %v2215_v53 = vadd.f32 %v2214_v30, %v2126_v24  ;;  %v2128_v23 = vpop.f32.mrf.mxu2  ;;  %v2834_v15 = vmul.f32 1.442695, %v2730_v41  ;;  %v2040_v55 = vadd.f32 %v2039_v51, %v1951_v59  ;;  %v3978_v51 = vld [vmem:[#allocation2 + $0xa0] sm:$0xff] }
 0x3ac   :  { %v3845_v43 = vpop.eup %3844  ;;  %v2901_v18 = vadd.f32 %v5032_v1, %v2900_v3  ;;  %3846 = vpow2.f32 %v2770_v12  ;;  %v2217_v33 = vpop.f32.mrf.mxu3  ;;  %v2866_v17 = vmul.f32 1.442695, %v2746_v52  ;;  %v3981_v59 = vld [vmem:[#allocation2 + $0x1a0] sm:$0xff]  ;;  %v5634_v3 = vmax.f32 %v4913_v32, 0.0 }
 0x3ad   :  { %v1952_v7 = vpop.f32.mrf.mxu0  ;;  %v3081_v13 = vadd.f32 %v3080_v9, %v3044_v54  ;;  %v2950_v44 = vmul.f32 %v3845_v43, %v4996_v40  ;;  %v2966_v34 = vmul.f32 %v3845_v43, %v5004_v63  ;;  %v2982_v49 = vmul.f32 %v3845_v43, %v5008_v5  ;;  %v2041_v56 = vpop.f32.mrf.mxu1  ;;  %v3979_v63 = vld [vmem:[%s5460_s4] sm:$0x3]  ;;  %s4170_s4 = smov [#allocation10]  }
 0x3ae   :  { %v2998_v60 = vmul.f32 %v3845_v43, %v5010_v50  ;;  %v2902_v30 = vadd.f32 %v5038_v42, %v2901_v18  ;;  %3848 = vpow2.f32 %v2802_v38  ;;  %v2636_v24 = vmax.f32 %v2215_v53, 0.0  ;;  %v3980_v50 = vld [vmem:[#allocation2 + $0x120] sm:$0xff]  ;;  %s3142_s17 = sshll.u32 %s4170_s4, 4  ;;  %s3143_s17 = int_to_ptr.vmem [resolvable:$true] %s3142_s17 }
 0x3af   :  { %v3082_v36 = vadd.f32 %v3081_v13, %v3060_v14  ;;  %v3014_v57 = vmul.f32 %v3977_v31, %v2950_v44  ;;  %v3030_v58 = vmul.f32 %v3978_v51, %v2966_v34  ;;  %v2129_v20 = vadd.f32 %v2128_v23, %v2040_v55 }
 0x3b0   :  { %3850 = vrcp.f32 %v2902_v30  ;;  %v2674_v40 = vmax.f32 %v4923_v10, %v2636_v24  ;;  %v5050_v5 = vperm.slane %v3979_v63, 1  ;;  %v3046_v0 = vmul.f32 %v3980_v50, %v2982_v49 }
 0x3b1   :  { %3124 = vst [vmem:[#allocation10 + $0x10] sm:$0xff] %v3082_v36  ;;  %v3086_v48 = vadd.f32 %v3030_v58, %v3014_v57  ;;  %3852 = vpow2.f32 %v2834_v15  ;;  %v1953_v61 = vadd.f32 %v1952_v7, %v4705_v4  ;;  %v3062_v6 = vmul.f32 %v3981_v59, %v2998_v60  ;;  %v5635_v36 = vld [vmem:[#allocation22_spill] sm:$0xff]  ;;  %v3982_v57 = vld [vmem:[#allocation2 + $0x30] sm:$0xff] }
 0x3b2   :  { %v5053_v41 = vpop.eup %3846  ;;  %v5632_v10 = vmax.f32 %v4741_v19, 0.0  ;;  %v2716_v47 = vsub.f32 %v5633_v39, %v2674_v40  ;;  %v2732_v52 = vsub.f32 %v5634_v3, %v2674_v40  ;;  %3854 = vpow2.f32 %v2866_v17  ;;  %v3983_v58 = vld [vmem:[#allocation2 + $0xb0] sm:$0xff] }
 0x3b3   :  { %v3087_v12 = vadd.f32 %v3086_v48, %v3046_v0  ;;  %v2748_v38 = vsub.f32 %v2636_v24, %v2674_v40  ;;  %v2218_v2 = vadd.f32 %v2217_v33, %v2129_v20  ;;  %v2130_v54 = vpop.f32.mrf.mxu2  ;;  %v2042_v9 = vadd.f32 %v2041_v56, %v1953_v61  ;;  %v5639_v48 = vld [vmem:[#allocation49_spill] sm:$0xff]  ;;  %v5640_v61 = vld [vmem:[#allocation50_spill] sm:$0xff] }
 0x3b4   :  { %v2700_v46 = vsub.f32 %v5632_v10, %v2674_v40  ;;  %v5061_v37 = vpop.eup %3848  ;;  %v2806_v14 = vmul.f32 1.442695, %v2716_v47  ;;  %v2219_v53 = vpop.f32.mrf.mxu3  ;;  %v2838_v43 = vmul.f32 1.442695, %v2732_v52  ;;  %v5637_v63 = vmax.f32 %v4748_v8, 0.0 }
 0x3b5   :  { %v2231_v23 = vpop.f32.mrf.mxu0  ;;  %v3088_v19 = vadd.f32 %v3087_v12, %v3062_v6  ;;  %v2906_v28 = vadd.f32 %v5061_v37, %v5053_v41  ;;  %v2638_v18 = vmax.f32 %v2218_v2, 0.0  ;;  %v2320_v32 = vpop.f32.mrf.mxu1  ;;  %v2870_v55 = vmul.f32 1.442695, %v2748_v38 }
 0x3b6   :  { %v2774_v4 = vmul.f32 1.442695, %v2700_v46  ;;  %v3851_v15 = vpop.eup %3850  ;;  %v2131_v7 = vadd.f32 %v2130_v54, %v2042_v9  ;;  %v2232_v33 = vadd.f32 %v2231_v23, %v5050_v5  ;;  %2270 = vmatmul.bf16.gmra.mxu0 %v5635_v36  ;;  %v5641_v6 = vmax.f32 %v4928_v11, 0.0 }
 0x3b7   :  { %v5066_v13 = vpop.eup %3852  ;;  %3126 = vst [vmem:[#allocation10 + $0x20] sm:$0xff] %v3088_v19  ;;  %v2952_v44 = vmul.f32 %v3851_v15, %v5019_v16  ;;  %v2968_v34 = vmul.f32 %v3851_v15, %v5029_v62  ;;  %v2984_v49 = vmul.f32 %v3851_v15, %v5032_v1  ;;  %v3000_v56 = vmul.f32 %v3851_v15, %v5038_v42  ;;  %v3984_v16 = vld [vmem:[#allocation2 + $0x130] sm:$0xff]  ;;  %v5636_v1 = vld [vmem:[#allocation23_spill] sm:$0xff] }
 0x3b8   :  { %3856 = vpow2.f32 %v2774_v4  ;;  %v2907_v60 = vadd.f32 %v5066_v13, %v2906_v28  ;;  %v2680_v30 = vmax.f32 %v4935_v26, %v2638_v18  ;;  %v2220_v24 = vadd.f32 %v2219_v53, %v2131_v7  ;;  %v3855_v31 = vpop.eup %3854  ;;  %v3985_v62 = vld [vmem:[#allocation2 + $0x1b0] sm:$0xff]  ;;  %2359 = vmatmul.bf16.gmra.mxu1 %v5636_v1  ;;  %v3987_v1 = vld [vmem:[#allocation2 + $0xc0] sm:$0xff] }
 0x3b9   :  { %3858 = vpow2.f32 %v2806_v14  ;;  %v3016_v51 = vmul.f32 %v3982_v57, %v2952_v44  ;;  %v3032_v17 = vmul.f32 %v3983_v58, %v2968_v34  ;;  %v3048_v40 = vmul.f32 %v3984_v16, %v2984_v49  ;;  %2448 = vmatmul.bf16.gmra.mxu2 %v5639_v48  ;;  %2537 = vmatmul.bf16.gmra.mxu3 %v5640_v61 }
 0x3ba   :  { %v3064_v20 = vmul.f32 %v3985_v62, %v3000_v56  ;;  %v2908_v42 = vadd.f32 %v3855_v31, %v2907_v60  ;;  %3860 = vpow2.f32 %v2838_v43  ;;  %v2702_v50 = vsub.f32 %v5637_v63, %v2680_v30  ;;  %v3986_v62 = vld [vmem:[#allocation2 + $0x40] sm:$0xff] }
 0x3bb   :  { %v5638_v26 = vmax.f32 %v4836_v22, 0.0  ;;  %v3092_v59 = vadd.f32 %v3032_v17, %v3016_v51  ;;  %3862 = vpow2.f32 %v2870_v55  ;;  %v2734_v10 = vsub.f32 %v5641_v6, %v2680_v30  ;;  %v2409_v39 = vpop.f32.mrf.mxu2 }
 0x3bc   :  { %v2750_v46 = vsub.f32 %v2638_v18, %v2680_v30  ;;  %3864 = vrcp.f32 %v2908_v42  ;;  %v2778_v3 = vmul.f32 1.442695, %v2702_v50  ;;  %v2640_v52 = vmax.f32 %v2220_v24, 0.0  ;;  %v2498_v12 = vpop.f32.mrf.mxu3 }
 0x3bd   :  { %v2718_v0 = vsub.f32 %v5638_v26, %v2680_v30  ;;  %v2233_v22 = vpop.f32.mrf.mxu0  ;;  %v3093_v38 = vadd.f32 %v3092_v59, %v3048_v40  ;;  %v2842_v2 = vmul.f32 1.442695, %v2734_v10  ;;  %v2321_v4 = vadd.f32 %v2320_v32, %v2232_v33  ;;  %v2322_v14 = vpop.f32.mrf.mxu1 }
 0x3be   :  { %v5084_v47 = vpop.eup %3856  ;;  %v2874_v54 = vmul.f32 1.442695, %v2750_v46  ;;  %3866 = vpow2.f32 %v2778_v3  ;;  %v2686_v11 = vmax.f32 %v4950_v27, %v2640_v52  ;;  %v2234_v53 = vadd.f32 %v2233_v22, %v5050_v5  ;;  %v5646_v22 = vld [vmem:[#allocation52_spill] sm:$0xff] }
 0x3bf   :  { %v2810_v8 = vmul.f32 1.442695, %v2718_v0  ;;  %v5086_v9 = vpop.eup %3858  ;;  %v3094_v23 = vadd.f32 %v3093_v38, %v3064_v20  ;;  %v2410_v28 = vadd.f32 %v2409_v39, %v2321_v4  ;;  %v5642_v18 = vmax.f32 %v4751_v21, 0.0  ;;  %v3988_v0 = vld [vmem:[#allocation2 + $0x140] sm:$0xff] }
 0x3c0   :  { %v2912_v19 = vadd.f32 %v5086_v9, %v5084_v47  ;;  %v5092_v43 = vpop.eup %3860  ;;  %v5643_v15 = vmax.f32 %v4850_v45, 0.0  ;;  %v5644_v7 = vmax.f32 %v4938_v29, 0.0  ;;  %v2752_v56 = vsub.f32 %v2640_v52, %v2686_v11  ;;  %v3989_v39 = vld [vmem:[#allocation2 + $0x1c0] sm:$0xff] }
 0x3c1   :  { %3868 = vpow2.f32 %v2810_v8  ;;  %v2704_v32 = vsub.f32 %v5642_v18, %v2686_v11  ;;  %v5100_v33 = vpop.eup %3862  ;;  %3128 = vst [vmem:[#allocation10 + $0x30] sm:$0xff] %v3094_v23  ;;  %v5103_v34 = vadd.f32 %v2498_v12, %v2410_v28  ;;  %v2323_v21 = vadd.f32 %v2322_v14, %v2234_v53  ;;  %v5645_v12 = vld [vmem:[#allocation51_spill] sm:$0xff] }
 0x3c2   :  { %3870 = vpow2.f32 %v2842_v2  ;;  %v2720_v55 = vsub.f32 %v5643_v15, %v2686_v11  ;;  %v2736_v27 = vsub.f32 %v5644_v7, %v2686_v11  ;;  %v2913_v44 = vadd.f32 %v5092_v43, %v2912_v19  ;;  %v3865_v49 = vpop.eup %3864 }
 0x3c3   :  { %3872 = vpow2.f32 %v2874_v54  ;;  %v2782_v60 = vmul.f32 1.442695, %v2704_v32  ;;  %v2954_v24 = vmul.f32 %v3865_v49, %v5053_v41  ;;  %v2970_v45 = vmul.f32 %v3865_v49, %v5061_v37  ;;  %v2411_v57 = vpop.f32.mrf.mxu2 }
 0x3c4   :  { %v2814_v30 = vmul.f32 1.442695, %v2720_v55  ;;  %v2986_v29 = vmul.f32 %v3865_v49, %v5066_v13  ;;  %v3002_v36 = vmul.f32 %v3865_v49, %v3855_v31  ;;  %v5108_v51 = vpop.eup %3866  ;;  %v2914_v58 = vadd.f32 %v5100_v33, %v2913_v44  ;;  %v2500_v17 = vpop.f32.mrf.mxu3  ;;  %v3991_v49 = vld [vmem:[#allocation2 + $0xd0] sm:$0xff] }
 0x3c5   :  { %v2236_v16 = vpop.f32.mrf.mxu0  ;;  %v3018_v20 = vmul.f32 %v3986_v62, %v2954_v24  ;;  %v3034_v42 = vmul.f32 %v3987_v1, %v2970_v45  ;;  %3874 = vpow2.f32 %v2782_v60  ;;  %v2846_v41 = vmul.f32 1.442695, %v2736_v27  ;;  %v2325_v63 = vpop.f32.mrf.mxu1  ;;  %v3990_v27 = vld [vmem:[#allocation2 + $0x50] sm:$0xff] }
 0x3c6   :  { %3876 = vrcp.f32 %v2914_v58  ;;  %v2412_v31 = vadd.f32 %v2411_v57, %v2323_v21  ;;  %v2237_v50 = vadd.f32 %v2236_v16, %v5050_v5  ;;  %v3050_v48 = vmul.f32 %v3988_v0, %v2986_v29  ;;  %2275 = vmatmul.bf16.gmra.mxu0 %v4434_v25 }
 0x3c7   :  { %v5111_v40 = vpop.eup %3868  ;;  %v3098_v61 = vadd.f32 %v3034_v42, %v3018_v20  ;;  %3878 = vpow2.f32 %v2814_v30  ;;  %v2878_v59 = vmul.f32 1.442695, %v2752_v56  ;;  %v3066_v3 = vmul.f32 %v3989_v39, %v3002_v36 }
 0x3c8   :  { %v3871_v37 = vpop.eup %3870  ;;  %v2918_v13 = vadd.f32 %v5111_v40, %v5108_v51  ;;  %v5116_v10 = vadd.f32 %v2500_v17, %v2412_v31  ;;  %v2326_v46 = vadd.f32 %v2325_v63, %v2237_v50  ;;  %3880 = vpow2.f32 %v2846_v41  ;;  %2364 = vmatmul.bf16.gmra.mxu1 %v4442_v35  ;;  %v3994_v63 = vld [vmem:[#allocation2 + $0x60] sm:$0xff] }
 0x3c9   :  { %v3873_v26 = vpop.eup %3872  ;;  %v3099_v8 = vadd.f32 %v3098_v61, %v3050_v48  ;;  %2453 = vmatmul.bf16.gmra.mxu2 %v5645_v12  ;;  %2542 = vmatmul.bf16.gmra.mxu3 %v5646_v22  ;;  %3882 = vpow2.f32 %v2878_v59  ;;  %v3995_v31 = vld [vmem:[#allocation2 + $0xe0] sm:$0xff] }
 0x3ca   :  { %v2919_v6 = vadd.f32 %v3871_v37, %v2918_v13  ;;  %v5650_v12 = vld [vmem:[#allocation54_spill] sm:$0xff] }
 0x3cb   :  { %v5122_v38 = vpop.eup %3874  ;;  %v3100_v2 = vadd.f32 %v3099_v8, %v3066_v3  ;;  %v2414_v54 = vpop.f32.mrf.mxu2  ;;  %v5648_v3 = vld [vmem:[#allocation25_spill] sm:$0xff] }
 0x3cc   :  { %v2920_v52 = vadd.f32 %v3873_v26, %v2919_v6  ;;  %v3877_v4 = vpop.eup %3876  ;;  %v2415_v14 = vadd.f32 %v2414_v54, %v2326_v46  ;;  %v2503_v25 = vpop.f32.mrf.mxu3  ;;  %v3997_v6 = vld [vmem:[#allocation2 + $0x1e0] sm:$0xff] }
 0x3cd   :  { %v2238_v11 = vpop.f32.mrf.mxu0  ;;  %v3879_v53 = vpop.eup %3878  ;;  %3130 = vst [vmem:[#allocation10 + $0x40] sm:$0xff] %v3100_v2  ;;  %v2956_v23 = vmul.f32 %v3877_v4, %v5084_v47  ;;  %v2972_v35 = vmul.f32 %v3877_v4, %v5086_v9  ;;  %v2988_v19 = vmul.f32 %v3877_v4, %v5092_v43  ;;  %v3004_v28 = vmul.f32 %v3877_v4, %v5100_v33  ;;  %v3992_v9 = vld [vmem:[#allocation2 + $0x150] sm:$0xff] }
 0x3ce   :  { %3884 = vrcp.f32 %v2920_v52  ;;  %v2327_v18 = vpop.f32.mrf.mxu1  ;;  %v2924_v32 = vadd.f32 %v3879_v53, %v5122_v38  ;;  %v5129_v15 = vadd.f32 %v2503_v25, %v2415_v14  ;;  %v2239_v55 = vadd.f32 %v2238_v11, %v5050_v5  ;;  %v3881_v7 = vpop.eup %3880  ;;  %v3993_v33 = vld [vmem:[#allocation2 + $0x1d0] sm:$0xff] }
 0x3cf   :  { %v3020_v44 = vmul.f32 %v3990_v27, %v2956_v23  ;;  %v3036_v56 = vmul.f32 %v3991_v49, %v2972_v35  ;;  %v3883_v30 = vpop.eup %3882  ;;  %v3052_v21 = vmul.f32 %v3992_v9, %v2988_v19  ;;  %v3068_v45 = vmul.f32 %v3993_v33, %v3004_v28  ;;  %v5649_v52 = vld [vmem:[#allocation53_spill] sm:$0xff] }
 0x3d0   :  { %v2925_v60 = vadd.f32 %v3881_v7, %v2924_v32  ;;  %v2328_v47 = vadd.f32 %v2327_v18, %v2239_v55  ;;  %v3998_v19 = vld [vmem:[#allocation2 + $0x70] sm:$0xff] }
 0x3d1   :  { %v3104_v43 = vadd.f32 %v3036_v56, %v3020_v44  ;;  %v3999_v18 = vld [vmem:[#allocation2 + $0xf0] sm:$0xff] }
 0x3d2   :  { %v2926_v29 = vadd.f32 %v3883_v30, %v2925_v60  ;;  %v4000_v49 = vld [vmem:[#allocation2 + $0x170] sm:$0xff] }
 0x3d3   :  { %v3105_v36 = vadd.f32 %v3104_v43, %v3052_v21  ;;  %v2416_v16 = vpop.f32.mrf.mxu2 }
 0x3d4   :  { %v3885_v24 = vpop.eup %3884  ;;  %3886 = vrcp.f32 %v2926_v29  ;;  %v2417_v20 = vadd.f32 %v2416_v16, %v2328_v47  ;;  %v2505_v1 = vpop.f32.mrf.mxu3  ;;  %v5654_v16 = vld [vmem:[#allocation56_spill] sm:$0xff] }
 0x3d5   :  { %v2958_v57 = vmul.f32 %v3885_v24, %v5108_v51  ;;  %v2974_v58 = vmul.f32 %v3885_v24, %v5111_v40  ;;  %v2990_v17 = vmul.f32 %v3885_v24, %v3871_v37  ;;  %v3006_v62 = vmul.f32 %v3885_v24, %v3873_v26  ;;  %v2241_v42 = vpop.f32.mrf.mxu0  ;;  %v3996_v51 = vld [vmem:[#allocation2 + $0x160] sm:$0xff]  ;;  %v5647_v26 = vld [vmem:[#allocation24_spill] sm:$0xff] }
 0x3d6   :  { %v3106_v41 = vadd.f32 %v3105_v36, %v3068_v45  ;;  %v2330_v0 = vpop.f32.mrf.mxu1  ;;  %v5134_v48 = vadd.f32 %v2505_v1, %v2417_v20  ;;  %v2242_v61 = vadd.f32 %v2241_v42, %v5050_v5  ;;  %2280 = vmatmul.bf16.gmra.mxu0 %v5647_v26 }
 0x3d7   :  { %v3022_v13 = vmul.f32 %v3994_v63, %v2958_v57  ;;  %v3038_v50 = vmul.f32 %v3995_v31, %v2974_v58  ;;  %v3054_v40 = vmul.f32 %v3996_v51, %v2990_v17  ;;  %v3070_v46 = vmul.f32 %v3997_v6, %v3006_v62  ;;  %v5651_v57 = vld [vmem:[#allocation26_spill] sm:$0xff]  ;;  %v5652_v58 = vld [vmem:[#allocation27_spill] sm:$0xff]  ;;  %v5655_v6 = vld [vmem:[#allocation28_spill] sm:$0xff] }
 0x3d8   :  { %3132 = vst [vmem:[#allocation10 + $0x50] sm:$0xff] %v3106_v41  ;;  %v2331_v59 = vadd.f32 %v2330_v0, %v2242_v61  ;;  %2369 = vmatmul.bf16.gmra.mxu1 %v5648_v3  ;;  %v5653_v17 = vld [vmem:[#allocation55_spill] sm:$0xff]  ;;  %v5658_v3 = vld [vmem:[#allocation18_spill] sm:$0xff] }
 0x3d9   :  { %v3110_v37 = vadd.f32 %v3038_v50, %v3022_v13  ;;  %2458 = vmatmul.bf16.gmra.mxu2 %v5649_v52  ;;  %2547 = vmatmul.bf16.gmra.mxu3 %v5650_v12 }
 0x3da   :  { %v3887_v8 = vpop.eup %3886 }
 0x3db   :  { %v3111_v39 = vadd.f32 %v3110_v37, %v3054_v40  ;;  %v2960_v2 = vmul.f32 %v3887_v8, %v5122_v38  ;;  %v2976_v54 = vmul.f32 %v3887_v8, %v3879_v53  ;;  %v2992_v4 = vmul.f32 %v3887_v8, %v3881_v7  ;;  %v2419_v14 = vpop.f32.mrf.mxu2  ;;  %v4001_v7 = vld [vmem:[#allocation2 + $0x1f0] sm:$0xff] }
 0x3dc   :  { %v3008_v25 = vmul.f32 %v3887_v8, %v3883_v30  ;;  %v2420_v11 = vadd.f32 %v2419_v14, %v2331_v59  ;;  %v2508_v23 = vpop.f32.mrf.mxu3 }
 0x3dd   :  { %v3112_v22 = vadd.f32 %v3111_v39, %v3070_v46  ;;  %v2243_v35 = vpop.f32.mrf.mxu0  ;;  %v3024_v28 = vmul.f32 %v3998_v19, %v2960_v2  ;;  %v3040_v32 = vmul.f32 %v3999_v18, %v2976_v54  ;;  %v3056_v56 = vmul.f32 %v4000_v49, %v2992_v4  ;;  %v5656_v46 = vld [vmem:[#allocation29_spill] sm:$0xff] }
 0x3de   :  { %v2244_v55 = vadd.f32 %v2243_v35, %v5050_v5  ;;  %v2332_v27 = vpop.f32.mrf.mxu1  ;;  %v5143_v44 = vadd.f32 %v2508_v23, %v2420_v11  ;;  %v3072_v60 = vmul.f32 %v4001_v7, %v3008_v25  ;;  %v5657_v39 = vld [vmem:[#allocation57_spill] sm:$0xff]  ;;  %v2579_v25 = vmax.f32 %v5103_v34, 0.0  ;;  %v5660_v7 = vld [vmem:[#allocation31_spill] sm:$0xff] }
 0x3df   :  { %3134 = vst [vmem:[#allocation10 + $0x60] sm:$0xff] %v3112_v22  ;;  %v3116_v38 = vadd.f32 %v3040_v32, %v3024_v28 }
 0x3e0   :  { %v2333_v53 = vadd.f32 %v2332_v27, %v2244_v55 }
 0x3e1   :  { %v3117_v47 = vadd.f32 %v3116_v38, %v3056_v56  ;;  %v2581_v56 = vmax.f32 %v5116_v10, 0.0 }
 0x3e3   :  { %v3118_v30 = vadd.f32 %v3117_v47, %v3072_v60  ;;  %v2421_v9 = vpop.f32.mrf.mxu2  ;;  %v5661_v47 = vld [vmem:[#allocation58_spill] sm:$0xff] }
 0x3e4   :  { %v2422_v21 = vadd.f32 %v2421_v9, %v2333_v53  ;;  %v2510_v43 = vpop.f32.mrf.mxu3  ;;  %v5659_v53 = vld [vmem:[#allocation30_spill] sm:$0xff] }
 0x3e5   :  { %v2246_v24 = vpop.f32.mrf.mxu0  ;;  %3136 = vst [vmem:[#allocation10 + $0x70] sm:$0xff] %v3118_v30  ;;  %v5662_v30 = vld [vmem:[#allocation59_spill] sm:$0xff] }
 0x3e6   :  { %v2247_v33 = vadd.f32 %v2246_v24, %v5050_v5  ;;  %v2335_v45 = vpop.f32.mrf.mxu1  ;;  %v5146_v29 = vadd.f32 %v2510_v43, %v2422_v21  ;;  %2285 = vmatmul.bf16.gmra.mxu0 %v5651_v57 }
 0x3e8   :  { %v2336_v36 = vadd.f32 %v2335_v45, %v2247_v33  ;;  %2374 = vmatmul.bf16.gmra.mxu1 %v5652_v58  ;;  %v2583_v58 = vmax.f32 %v5129_v15, 0.0 }
 0x3e9   :  { %2463 = vmatmul.bf16.gmra.mxu2 %v5653_v17  ;;  %2552 = vmatmul.bf16.gmra.mxu3 %v5654_v16 }
 0x3eb   :  { %v2424_v62 = vpop.f32.mrf.mxu2 }
 0x3ec   :  { %v2425_v20 = vadd.f32 %v2424_v62, %v2336_v36  ;;  %v2513_v1 = vpop.f32.mrf.mxu3 }
 0x3ed   :  { %v2248_v42 = vpop.f32.mrf.mxu0 }
 0x3ee   :  { %v2249_v41 = vadd.f32 %v2248_v42, %v5050_v5  ;;  %v2337_v63 = vpop.f32.mrf.mxu1  ;;  %v5153_v13 = vadd.f32 %v2513_v1, %v2425_v20 }
 0x3f0   :  { %v2338_v31 = vadd.f32 %v2337_v63, %v2249_v41 }
 0x3f3   :  { %v2426_v50 = vpop.f32.mrf.mxu2 }
 0x3f4   :  { %v2427_v0 = vadd.f32 %v2426_v50, %v2338_v31  ;;  %v2515_v61 = vpop.f32.mrf.mxu3 }
 0x3f5   :  { %v2251_v51 = vpop.f32.mrf.mxu0 }
 0x3f6   :  { %v2252_v40 = vadd.f32 %v2251_v51, %v5050_v5  ;;  %v2340_v37 = vpop.f32.mrf.mxu1  ;;  %v5156_v59 = vadd.f32 %v2515_v61, %v2427_v0  ;;  %2290 = vmatmul.bf16.gmra.mxu0 %v5655_v6  ;;  %v2585_v0 = vmax.f32 %v5134_v48, 0.0  ;;  %v5663_v51 = vld [vmem:[#allocation32_spill] sm:$0xff]  ;;  %v5666_v6 = vld [vmem:[#allocation21_spill] sm:$0xff] }
 0x3f8   :  { %v2341_v26 = vadd.f32 %v2340_v37, %v2252_v40  ;;  %2379 = vmatmul.bf16.gmra.mxu1 %v5656_v46  ;;  %v5664_v40 = vld [vmem:[#allocation33_spill] sm:$0xff] }
 0x3f9   :  { %2468 = vmatmul.bf16.gmra.mxu2 %v5657_v39  ;;  %2557 = vmatmul.bf16.gmra.mxu3 %v5658_v3 }
 0x3fb   :  { %v2429_v8 = vpop.f32.mrf.mxu2 }
 0x3fc   :  { %v2430_v52 = vadd.f32 %v2429_v8, %v2341_v26  ;;  %v2518_v12 = vpop.f32.mrf.mxu3  ;;  %v5665_v26 = vld [vmem:[#allocation60_spill] sm:$0xff] }
 0x3fd   :  { %v2253_v22 = vpop.f32.mrf.mxu0 }
 0x3fe   :  { %v2254_v2 = vadd.f32 %v2253_v22, %v5050_v5  ;;  %v2342_v54 = vpop.f32.mrf.mxu1  ;;  %v5163_v4 = vadd.f32 %v2518_v12, %v2430_v52 }
 0x400   :  { %v2343_v14 = vadd.f32 %v2342_v54, %v2254_v2  ;;  %v2595_v11 = vmax.f32 %v5163_v4, 0.0  ;;  %v5545_v54 = vmax.f32 %v5143_v44, 0.0 }
 0x402   :  { %v5171_v23 = vmax.f32 %v2579_v25, %v2595_v11 }
 0x403   :  { %v2431_v35 = vpop.f32.mrf.mxu2 }
 0x404   :  { %v2432_v19 = vadd.f32 %v2431_v35, %v2343_v14  ;;  %v2520_v28 = vpop.f32.mrf.mxu3 }
 0x405   :  { %v2256_v18 = vpop.f32.mrf.mxu0 }
 0x406   :  { %v2257_v32 = vadd.f32 %v2256_v18, %v5050_v5  ;;  %v2345_v55 = vpop.f32.mrf.mxu1  ;;  %v5174_v27 = vadd.f32 %v2520_v28, %v2432_v19  ;;  %2295 = vmatmul.bf16.gmra.mxu0 %v5659_v53 }
 0x408   :  { %v2346_v49 = vadd.f32 %v2345_v55, %v2257_v32  ;;  %v2597_v38 = vmax.f32 %v5174_v27, 0.0  ;;  %2384 = vmatmul.bf16.gmra.mxu1 %v5660_v7  ;;  %v5539_v7 = vmax.f32 %v5146_v29, 0.0 }
 0x409   :  { %2473 = vmatmul.bf16.gmra.mxu2 %v5661_v47  ;;  %2562 = vmatmul.bf16.gmra.mxu3 %v5662_v30 }
 0x40a   :  { %v5184_v60 = vmax.f32 %v2581_v56, %v2597_v38 }
 0x40b   :  { %v2434_v9 = vpop.f32.mrf.mxu2 }
 0x40c   :  { %v2435_v21 = vadd.f32 %v2434_v9, %v2346_v49  ;;  %v2523_v43 = vpop.f32.mrf.mxu3  ;;  %v5667_v9 = vld [vmem:[#allocation34_spill] sm:$0xff] }
 0x40d   :  { %v2258_v24 = vpop.f32.mrf.mxu0 }
 0x40e   :  { %v2259_v33 = vadd.f32 %v2258_v24, %v5050_v5  ;;  %v2347_v45 = vpop.f32.mrf.mxu1  ;;  %v5189_v36 = vadd.f32 %v2523_v43, %v2435_v21  ;;  %v5668_v21 = vld [vmem:[#allocation35_spill] sm:$0xff]  ;;  %v5669_v24 = vld [vmem:[#allocation61_spill] sm:$0xff] }
 0x410   :  { %v2348_v57 = vadd.f32 %v2347_v45, %v2259_v33  ;;  %v2599_v17 = vmax.f32 %v5189_v36, 0.0  ;;  %v5670_v33 = vld [vmem:[#allocation62_spill] sm:$0xff] }
 0x412   :  { %v5197_v16 = vmax.f32 %v2583_v58, %v2599_v17 }
 0x413   :  { %v2436_v62 = vpop.f32.mrf.mxu2 }
 0x414   :  { %v2437_v20 = vadd.f32 %v2436_v62, %v2348_v57  ;;  %v2525_v1 = vpop.f32.mrf.mxu3 }
 0x415   :  { %v2261_v42 = vpop.f32.mrf.mxu0 }
 0x416   :  { %v2262_v41 = vadd.f32 %v2261_v42, %v5050_v5  ;;  %v2350_v63 = vpop.f32.mrf.mxu1  ;;  %v5200_v31 = vadd.f32 %v2525_v1, %v2437_v20  ;;  %2300 = vmatmul.bf16.gmra.mxu0 %v5663_v51 }
 0x418   :  { %v2351_v50 = vadd.f32 %v2350_v63, %v2262_v41  ;;  %v2601_v61 = vmax.f32 %v5200_v31, 0.0  ;;  %2389 = vmatmul.bf16.gmra.mxu1 %v5664_v40 }
 0x419   :  { %2478 = vmatmul.bf16.gmra.mxu2 %v5665_v26  ;;  %2567 = vmatmul.bf16.gmra.mxu3 %v5666_v6 }
 0x41a   :  { %v5210_v37 = vmax.f32 %v2585_v0, %v2601_v61 }
 0x41b   :  { %v2439_v46 = vpop.f32.mrf.mxu2 }
 0x41c   :  { %v2440_v39 = vadd.f32 %v2439_v46, %v2351_v50  ;;  %v2528_v3 = vpop.f32.mrf.mxu3  ;;  %v5537_v50 = vmax.f32 %v5153_v13, 0.0 }
 0x41d   :  { %v2263_v8 = vpop.f32.mrf.mxu0 }
 0x41e   :  { %v2264_v52 = vadd.f32 %v2263_v8, %v5050_v5  ;;  %v2352_v12 = vpop.f32.mrf.mxu1  ;;  %v5215_v22 = vadd.f32 %v2528_v3, %v2440_v39 }
 0x420   :  { %v2353_v2 = vadd.f32 %v2352_v12, %v2264_v52  ;;  %v5542_v14 = vmax.f32 %v5215_v22, 0.0  ;;  %v5535_v52 = vmax.f32 %v5156_v59, 0.0 }
 0x422   :  { %v5223_v35 = vmax.f32 %v5545_v54, %v5542_v14 }
 0x423   :  { %v2441_v19 = vpop.f32.mrf.mxu2 }
 0x424   :  { %v2442_v28 = vadd.f32 %v2441_v19, %v2353_v2  ;;  %v2530_v18 = vpop.f32.mrf.mxu3 }
 0x425   :  { %v2266_v32 = vpop.f32.mrf.mxu0 }
 0x426   :  { %v5225_v55 = vadd.f32 %v2530_v18, %v2442_v28  ;;  %v2267_v49 = vadd.f32 %v2266_v32, %v5050_v5  ;;  %v2355_v53 = vpop.f32.mrf.mxu1  ;;  %2305 = vmatmul.bf16.gmra.mxu0 %v5667_v9 }
 0x428   :  { %v5538_v47 = vmax.f32 %v5225_v55, 0.0  ;;  %v2356_v30 = vadd.f32 %v2355_v53, %v2267_v49  ;;  %2394 = vmatmul.bf16.gmra.mxu1 %v5668_v21 }
 0x429   :  { %2483 = vmatmul.bf16.gmra.mxu2 %v5669_v24  ;;  %2572 = vmatmul.bf16.gmra.mxu3 %v5670_v33 }
 0x42a   :  { %v5236_v43 = vmax.f32 %v5539_v7, %v5538_v47 }
 0x42c   :  { %v2444_v45 = vpop.f32.mrf.mxu2  ;;  %v2533_v57 = vpop.f32.mrf.mxu3 }
 0x42d   :  { %v2445_v62 = vadd.f32 %v2444_v45, %v2356_v30  ;;  %v2268_v20 = vpop.f32.mrf.mxu0 }
 0x42e   :  { %v2357_v1 = vpop.f32.mrf.mxu1  ;;  %v2269_v42 = vadd.f32 %v2268_v20, %v5050_v5 }
 0x42f   :  { %v5241_v41 = vadd.f32 %v2533_v57, %v2445_v62 }
 0x430   :  { %v2358_v63 = vadd.f32 %v2357_v1, %v2269_v42 }
 0x431   :  { %v5536_v51 = vmax.f32 %v5241_v41, 0.0 }
 0x433   :  { %v5249_v40 = vmax.f32 %v5537_v50, %v5536_v51 }
 0x434   :  { %v2446_v26 = vpop.f32.mrf.mxu2  ;;  %v2535_v6 = vpop.f32.mrf.mxu3 }
 0x435   :  { %v2447_v46 = vadd.f32 %v2446_v26, %v2358_v63  ;;  %v2271_v39 = vpop.f32.mrf.mxu0 }
 0x436   :  { %v5251_v3 = vpop.f32.mrf.mxu1 }
 0x437   :  { %v5253_v8 = vadd.f32 %v2535_v6, %v2447_v46 }
 0x439   :  { %v5534_v12 = vmax.f32 %v5253_v8, 0.0 }
 0x43b   :  { %v5261_v2 = vmax.f32 %v5535_v52, %v5534_v12 }
 0x43c   :  { %v5263_v19 = vpop.f32.mrf.mxu2  ;;  %v5265_v28 = vpop.f32.mrf.mxu3 }
 0x43d   :  { %v2273_v18 = vpop.f32.mrf.mxu0 }
 0x43e   :  { %v2362_v32 = vpop.f32.mrf.mxu1  ;;  %v2274_v49 = vadd.f32 %v2273_v18, %v5050_v5 }
 0x440   :  { %v2363_v53 = vadd.f32 %v2362_v32, %v2274_v49 }
 0x444   :  { %v2451_v30 = vpop.f32.mrf.mxu2  ;;  %v2540_v9 = vpop.f32.mrf.mxu3 }
 0x445   :  { %v2452_v21 = vadd.f32 %v2451_v30, %v2363_v53  ;;  %v5268_v24 = vpop.f32.mrf.mxu0 }
 0x446   :  { %v5270_v33 = vpop.f32.mrf.mxu1 }
 0x447   :  { %v5272_v45 = vadd.f32 %v2540_v9, %v2452_v21 }
 0x449   :  { %v2613_v57 = vmax.f32 %v5272_v45, 0.0 }
 0x44b   :  { %v5278_v62 = vmax.f32 %v5184_v60, %v2613_v57 }
 0x44c   :  { %v5280_v20 = vpop.f32.mrf.mxu2  ;;  %v5282_v1 = vpop.f32.mrf.mxu3 }
 0x44d   :  { %v2278_v42 = vpop.f32.mrf.mxu0 }
 0x44e   :  { %v2367_v63 = vpop.f32.mrf.mxu1  ;;  %v2279_v26 = vadd.f32 %v2278_v42, %v5050_v5 }
 0x450   :  { %v2368_v6 = vadd.f32 %v2367_v63, %v2279_v26 }
 0x454   :  { %v2456_v46 = vpop.f32.mrf.mxu2  ;;  %v2545_v18 = vpop.f32.mrf.mxu3 }
 0x455   :  { %v2457_v32 = vadd.f32 %v2456_v46, %v2368_v6  ;;  %v2281_v49 = vpop.f32.mrf.mxu0 }
 0x456   :  { %v2370_v53 = vpop.f32.mrf.mxu1  ;;  %v2282_v30 = vadd.f32 %v2281_v49, %v5050_v5 }
 0x457   :  { %v5286_v9 = vadd.f32 %v2545_v18, %v2457_v32 }
 0x458   :  { %v2371_v60 = vadd.f32 %v2370_v53, %v2282_v30 }
 0x459   :  { %v2617_v21 = vmax.f32 %v5286_v9, 0.0 }
 0x45b   :  { %v5292_v12 = vmax.f32 %v5210_v37, %v2617_v21 }
 0x45c   :  { %v2459_v52 = vpop.f32.mrf.mxu2  ;;  %v2548_v42 = vpop.f32.mrf.mxu3 }
 0x45d   :  { %v2460_v63 = vadd.f32 %v2459_v52, %v2371_v60  ;;  %v2283_v26 = vpop.f32.mrf.mxu0 }
 0x45e   :  { %v2372_v51 = vpop.f32.mrf.mxu1  ;;  %v2284_v6 = vadd.f32 %v2283_v26, %v5050_v5 }
 0x45f   :  { %v5295_v46 = vadd.f32 %v2548_v42, %v2460_v63 }
 0x460   :  { %v2373_v49 = vadd.f32 %v2372_v51, %v2284_v6 }
 0x461   :  { %v5540_v18 = vmax.f32 %v5295_v46, 0.0 }
 0x463   :  { %v5301_v32 = vmax.f32 %v5223_v35, %v5540_v18 }
 0x464   :  { %v2461_v53 = vpop.f32.mrf.mxu2  ;;  %v2550_v37 = vpop.f32.mrf.mxu3 }
 0x465   :  { %v2462_v30 = vadd.f32 %v2461_v53, %v2373_v49  ;;  %v2286_v50 = vpop.f32.mrf.mxu0  ;;  %v2272_v53 = vadd.f32 %v2271_v39, %v5050_v5 }
 0x466   :  { %v2375_v47 = vpop.f32.mrf.mxu1  ;;  %v2287_v52 = vadd.f32 %v2286_v50, %v5050_v5 }
 0x467   :  { %v5304_v60 = vadd.f32 %v2550_v37, %v2462_v30  ;;  %v2361_v30 = vadd.f32 %v5251_v3, %v2272_v53 }
 0x468   :  { %v2376_v26 = vadd.f32 %v2375_v47, %v2287_v52 }
 0x469   :  { %v5541_v42 = vmax.f32 %v5304_v60, 0.0 }
 0x46b   :  { %v5310_v51 = vmax.f32 %v5236_v43, %v5541_v42 }
 0x46c   :  { %v2464_v63 = vpop.f32.mrf.mxu2  ;;  %v2553_v35 = vpop.f32.mrf.mxu3 }
 0x46d   :  { %v2465_v6 = vadd.f32 %v2464_v63, %v2376_v26  ;;  %v2288_v7 = vpop.f32.mrf.mxu0  ;;  %v2450_v63 = vadd.f32 %v5263_v19, %v2361_v30 }
 0x46e   :  { %v2377_v18 = vpop.f32.mrf.mxu1  ;;  %v2289_v49 = vadd.f32 %v2288_v7, %v5050_v5 }
 0x46f   :  { %v5314_v50 = vadd.f32 %v2553_v35, %v2465_v6  ;;  %v2539_v35 = vadd.f32 %v5265_v28, %v2450_v63 }
 0x470   :  { %v2378_v37 = vadd.f32 %v2377_v18, %v2289_v49 }
 0x471   :  { %v5543_v47 = vmax.f32 %v5314_v50, 0.0  ;;  %v2611_v19 = vmax.f32 %v2539_v35, 0.0 }
 0x473   :  { %v5321_v43 = vmax.f32 %v5249_v40, %v5543_v47  ;;  %v2646_v63 = vmax.f32 %v5171_v23, %v2611_v19 }
 0x474   :  { %v2466_v52 = vpop.f32.mrf.mxu2  ;;  %v2555_v26 = vpop.f32.mrf.mxu3 }
 0x475   :  { %v2467_v42 = vadd.f32 %v2466_v52, %v2378_v37  ;;  %v2291_v7 = vpop.f32.mrf.mxu0 }
 0x476   :  { %v2380_v14 = vpop.f32.mrf.mxu1  ;;  %v2292_v18 = vadd.f32 %v2291_v7, %v5050_v5 }
 0x477   :  { %v5324_v39 = vadd.f32 %v2555_v26, %v2467_v42  ;;  %v2277_v42 = vadd.f32 %v5268_v24, %v5050_v5 }
 0x478   :  { %v2381_v6 = vadd.f32 %v2380_v14, %v2292_v18 }
 0x479   :  { %v5544_v3 = vmax.f32 %v5324_v39, 0.0  ;;  %v2366_v47 = vadd.f32 %v5270_v33, %v2277_v42 }
 0x47b   :  { %v5332_v40 = vmax.f32 %v5261_v2, %v5544_v3  ;;  %v2455_v35 = vadd.f32 %v5280_v20, %v2366_v47 }
 0x47c   :  { %v2469_v49 = vpop.f32.mrf.mxu2  ;;  %v2558_v53 = vpop.f32.mrf.mxu3 }
 0x47d   :  { %v2470_v37 = vadd.f32 %v2469_v49, %v2381_v6  ;;  %v2293_v30 = vpop.f32.mrf.mxu0 }
 0x47e   :  { %v2382_v52 = vpop.f32.mrf.mxu1  ;;  %v2294_v28 = vadd.f32 %v2293_v30, %v5050_v5 }
 0x47f   :  { %v2559_v26 = vadd.f32 %v2558_v53, %v2470_v37 }
 0x480   :  { %v2383_v3 = vadd.f32 %v2382_v52, %v2294_v28  ;;  %v2544_v28 = vadd.f32 %v5282_v1, %v2455_v35 }
 0x481   :  { %v2627_v7 = vmax.f32 %v2559_v26, 0.0 }
 0x483   :  { %v2647_v2 = vmax.f32 %v2646_v63, %v2627_v7 }
 0x484   :  { %v2471_v14 = vpop.f32.mrf.mxu2  ;;  %v2560_v18 = vpop.f32.mrf.mxu3 }
 0x485   :  { %v2691_v6 = vsub.f32 %v2579_v25, %v2647_v2  ;;  %v2707_v24 = vsub.f32 %v2595_v11, %v2647_v2  ;;  %v2723_v49 = vsub.f32 %v2611_v19, %v2647_v2  ;;  %v2296_v53 = vpop.f32.mrf.mxu0  ;;  %v2739_v30 = vsub.f32 %v2627_v7, %v2647_v2 }
 0x486   :  { %v2385_v37 = vpop.f32.mrf.mxu1  ;;  %v2472_v23 = vadd.f32 %v2471_v14, %v2383_v3  ;;  %v2297_v33 = vadd.f32 %v2296_v53, %v5050_v5  ;;  %v2615_v19 = vmax.f32 %v2544_v28, 0.0 }
 0x487   :  { %v2756_v26 = vmul.f32 1.442695, %v2691_v6  ;;  %v2788_v54 = vmul.f32 1.442695, %v2707_v24  ;;  %v2820_v52 = vmul.f32 1.442695, %v2723_v49 }
 0x488   :  { %v2561_v42 = vadd.f32 %v2560_v18, %v2472_v23  ;;  %v2852_v34 = vmul.f32 1.442695, %v2739_v30  ;;  %v2386_v20 = vadd.f32 %v2385_v37, %v2297_v33  ;;  %v2658_v53 = vmax.f32 %v5197_v16, %v2615_v19 }
 0x489   :  { %3888 = vpow2.f32 %v2756_v26 }
 0x48a   :  { %3890 = vpow2.f32 %v2788_v54  ;;  %v2629_v25 = vmax.f32 %v2561_v42, 0.0 }
 0x48b   :  { %3892 = vpow2.f32 %v2820_v52 }
 0x48c   :  { %v2653_v4 = vmax.f32 %v5278_v62, %v2629_v25  ;;  %v2474_v11 = vpop.f32.mrf.mxu2  ;;  %v2563_v47 = vpop.f32.mrf.mxu3  ;;  %3894 = vpow2.f32 %v2852_v34 }
 0x48d   :  { %v2475_v3 = vadd.f32 %v2474_v11, %v2386_v20  ;;  %v2298_v63 = vpop.f32.mrf.mxu0 }
 0x48e   :  { %v2387_v7 = vpop.f32.mrf.mxu1  ;;  %v2693_v2 = vsub.f32 %v2581_v56, %v2653_v4  ;;  %v2709_v1 = vsub.f32 %v2597_v38, %v2653_v4  ;;  %v2725_v54 = vsub.f32 %v2613_v57, %v2653_v4  ;;  %v2741_v62 = vsub.f32 %v2629_v25, %v2653_v4 }
 0x48f   :  { %v3889_v14 = vpop.eup %3888  ;;  %v2564_v18 = vadd.f32 %v2563_v47, %v2475_v3  ;;  %v2299_v49 = vadd.f32 %v2298_v63, %v5050_v5 }
 0x490   :  { %v3891_v35 = vpop.eup %3890  ;;  %v2760_v6 = vmul.f32 1.442695, %v2693_v2  ;;  %v2792_v24 = vmul.f32 1.442695, %v2709_v1  ;;  %v2824_v30 = vmul.f32 1.442695, %v2725_v54 }
 0x491   :  { %v2885_v37 = vadd.f32 %v3891_v35, %v3889_v14  ;;  %v2631_v10 = vmax.f32 %v2564_v18, 0.0  ;;  %v3893_v56 = vpop.eup %3892  ;;  %v2856_v57 = vmul.f32 1.442695, %v2741_v62  ;;  %v2388_v23 = vadd.f32 %v2387_v7, %v2299_v49 }
 0x492   :  { %3896 = vpow2.f32 %v2760_v6  ;;  %v3895_v45 = vpop.eup %3894 }
 0x493   :  { %v2886_v27 = vadd.f32 %v3893_v56, %v2885_v37  ;;  %3898 = vpow2.f32 %v2792_v24  ;;  %v2659_v38 = vmax.f32 %v2658_v53, %v2631_v10 }
 0x494   :  { %v2476_v26 = vpop.f32.mrf.mxu2  ;;  %v2565_v33 = vpop.f32.mrf.mxu3  ;;  %3900 = vpow2.f32 %v2824_v30 }
 0x495   :  { %v2887_v52 = vadd.f32 %v3895_v45, %v2886_v27  ;;  %v2695_v42 = vsub.f32 %v2583_v58, %v2659_v38  ;;  %v2711_v16 = vsub.f32 %v2599_v17, %v2659_v38  ;;  %v2301_v28 = vpop.f32.mrf.mxu0  ;;  %v2727_v34 = vsub.f32 %v2615_v19, %v2659_v38 }
 0x496   :  { %v2743_v25 = vsub.f32 %v2631_v10, %v2659_v38  ;;  %v2477_v20 = vadd.f32 %v2476_v26, %v2388_v23  ;;  %v2390_v4 = vpop.f32.mrf.mxu1  ;;  %v2302_v3 = vadd.f32 %v2301_v28, %v5050_v5 }
 0x497   :  { %3902 = vrcp.f32 %v2887_v52  ;;  %v2764_v11 = vmul.f32 1.442695, %v2695_v42  ;;  %v2796_v47 = vmul.f32 1.442695, %v2711_v16  ;;  %v2828_v7 = vmul.f32 1.442695, %v2727_v34 }
 0x498   :  { %v5360_v63 = vpop.eup %3896  ;;  %3904 = vpow2.f32 %v2856_v57  ;;  %v2566_v2 = vadd.f32 %v2565_v33, %v2477_v20  ;;  %v2860_v36 = vmul.f32 1.442695, %v2743_v25  ;;  %v2391_v1 = vadd.f32 %v2390_v4, %v2302_v3  ;;  %v4002_v42 = vld [vmem:[#allocation2 + $0x8] sm:$0xff] }
 0x499   :  { %v5362_v15 = vpop.eup %3898  ;;  %3906 = vpow2.f32 %v2764_v11  ;;  %v4005_v3 = vld [vmem:[#allocation2 + $0x188] sm:$0xff] }
 0x49a   :  { %v2891_v58 = vadd.f32 %v5362_v15, %v5360_v63  ;;  %3908 = vpow2.f32 %v2796_v47  ;;  %v2633_v17 = vmax.f32 %v2566_v2, 0.0  ;;  %v5366_v19 = vpop.eup %3900 }
 0x49b   :  { %3910 = vpow2.f32 %v2828_v7 }
 0x49c   :  { %v2892_v54 = vadd.f32 %v5366_v19, %v2891_v58  ;;  %v2665_v18 = vmax.f32 %v5292_v12, %v2633_v17  ;;  %v2479_v62 = vpop.f32.mrf.mxu2  ;;  %v2568_v6 = vpop.f32.mrf.mxu3  ;;  %3912 = vpow2.f32 %v2860_v36 }
 0x49d   :  { %v3903_v24 = vpop.eup %3902  ;;  %v2480_v49 = vadd.f32 %v2479_v62, %v2391_v1  ;;  %v2303_v53 = vpop.f32.mrf.mxu0 }
 0x49e   :  { %v3905_v37 = vpop.eup %3904  ;;  %v2947_v30 = vmul.f32 %v3903_v24, %v3889_v14  ;;  %v2963_v10 = vmul.f32 %v3903_v24, %v3891_v35  ;;  %v2979_v27 = vmul.f32 %v3903_v24, %v3893_v56  ;;  %v2995_v38 = vmul.f32 %v3903_v24, %v3895_v45  ;;  %v4003_v14 = vld [vmem:[#allocation2 + $0x88] sm:$0xff]  ;;  %v2392_v28 = vpop.f32.mrf.mxu1 }
 0x49f   :  { %v5370_v57 = vpop.eup %3906  ;;  %v2893_v23 = vadd.f32 %v3905_v37, %v2892_v54  ;;  %v2697_v26 = vsub.f32 %v2585_v0, %v2665_v18  ;;  %v2713_v12 = vsub.f32 %v2601_v61, %v2665_v18  ;;  %v2729_v33 = vsub.f32 %v2617_v21, %v2665_v18  ;;  %v4004_v56 = vld [vmem:[#allocation2 + $0x108] sm:$0xff] }
 0x4a0   :  { %v5378_v52 = vpop.eup %3908  ;;  %v3011_v16 = vmul.f32 %v4002_v42, %v2947_v30  ;;  %v3027_v35 = vmul.f32 %v4003_v14, %v2963_v10  ;;  %v3043_v45 = vmul.f32 %v4004_v56, %v2979_v27  ;;  %v2745_v0 = vsub.f32 %v2633_v17, %v2665_v18 }
 0x4a1   :  { %3914 = vrcp.f32 %v2893_v23  ;;  %v2897_v48 = vadd.f32 %v5378_v52, %v5370_v57  ;;  %v2768_v34 = vmul.f32 1.442695, %v2697_v26  ;;  %v5382_v31 = vpop.eup %3910  ;;  %v2800_v9 = vmul.f32 1.442695, %v2713_v12 }
 0x4a2   :  { %v3077_v61 = vadd.f32 %v3027_v35, %v3011_v16  ;;  %v2832_v21 = vmul.f32 1.442695, %v2729_v33  ;;  %v2569_v25 = vadd.f32 %v2568_v6, %v2480_v49  ;;  %v3913_v20 = vpop.eup %3912  ;;  %v2864_v11 = vmul.f32 1.442695, %v2745_v0  ;;  %v4007_v35 = vld [vmem:[#allocation2 + $0x98] sm:$0xff] }
 0x4a3   :  { %v2898_v4 = vadd.f32 %v5382_v31, %v2897_v48  ;;  %3916 = vpow2.f32 %v2768_v34  ;;  %v2304_v47 = vadd.f32 %v2303_v53, %v5050_v5  ;;  %v3059_v7 = vmul.f32 %v4005_v3, %v2995_v38  ;;  %v4009_v34 = vld [vmem:[#allocation2 + $0x198] sm:$0xff] }
 0x4a4   :  { %v3078_v2 = vadd.f32 %v3077_v61, %v3043_v45  ;;  %3918 = vpow2.f32 %v2800_v9  ;;  %v2635_v36 = vmax.f32 %v2569_v25, 0.0  ;;  %v2481_v58 = vpop.f32.mrf.mxu2  ;;  %v2570_v17 = vpop.f32.mrf.mxu3  ;;  %v5671_v23 = vmax.f32 %v5143_v44, 0.0 }
 0x4a5   :  { %v2899_v1 = vadd.f32 %v3913_v20, %v2898_v4  ;;  %3920 = vpow2.f32 %v2832_v21  ;;  %v2393_v54 = vadd.f32 %v2392_v28, %v2304_v47  ;;  %v2306_v18 = vpop.f32.mrf.mxu0  ;;  %v5672_v12 = vmax.f32 %v5215_v22, 0.0 }
 0x4a6   :  { %v3079_v62 = vadd.f32 %v3078_v2, %v3059_v7  ;;  %3922 = vpow2.f32 %v2864_v11  ;;  %v2671_v6 = vmax.f32 %v5301_v32, %v2635_v36  ;;  %v5673_v32 = vmax.f32 %v5295_v46, 0.0  ;;  %v4008_v46 = vld [vmem:[#allocation2 + $0x118] sm:$0xff] }
 0x4a7   :  { %v3915_v24 = vpop.eup %3914  ;;  %3924 = vrcp.f32 %v2899_v1  ;;  %v2482_v49 = vadd.f32 %v2481_v58, %v2393_v54  ;;  %v2307_v16 = vadd.f32 %v2306_v18, %v5050_v5 }
 0x4a8   :  { %3123 = vst [vmem:[#allocation10 + $0x8] sm:$0xff] %v3079_v62  ;;  %v2949_v53 = vmul.f32 %v3915_v24, %v5360_v63  ;;  %v2965_v30 = vmul.f32 %v3915_v24, %v5362_v15  ;;  %v2981_v10 = vmul.f32 %v3915_v24, %v5366_v19  ;;  %v2997_v27 = vmul.f32 %v3915_v24, %v3905_v37  ;;  %v4006_v63 = vld [vmem:[#allocation2 + $0x18] sm:$0xff]  ;;  %v2395_v37 = vpop.f32.mrf.mxu1  ;;  %v4010_v24 = vld [vmem:[#allocation2 + $0x28] sm:$0xff] }
 0x4a9   :  { %v5390_v38 = vpop.eup %3916  ;;  %v2699_v26 = vsub.f32 %v5671_v23, %v2671_v6  ;;  %v2715_v33 = vsub.f32 %v5672_v12, %v2671_v6  ;;  %v2731_v42 = vsub.f32 %v5673_v32, %v2671_v6  ;;  %v2747_v45 = vsub.f32 %v2635_v36, %v2671_v6 }
 0x4aa   :  { %v5399_v14 = vpop.eup %3918  ;;  %v3013_v15 = vmul.f32 %v4006_v63, %v2949_v53  ;;  %v3029_v19 = vmul.f32 %v4007_v35, %v2965_v30  ;;  %v3045_v0 = vmul.f32 %v4008_v46, %v2981_v10  ;;  %v3061_v61 = vmul.f32 %v4009_v34, %v2997_v27  ;;  %v4011_v53 = vld [vmem:[#allocation2 + $0xa8] sm:$0xff] }
 0x4ab   :  { %v5401_v56 = vpop.eup %3920  ;;  %v2903_v44 = vadd.f32 %v5399_v14, %v5390_v38  ;;  %v2772_v22 = vmul.f32 1.442695, %v2699_v26  ;;  %v2804_v28 = vmul.f32 1.442695, %v2715_v33  ;;  %v2571_v21 = vadd.f32 %v2570_v17, %v2482_v49 }
 0x4ac   :  { %v5405_v48 = vpop.eup %3922  ;;  %v3083_v9 = vadd.f32 %v3029_v19, %v3013_v15  ;;  %v2484_v25 = vpop.f32.mrf.mxu2  ;;  %v2836_v47 = vmul.f32 1.442695, %v2731_v42  ;;  %v2396_v3 = vadd.f32 %v2395_v37, %v2307_v16  ;;  %v2868_v10 = vmul.f32 1.442695, %v2747_v45 }
 0x4ad   :  { %v3925_v4 = vpop.eup %3924  ;;  %v2904_v11 = vadd.f32 %v5401_v56, %v2903_v44  ;;  %3926 = vpow2.f32 %v2772_v22  ;;  %v2573_v1 = vpop.f32.mrf.mxu3  ;;  %v2637_v17 = vmax.f32 %v2571_v21, 0.0  ;;  %v5674_v12 = vmax.f32 %v5146_v29, 0.0 }
 0x4ae   :  { %v3084_v7 = vadd.f32 %v3083_v9, %v3045_v0  ;;  %v2951_v2 = vmul.f32 %v3925_v4, %v5370_v57  ;;  %v2967_v36 = vmul.f32 %v3925_v4, %v5378_v52  ;;  %v2983_v58 = vmul.f32 %v3925_v4, %v5382_v31  ;;  %v2308_v62 = vpop.f32.mrf.mxu0  ;;  %v4012_v52 = vld [vmem:[#allocation2 + $0x128] sm:$0xff] }
 0x4af   :  { %v2999_v54 = vmul.f32 %v3925_v4, %v3913_v20  ;;  %v2905_v18 = vadd.f32 %v5405_v48, %v2904_v11  ;;  %3928 = vpow2.f32 %v2804_v28  ;;  %v2677_v57 = vmax.f32 %v5310_v51, %v2637_v17  ;;  %v4013_v51 = vld [vmem:[#allocation2 + $0x1a8] sm:$0xff] }
 0x4b0   :  { %v3085_v6 = vadd.f32 %v3084_v7, %v3061_v61  ;;  %v3015_v49 = vmul.f32 %v4010_v24, %v2951_v2  ;;  %v3031_v30 = vmul.f32 %v4011_v53, %v2967_v36  ;;  %v2485_v27 = vadd.f32 %v2484_v25, %v2396_v3  ;;  %v2397_v37 = vpop.f32.mrf.mxu1 }
 0x4b1   :  { %3930 = vrcp.f32 %v2905_v18  ;;  %v3047_v31 = vmul.f32 %v4012_v52, %v2983_v58  ;;  %v2309_v20 = vadd.f32 %v2308_v62, %v5050_v5  ;;  %v2701_v33 = vsub.f32 %v5674_v12, %v2677_v57  ;;  %v4014_v58 = vld [vmem:[#allocation2 + $0x38] sm:$0xff] }
 0x4b2   :  { %3125 = vst [vmem:[#allocation10 + $0x18] sm:$0xff] %v3085_v6  ;;  %v3089_v23 = vadd.f32 %v3031_v30, %v3015_v49  ;;  %3932 = vpow2.f32 %v2836_v47  ;;  %v5675_v32 = vmax.f32 %v5225_v55, 0.0  ;;  %v5676_v16 = vmax.f32 %v5304_v60, 0.0  ;;  %v4016_v6 = vld [vmem:[#allocation2 + $0x138] sm:$0xff] }
 0x4b3   :  { %v5414_v26 = vpop.eup %3926  ;;  %v3063_v15 = vmul.f32 %v4013_v51, %v2999_v54  ;;  %3934 = vpow2.f32 %v2868_v10  ;;  %v2574_v19 = vadd.f32 %v2573_v1, %v2485_v27  ;;  %v2776_v5 = vmul.f32 1.442695, %v2701_v33  ;;  %v4015_v54 = vld [vmem:[#allocation2 + $0xb8] sm:$0xff] }
 0x4b4   :  { %v2717_v42 = vsub.f32 %v5675_v32, %v2677_v57  ;;  %v2733_v63 = vsub.f32 %v5676_v16, %v2677_v57  ;;  %v3090_v35 = vadd.f32 %v3089_v23, %v3047_v31  ;;  %v2486_v44 = vpop.f32.mrf.mxu2  ;;  %v2398_v28 = vadd.f32 %v2397_v37, %v2309_v20  ;;  %v4017_v31 = vld [vmem:[#allocation2 + $0x1b8] sm:$0xff] }
 0x4b5   :  { %v5422_v45 = vpop.eup %3928  ;;  %v2749_v46 = vsub.f32 %v2637_v17, %v2677_v57  ;;  %v2639_v0 = vmax.f32 %v2574_v19, 0.0  ;;  %3936 = vpow2.f32 %v2776_v5  ;;  %v2575_v47 = vpop.f32.mrf.mxu3  ;;  %v5680_v16 = vmax.f32 %v5156_v59, 0.0 }
 0x4b6   :  { %v2808_v22 = vmul.f32 1.442695, %v2717_v42  ;;  %v3091_v29 = vadd.f32 %v3090_v35, %v3063_v15  ;;  %v2909_v55 = vadd.f32 %v5422_v45, %v5414_v26  ;;  %v2840_v34 = vmul.f32 1.442695, %v2733_v63 }
 0x4b7   :  { %v3931_v60 = vpop.eup %3930  ;;  %v2487_v61 = vadd.f32 %v2486_v44, %v2398_v28  ;;  %v2683_v7 = vmax.f32 %v5321_v43, %v2639_v0  ;;  %v2872_v17 = vmul.f32 1.442695, %v2749_v46  ;;  %v5679_v43 = vmax.f32 %v5314_v50, 0.0 }
 0x4b8   :  { %v3933_v9 = vpop.eup %3932  ;;  %3127 = vst [vmem:[#allocation10 + $0x28] sm:$0xff] %v3091_v29  ;;  %v2953_v21 = vmul.f32 %v3931_v60, %v5390_v38  ;;  %v2969_v25 = vmul.f32 %v3931_v60, %v5399_v14  ;;  %v2985_v4 = vmul.f32 %v3931_v60, %v5401_v56  ;;  %v3001_v11 = vmul.f32 %v3931_v60, %v5405_v48 }
 0x4b9   :  { %v2910_v3 = vadd.f32 %v3933_v9, %v2909_v55  ;;  %3938 = vpow2.f32 %v2808_v22  ;;  %v2576_v2 = vadd.f32 %v2575_v47, %v2487_v61  ;;  %v3935_v36 = vpop.eup %3934  ;;  %v5677_v38 = vmax.f32 %v5153_v13, 0.0  ;;  %v4019_v61 = vld [vmem:[#allocation2 + $0xc8] sm:$0xff] }
 0x4ba   :  { %v3017_v1 = vmul.f32 %v4014_v58, %v2953_v21  ;;  %v3033_v18 = vmul.f32 %v4015_v54, %v2969_v25  ;;  %3940 = vpow2.f32 %v2840_v34  ;;  %v5678_v56 = vmax.f32 %v5241_v41, 0.0  ;;  %v4020_v47 = vld [vmem:[#allocation2 + $0x148] sm:$0xff] }
 0x4bb   :  { %v2911_v62 = vadd.f32 %v3935_v36, %v2910_v3  ;;  %v2703_v14 = vsub.f32 %v5677_v38, %v2683_v7  ;;  %v3049_v24 = vmul.f32 %v4016_v6, %v2985_v4  ;;  %v2735_v53 = vsub.f32 %v5679_v43, %v2683_v7  ;;  %v5437_v10 = vpop.eup %3936 }
 0x4bc   :  { %v2719_v48 = vsub.f32 %v5678_v56, %v2683_v7  ;;  %v3095_v49 = vadd.f32 %v3033_v18, %v3017_v1  ;;  %v2751_v30 = vsub.f32 %v2639_v0, %v2683_v7  ;;  %v2641_v52 = vmax.f32 %v2576_v2, 0.0  ;;  %v4021_v2 = vld [vmem:[#allocation2 + $0x1c8] sm:$0xff] }
 0x4bd   :  { %3942 = vrcp.f32 %v2911_v62  ;;  %v2780_v57 = vmul.f32 1.442695, %v2703_v14  ;;  %v3065_v23 = vmul.f32 %v4017_v31, %v3001_v11  ;;  %v2844_v20 = vmul.f32 1.442695, %v2735_v53  ;;  %v4023_v53 = vld [vmem:[#allocation2 + $0xd8] sm:$0xff] }
 0x4be   :  { %v2812_v27 = vmul.f32 1.442695, %v2719_v48  ;;  %v3096_v13 = vadd.f32 %v3095_v49, %v3049_v24  ;;  %3944 = vpow2.f32 %v2872_v17  ;;  %v2876_v12 = vmul.f32 1.442695, %v2751_v30  ;;  %v4022_v49 = vld [vmem:[#allocation2 + $0x58] sm:$0xff] }
 0x4bf   :  { %v3939_v41 = vpop.eup %3938  ;;  %3946 = vpow2.f32 %v2780_v57  ;;  %v2689_v33 = vmax.f32 %v5332_v40, %v2641_v52  ;;  %v5681_v51 = vmax.f32 %v5253_v8, 0.0  ;;  %v5682_v35 = vmax.f32 %v5324_v39, 0.0  ;;  %v4018_v39 = vld [vmem:[#allocation2 + $0x48] sm:$0xff] }
 0x4c0   :  { %v3097_v32 = vadd.f32 %v3096_v13, %v3065_v23  ;;  %v2915_v50 = vadd.f32 %v3939_v41, %v5437_v10  ;;  %3948 = vpow2.f32 %v2812_v27  ;;  %v3941_v42 = vpop.eup %3940 }
 0x4c1   :  { %v2705_v63 = vsub.f32 %v5680_v16, %v2689_v33  ;;  %v2721_v15 = vsub.f32 %v5681_v51, %v2689_v33  ;;  %v2737_v19 = vsub.f32 %v5682_v35, %v2689_v33  ;;  %3950 = vpow2.f32 %v2844_v20  ;;  %v4025_v20 = vld [vmem:[#allocation2 + $0x1d8] sm:$0xff] }
 0x4c2   :  { %3129 = vst [vmem:[#allocation10 + $0x38] sm:$0xff] %v3097_v32  ;;  %v2916_v37 = vadd.f32 %v3941_v42, %v2915_v50  ;;  %3952 = vpow2.f32 %v2876_v12  ;;  %v2753_v40 = vsub.f32 %v2641_v52, %v2689_v33  ;;  %v4024_v52 = vld [vmem:[#allocation2 + $0x158] sm:$0xff] }
 0x4c3   :  { %v3943_v44 = vpop.eup %3942  ;;  %v2784_v5 = vmul.f32 1.442695, %v2705_v63  ;;  %v2816_v22 = vmul.f32 1.442695, %v2721_v15  ;;  %v2848_v25 = vmul.f32 1.442695, %v2737_v19 }
 0x4c4   :  { %v3945_v28 = vpop.eup %3944  ;;  %v2955_v29 = vmul.f32 %v3943_v44, %v5414_v26  ;;  %v2971_v59 = vmul.f32 %v3943_v44, %v5422_v45  ;;  %v2987_v55 = vmul.f32 %v3943_v44, %v3933_v9  ;;  %v3003_v46 = vmul.f32 %v3943_v44, %v3935_v36  ;;  %v4026_v63 = vld [vmem:[#allocation2 + $0x68] sm:$0xff] }
 0x4c5   :  { %v3947_v8 = vpop.eup %3946  ;;  %v2917_v0 = vadd.f32 %v3945_v28, %v2916_v37  ;;  %3954 = vpow2.f32 %v2784_v5  ;;  %v2880_v26 = vmul.f32 1.442695, %v2753_v40  ;;  %v4027_v15 = vld [vmem:[#allocation2 + $0xe8] sm:$0xff] }
 0x4c6   :  { %v3949_v60 = vpop.eup %3948  ;;  %v3019_v34 = vmul.f32 %v4018_v39, %v2955_v29  ;;  %v3035_v21 = vmul.f32 %v4019_v61, %v2971_v59  ;;  %v3051_v3 = vmul.f32 %v4020_v47, %v2987_v55  ;;  %v3067_v36 = vmul.f32 %v4021_v2, %v3003_v46  ;;  %v4028_v19 = vld [vmem:[#allocation2 + $0x168] sm:$0xff]  ;;  %v4031_v39 = vld [vmem:[#allocation2 + $0xf8] sm:$0xff] }
 0x4c7   :  { %3956 = vrcp.f32 %v2917_v0  ;;  %v2921_v4 = vadd.f32 %v3949_v60, %v3947_v8  ;;  %v3951_v11 = vpop.eup %3950  ;;  %v4029_v40 = vld [vmem:[#allocation2 + $0x1e8] sm:$0xff]  ;;  %v4030_v0 = vld [vmem:[#allocation2 + $0x78] sm:$0xff] }
 0x4c8   :  { %v3101_v7 = vadd.f32 %v3035_v21, %v3019_v34  ;;  %3958 = vpow2.f32 %v2816_v22  ;;  %v3953_v45 = vpop.eup %3952  ;;  %v4032_v61 = vld [vmem:[#allocation2 + $0x178] sm:$0xff] }
 0x4c9   :  { %v2922_v9 = vadd.f32 %v3951_v11, %v2921_v4  ;;  %3960 = vpow2.f32 %v2848_v25  ;;  %v4033_v4 = vld [vmem:[#allocation2 + $0x1f8] sm:$0xff] }
 0x4ca   :  { %v3102_v58 = vadd.f32 %v3101_v7, %v3051_v3  ;;  %3962 = vpow2.f32 %v2880_v26 }
 0x4cb   :  { %v2923_v1 = vadd.f32 %v3953_v45, %v2922_v9  ;;  %v3955_v54 = vpop.eup %3954 }
 0x4cc   :  { %v3103_v18 = vadd.f32 %v3102_v58, %v3067_v36 }
 0x4cd   :  { %v3957_v17 = vpop.eup %3956  ;;  %3964 = vrcp.f32 %v2923_v1 }
 0x4ce   :  { %v3959_v62 = vpop.eup %3958  ;;  %3131 = vst [vmem:[#allocation10 + $0x48] sm:$0xff] %v3103_v18  ;;  %v2957_v38 = vmul.f32 %v3957_v17, %v5437_v10  ;;  %v2973_v14 = vmul.f32 %v3957_v17, %v3939_v41  ;;  %v2989_v56 = vmul.f32 %v3957_v17, %v3941_v42  ;;  %v3005_v48 = vmul.f32 %v3957_v17, %v3945_v28 }
 0x4cf   :  { %v2927_v6 = vadd.f32 %v3959_v62, %v3955_v54  ;;  %v3961_v24 = vpop.eup %3960 }
 0x4d0   :  { %v3021_v43 = vmul.f32 %v4022_v49, %v2957_v38  ;;  %v3037_v30 = vmul.f32 %v4023_v53, %v2973_v14  ;;  %v3963_v27 = vpop.eup %3962  ;;  %v3053_v31 = vmul.f32 %v4024_v52, %v2989_v56  ;;  %v3069_v12 = vmul.f32 %v4025_v20, %v3005_v48 }
 0x4d1   :  { %v2928_v57 = vadd.f32 %v3961_v24, %v2927_v6 }
 0x4d2   :  { %v3107_v23 = vadd.f32 %v3037_v30, %v3021_v43 }
 0x4d3   :  { %v3965_v13 = vpop.eup %3964  ;;  %v2929_v33 = vadd.f32 %v3963_v27, %v2928_v57 }
 0x4d4   :  { %v3108_v32 = vadd.f32 %v3107_v23, %v3053_v31  ;;  %v2959_v10 = vmul.f32 %v3965_v13, %v3947_v8  ;;  %v2975_v41 = vmul.f32 %v3965_v13, %v3949_v60  ;;  %v2991_v50 = vmul.f32 %v3965_v13, %v3951_v11 }
 0x4d5   :  { %v3007_v42 = vmul.f32 %v3965_v13, %v3953_v45  ;;  %3966 = vrcp.f32 %v2929_v33 }
 0x4d6   :  { %v3109_v16 = vadd.f32 %v3108_v32, %v3069_v12  ;;  %v3023_v51 = vmul.f32 %v4026_v63, %v2959_v10  ;;  %v3039_v35 = vmul.f32 %v4027_v15, %v2975_v41  ;;  %v3055_v37 = vmul.f32 %v4028_v19, %v2991_v50 }
 0x4d7   :  { %v3071_v5 = vmul.f32 %v4029_v40, %v3007_v42 }
 0x4d8   :  { %3133 = vst [vmem:[#allocation10 + $0x58] sm:$0xff] %v3109_v16  ;;  %v3113_v44 = vadd.f32 %v3039_v35, %v3023_v51 }
 0x4da   :  { %v3114_v22 = vadd.f32 %v3113_v44, %v3055_v37 }
 0x4db   :  { %v3967_v28 = vpop.eup %3966 }
 0x4dc   :  { %v3115_v29 = vadd.f32 %v3114_v22, %v3071_v5  ;;  %v2961_v59 = vmul.f32 %v3967_v28, %v3955_v54  ;;  %v2977_v55 = vmul.f32 %v3967_v28, %v3959_v62  ;;  %v2993_v46 = vmul.f32 %v3967_v28, %v3961_v24 }
 0x4dd   :  { %v3009_v8 = vmul.f32 %v3967_v28, %v3963_v27 }
 0x4de   :  { %3135 = vst [vmem:[#allocation10 + $0x68] sm:$0xff] %v3115_v29  ;;  %v3025_v60 = vmul.f32 %v4030_v0, %v2961_v59  ;;  %v3041_v34 = vmul.f32 %v4031_v39, %v2977_v55  ;;  %v3057_v21 = vmul.f32 %v4032_v61, %v2993_v46 }
 0x4df   :  { %v3073_v11 = vmul.f32 %v4033_v4, %v3009_v8 }
 0x4e0   :  { %v3119_v25 = vadd.f32 %v3041_v34, %v3025_v60 }
 0x4e2   :  { %v3120_v47 = vadd.f32 %v3119_v25, %v3057_v21 }
 0x4e4   :  { %v3121_v3 = vadd.f32 %v3120_v47, %v3073_v11 }
 0x4e6   :  { %3137 = vst [vmem:[#allocation10 + $0x78] sm:$0xff] %v3121_v3 }
 0x4e7   :  { %3150 = dma.vmem_to_hbm [thread:$0]  %s3143_s17, 2048, %s3145_s20, [#allocation4], %s4163_s26, %s4163_s26, %s4164_s27  }
 0x4e8   :  { %4160 = dma.done.wait [#allocation4], 2048  }
 0x4e9   :  { %4161 = vsyncadd [#allocation4], 4294965248 }
 0x4ea   :  { %3155 = vsyncpa [#allocation3], 1 }
 0x4eb   :  { %3156 = vsyncpa [#allocation6], 1 }
 0x4ec   :  { %3157 = vsyncpa [#allocation9], 1 }
 0x4ed   :  { %3158 = vsyncpa [#allocation4], 1 }

</bundles_post_ra>
